<compile_context>
chip_gen: v7x
topology: tpu7x:2x2x1
jax: 0.10.0
libtpu: 0.0.40
codegen_flags: <defaults>
</compile_context>

<pallas_src>
import functools

import jax
import jax.numpy as jnp
from jax.experimental import pallas as pl
from jax.experimental.pallas import tpu as pltpu


# -----------------------------------------------------------------------------
# Static configuration (synthetic backbone widths; head sizes come from params)
# -----------------------------------------------------------------------------
LANE = 128        # TPU lane width: every feature dim is zero-padded to this
TB = 8            # batch tile (multiple of 8 sublanes); grid axis over tiles
C1 = 16           # logical conv1 output channels (synthetic backbone)
C2 = 32           # logical conv2 output channels (synthetic backbone)
KH = KW = 3
STRIDE = 2
PAD = 1


# -----------------------------------------------------------------------------
# Fused Pallas kernel: conv1 + conv2 + embedding + fc1 + fc2 for one batch tile
# -----------------------------------------------------------------------------
def _fused_forward_kernel(p1_ref, w1_ref, b1_ref, w2_ref, b2_ref,
                          we_ref, be_ref, w3_ref, b3_ref, w4_ref, b4_ref,
                          o_ref, scr_ref, *, tb, oh1, ow1, oh2, ow2):
    lane = w1_ref.shape[1]
    hp = scr_ref.shape[0] // 2        # parity-plane height of padded activation
    wp = scr_ref.shape[1] // 2
    hw = ow1 // 2                     # conv1 columns per column-parity

    b1 = b1_ref[...]
    b2 = b2_ref[...]

    # --- conv1 ---------------------------------------------------------------
    # Zero the padded-activation scratch; the border cells that are never
    # overwritten below implement the conv2 zero padding.
    scr_ref[...] = jnp.zeros(scr_ref.shape, scr_ref.dtype)

    rows_pc = 2 * ow1 * tb            # im2col rows for 2 conv1 output rows
    for a in range(oh1 // 2):         # chunk = output rows (2a, 2a+1)
        chunk = p1_ref[a * rows_pc:(a + 1) * rows_pc, :]
        y = jnp.dot(chunk, w1_ref[...], preferred_element_type=jnp.float32)
        y = jnp.maximum(y + b1, 0.0)
        # rows ordered (row-in-pair, col, image); split cols into (half, parity)
        y = y.reshape(2, hw, 2, tb, lane)
        # padded coords: ih_p = 2a + s + 1, iw_p = 2b + q + 1
        # scratch dim0/dim1 index = parity * (hp|wp) + half  (parity-major)
        scr_ref[hp + a, wp:wp + hw, :, :] = y[0, :, 0]    # s=0,q=0 -> parity(1,1)
        scr_ref[hp + a, 1:1 + hw, :, :] = y[0, :, 1]      # s=0,q=1 -> parity(1,0)
        scr_ref[a + 1, wp:wp + hw, :, :] = y[1, :, 0]     # s=1,q=0 -> parity(0,1)
        scr_ref[a + 1, 1:1 + hw, :, :] = y[1, :, 1]       # s=1,q=1 -> parity(0,0)

    # --- conv2: one full-width matmul per tap --------------------------------
    rows2 = oh2 * ow2 * tb
    acc2 = jnp.zeros((rows2, lane), jnp.float32)
    for di in range(KH):
        for dj in range(KW):
            tap = di * KW + dj
            h0 = (di % 2) * hp + di // 2
            w0 = (dj % 2) * wp + dj // 2
            slab = scr_ref[h0:h0 + oh2, w0:w0 + ow2, :, :]   # (oh2, ow2, tb, lane)
            slab = slab.reshape(rows2, lane).astype(jnp.bfloat16)
            acc2 = acc2 + jnp.dot(slab, w2_ref[tap * lane:(tap + 1) * lane, :],
                                  preferred_element_type=jnp.float32)
    y2 = jnp.maximum(acc2 + b2, 0.0)          # rows ordered (pixel, image)

    # --- flatten folded into the embedding projection ------------------------
    emb = jnp.zeros((tb, lane), jnp.float32)
    for p2 in range(oh2 * ow2):
        blk = y2[p2 * tb:(p2 + 1) * tb, :].astype(jnp.bfloat16)
        emb = emb + jnp.dot(blk, we_ref[p2 * lane:(p2 + 1) * lane, :],
                            preferred_element_type=jnp.float32)
    emb = emb + be_ref[...]

    # --- classifier head: fc1 -> fc2 (no nonlinearity, as in PyTorch forward) -
    hid = jnp.dot(emb.astype(jnp.bfloat16), w3_ref[...],
                  preferred_element_type=jnp.float32) + b3_ref[...]
    o_ref[...] = jnp.dot(hid.astype(jnp.bfloat16), w4_ref[...],
                         preferred_element_type=jnp.float32) + b4_ref[...]


def _fused_forward(patches1, pw, n_tiles, p1_count, p2_count, oh1, ow1, oh2, ow2):
    rows1 = p1_count * TB
    hp = (oh1 + 2 * PAD + 1) // 2
    wp = (ow1 + 2 * PAD + 1) // 2
    kernel = functools.partial(_fused_forward_kernel, tb=TB,
                               oh1=oh1, ow1=ow1, oh2=oh2, ow2=ow2)

    args = (patches1, pw["conv1_w"], pw["conv1_b"], pw["conv2_w"], pw["conv2_b"],
            pw["emb_w"], pw["emb_b"], pw["fc1_w"], pw["fc1_b"],
            pw["fc2_w"], pw["fc2_b"])

    flops = 2 * n_tiles * LANE * LANE * (
        rows1                              # conv1
        + KH * KW * p2_count * TB          # conv2 (9 taps, padded = zeros)
        + p2_count * TB                    # embedding
        + 2 * TB)                          # fc1 + fc2
    bytes_accessed = (sum(a.size * a.dtype.itemsize for a in args)
                      + n_tiles * TB * LANE * 4)

    def full_block(a):
        nd = a.ndim
        return pl.BlockSpec(a.shape, lambda t, _nd=nd: (0,) * _nd)

    return pl.pallas_call(
        kernel,
        out_shape=jax.ShapeDtypeStruct((n_tiles * TB, LANE), jnp.float32),
        grid_spec=pltpu.PrefetchScalarGridSpec(
            num_scalar_prefetch=0,
            grid=(n_tiles,),
            in_specs=[pl.BlockSpec((rows1, LANE), lambda t: (t, 0))]
                     + [full_block(a) for a in args[1:]],
            out_specs=pl.BlockSpec((TB, LANE), lambda t: (t, 0)),
            scratch_shapes=[pltpu.VMEM((2 * hp, 2 * wp, TB, LANE), jnp.float32)],
        ),
        compiler_params=pltpu.CompilerParams(
            dimension_semantics=("parallel",),
            vmem_limit_bytes=32 * 1024 * 1024,
        ),
        cost_estimate=pl.CostEstimate(flops=flops, transcendentals=0,
                                      bytes_accessed=bytes_accessed),
    )(*args)


# -----------------------------------------------------------------------------
# Plain-JAX glue: im2col for conv1 only (stride-2 padded conv)
# -----------------------------------------------------------------------------
def _im2col(x_nhwc, kh, kw, stride, pad):
    n, h, w, c = x_nhwc.shape
    xp = jnp.pad(x_nhwc, ((0, 0), (pad, pad), (pad, pad), (0, 0)))
    oh = (h + 2 * pad - kh) // stride + 1
    ow = (w + 2 * pad - kw) // stride + 1
    cols = []
    for i in range(kh):
        for j in range(kw):
            cols.append(xp[:, i:i + (oh - 1) * stride + 1:stride,
                           j:j + (ow - 1) * stride + 1:stride, :])
    patches = jnp.stack(cols, axis=-2)                # (n, oh, ow, kh*kw, c)
    return patches.reshape(n, oh * ow, kh * kw * c), oh, ow


def _pad_to(a, shape):
    return jnp.pad(a, [(0, t - s) for s, t in zip(a.shape, shape)])


# -----------------------------------------------------------------------------
# Parameters (deterministic, synthetic — no checkpoint load), float32 logical
# -----------------------------------------------------------------------------
def init_params(key, in_channels, latent_dim, nb_classes, h, w):
    ks = jax.random.split(key, 10)

    def dense(k, fan_in, fan_out):
        return jax.random.normal(k, (fan_in, fan_out), jnp.float32) / jnp.sqrt(
            jnp.float32(fan_in))

    def bias(k, n_out):
        return jax.random.normal(k, (1, n_out), jnp.float32) * 0.01

    flat = C2 * (h // 4) * (w // 4)
    return {
        "conv1_w": dense(ks[0], KH * KW * in_channels, C1),
        "conv1_b": bias(ks[1], C1),
        "conv2_w": dense(ks[2], KH * KW * C1, C2),
        "conv2_b": bias(ks[3], C2),
        "emb_w": dense(ks[4], flat, latent_dim),
        "emb_b": bias(ks[5], latent_dim),
        "fc1_w": dense(ks[6], latent_dim, latent_dim),
        "fc1_b": bias(ks[7], latent_dim),
        "fc2_w": dense(ks[8], latent_dim, nb_classes),
        "fc2_b": bias(ks[9], nb_classes),
    }


# -----------------------------------------------------------------------------
# Forward pass (FucciClassifier.forward equivalent)
# -----------------------------------------------------------------------------
@jax.jit
def fucci_classifier_forward(x_nchw, params):
    n, c_in, h, w = x_nchw.shape
    latent = params["fc1_w"].shape[0]
    nb_classes = params["fc2_w"].shape[1]

    oh1 = (h + 2 * PAD - KH) // STRIDE + 1
    ow1 = (w + 2 * PAD - KW) // STRIDE + 1
    oh2 = (oh1 + 2 * PAD - KH) // STRIDE + 1
    ow2 = (ow1 + 2 * PAD - KW) // STRIDE + 1
    p1_count, p2_count = oh1 * ow1, oh2 * ow2

    # Shape assumptions of the in-kernel parity layout (stride-2, pad-1 stem).
    assert h % 4 == 0 and w % 4 == 0
    assert oh1 % 2 == 0 and ow1 % 2 == 0 and oh2 == oh1 // 2 and ow2 == ow1 // 2
    assert KH * KW * c_in <= LANE and C1 <= LANE and C2 <= LANE
    assert latent <= LANE and nb_classes <= LANE

    # ---- lane-pad weights to 128 (zero pad => numerics unchanged on the real
    #      slice) and cast matmul operands to bf16; biases stay f32 -----------
    pw = {
        "conv1_w": _pad_to(params["conv1_w"], (LANE, LANE)).astype(jnp.bfloat16),
        "conv1_b": _pad_to(params["conv1_b"], (1, LANE)),
        "conv2_w": _pad_to(params["conv2_w"].reshape(KH * KW, C1, C2),
                           (KH * KW, LANE, LANE))
                   .reshape(KH * KW * LANE, LANE).astype(jnp.bfloat16),
        "conv2_b": _pad_to(params["conv2_b"], (1, LANE)),
        "emb_w": _pad_to(params["emb_w"].reshape(p2_count, C2, latent),
                         (p2_count, LANE, LANE))
                 .reshape(p2_count * LANE, LANE).astype(jnp.bfloat16),
        "emb_b": _pad_to(params["emb_b"], (1, LANE)),
        "fc1_w": _pad_to(params["fc1_w"], (LANE, LANE)).astype(jnp.bfloat16),
        "fc1_b": _pad_to(params["fc1_b"], (1, LANE)),
        "fc2_w": _pad_to(params["fc2_w"], (LANE, LANE)).astype(jnp.bfloat16),
        "fc2_b": _pad_to(params["fc2_b"], (1, LANE)),
    }

    # ---- NCHW (PyTorch) -> NHWC, pad batch to a multiple of the batch tile --
    x = jnp.transpose(x_nchw, (0, 2, 3, 1)).astype(jnp.float32)
    n_pad = pl.cdiv(n, TB) * TB
    n_tiles = n_pad // TB
    x = jnp.pad(x, ((0, n_pad - n), (0, 0), (0, 0), (0, 0)))

    # ---- conv1 im2col; lane-pad K (9*c_in <= 128 here) and reorder rows to
    #      (tile, pixel, image) so the in-kernel conv2 taps are contiguous ----
    patches, _, _ = _im2col(x, KH, KW, STRIDE, PAD)   # (n_pad, P1, 9*c_in)
    patches = _pad_to(patches, (n_pad, p1_count, LANE))
    patches = patches.reshape(n_tiles, TB, p1_count, LANE)
    patches = patches.transpose(0, 2, 1, 3).reshape(n_tiles * p1_count * TB, LANE)
    patches = patches.astype(jnp.bfloat16)

    out = _fused_forward(patches, pw, n_tiles, p1_count, p2_count,
                         oh1, ow1, oh2, ow2)
    return out[:n, :nb_classes]


# -----------------------------------------------------------------------------
# Pure-JAX reference (f32) — mirrors the kernel math with the logical weights
# -----------------------------------------------------------------------------
def reference_forward(x_nchw, params):
    x = jnp.transpose(x_nchw, (0, 2, 3, 1)).astype(jnp.float32)
    n = x.shape[0]
    p1, oh1, ow1 = _im2col(x, KH, KW, STRIDE, PAD)
    y1 = jnp.maximum(jnp.einsum("npk,kc->npc", p1, params["conv1_w"])
                     + params["conv1_b"], 0.0)
    y1 = y1.reshape(n, oh1, ow1, C1)
    p2, _, _ = _im2col(y1, KH, KW, STRIDE, PAD)
    y2 = jnp.maximum(jnp.einsum("npk,kc->npc", p2, params["conv2_w"])
                     + params["conv2_b"], 0.0)
    flat = y2.reshape(n, -1)
    emb = flat @ params["emb_w"] + params["emb_b"]
    hid = emb @ params["fc1_w"] + params["fc1_b"]
    return hid @ params["fc2_w"] + params["fc2_b"]


if __name__ == "__main__":
    BATCH, CHANNELS, SPATIAL = 2, 4, 16
    LATENT_DIM, NB_CLASSES = 32, 3

    key = jax.random.PRNGKey(0)
    k_x, k_p = jax.random.split(key)
    x = jax.random.normal(k_x, (BATCH, CHANNELS, SPATIAL, SPATIAL), jnp.float32)
    params = init_params(k_p, CHANNELS, LATENT_DIM, NB_CLASSES, SPATIAL, SPATIAL)

    out = fucci_classifier_forward(x, params)
    out = jax.block_until_ready(out)

    assert out.shape == (BATCH, NB_CLASSES), out.shape
    assert bool(jnp.all(jnp.isfinite(out)))

    ref = reference_forward(x, params)
    # bf16 MXU operands vs f32 reference => loose-ish tolerance.
    assert bool(jnp.allclose(out, ref, atol=1e-1, rtol=1e-1)), (
        float(jnp.max(jnp.abs(out - ref))))
    print("KERNEL_OK")
</pallas_src>

<mosaic_0001>
module attributes {stable_mosaic.version = 11 : i64} {
  func.func @_fused_forward_kernel(%arg0: i32, %arg1: memref<512x128xbf16, #tpu.memory_space<vmem>>, %arg2: memref<128x128xbf16, #tpu.memory_space<vmem>>, %arg3: memref<1x128xf32, #tpu.memory_space<vmem>>, %arg4: memref<1152x128xbf16, #tpu.memory_space<vmem>>, %arg5: memref<1x128xf32, #tpu.memory_space<vmem>>, %arg6: memref<2048x128xbf16, #tpu.memory_space<vmem>>, %arg7: memref<1x128xf32, #tpu.memory_space<vmem>>, %arg8: memref<128x128xbf16, #tpu.memory_space<vmem>>, %arg9: memref<1x128xf32, #tpu.memory_space<vmem>>, %arg10: memref<128x128xbf16, #tpu.memory_space<vmem>>, %arg11: memref<1x128xf32, #tpu.memory_space<vmem>>, %arg12: memref<8x128xf32, #tpu.memory_space<vmem>>, %arg13: memref<10x10x8x128xf32, #tpu.memory_space<vmem>>) attributes {dimension_semantics = [#tpu.dimension_semantics<parallel>], iteration_bounds = array<i64: 1>, scalar_prefetch = 0 : i64, scratch_operands = 1 : i64, tpu.core_type = #tpu.core_type<tc>, window_params = [{transform_indices = @transform_0, window_bounds = array<i64: 512, 128>}, {pipeline_mode = #tpu.pipeline_mode<synchronous>, transform_indices = @transform_1, window_bounds = array<i64: 128, 128>}, {pipeline_mode = #tpu.pipeline_mode<synchronous>, transform_indices = @transform_2, window_bounds = array<i64: 1, 128>}, {pipeline_mode = #tpu.pipeline_mode<synchronous>, transform_indices = @transform_3, window_bounds = array<i64: 1152, 128>}, {pipeline_mode = #tpu.pipeline_mode<synchronous>, transform_indices = @transform_4, window_bounds = array<i64: 1, 128>}, {pipeline_mode = #tpu.pipeline_mode<synchronous>, transform_indices = @transform_5, window_bounds = array<i64: 2048, 128>}, {pipeline_mode = #tpu.pipeline_mode<synchronous>, transform_indices = @transform_6, window_bounds = array<i64: 1, 128>}, {pipeline_mode = #tpu.pipeline_mode<synchronous>, transform_indices = @transform_7, window_bounds = array<i64: 128, 128>}, {pipeline_mode = #tpu.pipeline_mode<synchronous>, transform_indices = @transform_8, window_bounds = array<i64: 1, 128>}, {pipeline_mode = #tpu.pipeline_mode<synchronous>, transform_indices = @transform_9, window_bounds = array<i64: 128, 128>}, {pipeline_mode = #tpu.pipeline_mode<synchronous>, transform_indices = @transform_10, window_bounds = array<i64: 1, 128>}, {transform_indices = @transform_11, window_bounds = array<i64: 8, 128>}]} {
    %c0 = arith.constant 0 : index
    %c0_0 = arith.constant 0 : index
    %0 = vector.load %arg3[%c0, %c0_0] : memref<1x128xf32, #tpu.memory_space<vmem>>, vector<1x128xf32>
    %c0_1 = arith.constant 0 : index
    %c0_2 = arith.constant 0 : index
    %1 = vector.load %arg5[%c0_1, %c0_2] : memref<1x128xf32, #tpu.memory_space<vmem>>, vector<1x128xf32>
    %cst = arith.constant 0.000000e+00 : f32
    %2 = vector.broadcast %cst : f32 to vector<10x10x8x128xf32>
    %c0_3 = arith.constant 0 : index
    %c0_4 = arith.constant 0 : index
    %c0_5 = arith.constant 0 : index
    %c0_6 = arith.constant 0 : index
    %3 = vector.load %arg13[%c0_3, %c0_4, %c0_5, %c0_6] : memref<10x10x8x128xf32, #tpu.memory_space<vmem>>, vector<10x10x8x128xf32>
    tpu.vector_store %arg13[%c0_3, %c0_4, %c0_5, %c0_6], %2 {strides = array<i32>} : memref<10x10x8x128xf32, #tpu.memory_space<vmem>>, vector<10x10x8x128xf32>,
    %c0_7 = arith.constant 0 : index
    %c0_8 = arith.constant 0 : index
    %4 = vector.load %arg1[%c0_7, %c0_8] : memref<512x128xbf16, #tpu.memory_space<vmem>>, vector<128x128xbf16>
    %c0_9 = arith.constant 0 : index
    %c0_10 = arith.constant 0 : index
    %5 = vector.load %arg2[%c0_9, %c0_10] : memref<128x128xbf16, #tpu.memory_space<vmem>>, vector<128x128xbf16>
    %cst_11 = arith.constant dense<0.000000e+00> : vector<128x128xf32>
    %6 = tpu.matmul %4, %5, %cst_11 {dimension_numbers = #tpu.dot_dimension_numbers<[1], [0], [0], [1], [0, 0, 1, 1], [], []>} : vector<128x128xbf16>, vector<128x128xbf16>, vector<128x128xf32> -> vector<128x128xf32>
    %7 = vector.broadcast %0 : vector<1x128xf32> to vector<128x128xf32>
    %8 = arith.addf %6, %7 : vector<128x128xf32>
    %cst_12 = arith.constant 0.000000e+00 : f32
    %9 = vector.broadcast %cst_12 : f32 to vector<128x128xf32>
    %10 = arith.maximumf %8, %9 : vector<128x128xf32>
    %11 = vector.shape_cast %10 : vector<128x128xf32> to vector<2x4x2x8x128xf32>
    %12 = vector.extract_strided_slice %11 {offsets = [0, 0, 0, 0, 0], sizes = [1, 4, 1, 8, 128], strides = [1, 1, 1, 1, 1]} : vector<2x4x2x8x128xf32> to vector<1x4x1x8x128xf32>
    %13 = vector.shape_cast %12 : vector<1x4x1x8x128xf32> to vector<4x8x128xf32>
    %c5 = arith.constant 5 : index
    %c5_13 = arith.constant 5 : index
    %c0_14 = arith.constant 0 : index
    %c0_15 = arith.constant 0 : index
    %14 = vector.load %arg13[%c5, %c5_13, %c0_14, %c0_15] : memref<10x10x8x128xf32, #tpu.memory_space<vmem>>, vector<1x4x8x128xf32>
    %15 = vector.shape_cast %14 : vector<1x4x8x128xf32> to vector<4x8x128xf32>
    %16 = vector.shape_cast %13 : vector<4x8x128xf32> to vector<1x4x8x128xf32>
    tpu.vector_store %arg13[%c5, %c5_13, %c0_14, %c0_15], %16 {strides = array<i32>} : memref<10x10x8x128xf32, #tpu.memory_space<vmem>>, vector<1x4x8x128xf32>,
    %17 = vector.extract_strided_slice %11 {offsets = [0, 0, 1, 0, 0], sizes = [1, 4, 1, 8, 128], strides = [1, 1, 1, 1, 1]} : vector<2x4x2x8x128xf32> to vector<1x4x1x8x128xf32>
    %18 = vector.shape_cast %17 : vector<1x4x1x8x128xf32> to vector<4x8x128xf32>
    %c5_16 = arith.constant 5 : index
    %c1 = arith.constant 1 : index
    %c0_17 = arith.constant 0 : index
    %c0_18 = arith.constant 0 : index
    %19 = vector.load %arg13[%c5_16, %c1, %c0_17, %c0_18] : memref<10x10x8x128xf32, #tpu.memory_space<vmem>>, vector<1x4x8x128xf32>
    %20 = vector.shape_cast %19 : vector<1x4x8x128xf32> to vector<4x8x128xf32>
    %21 = vector.shape_cast %18 : vector<4x8x128xf32> to vector<1x4x8x128xf32>
    tpu.vector_store %arg13[%c5_16, %c1, %c0_17, %c0_18], %21 {strides = array<i32>} : memref<10x10x8x128xf32, #tpu.memory_space<vmem>>, vector<1x4x8x128xf32>,
    %22 = vector.extract_strided_slice %11 {offsets = [1, 0, 0, 0, 0], sizes = [1, 4, 1, 8, 128], strides = [1, 1, 1, 1, 1]} : vector<2x4x2x8x128xf32> to vector<1x4x1x8x128xf32>
    %23 = vector.shape_cast %22 : vector<1x4x1x8x128xf32> to vector<4x8x128xf32>
    %c1_19 = arith.constant 1 : index
    %c5_20 = arith.constant 5 : index
    %c0_21 = arith.constant 0 : index
    %c0_22 = arith.constant 0 : index
    %24 = vector.load %arg13[%c1_19, %c5_20, %c0_21, %c0_22] : memref<10x10x8x128xf32, #tpu.memory_space<vmem>>, vector<1x4x8x128xf32>
    %25 = vector.shape_cast %24 : vector<1x4x8x128xf32> to vector<4x8x128xf32>
    %26 = vector.shape_cast %23 : vector<4x8x128xf32> to vector<1x4x8x128xf32>
    tpu.vector_store %arg13[%c1_19, %c5_20, %c0_21, %c0_22], %26 {strides = array<i32>} : memref<10x10x8x128xf32, #tpu.memory_space<vmem>>, vector<1x4x8x128xf32>,
    %27 = vector.extract_strided_slice %11 {offsets = [1, 0, 1, 0, 0], sizes = [1, 4, 1, 8, 128], strides = [1, 1, 1, 1, 1]} : vector<2x4x2x8x128xf32> to vector<1x4x1x8x128xf32>
    %28 = vector.shape_cast %27 : vector<1x4x1x8x128xf32> to vector<4x8x128xf32>
    %c1_23 = arith.constant 1 : index
    %c1_24 = arith.constant 1 : index
    %c0_25 = arith.constant 0 : index
    %c0_26 = arith.constant 0 : index
    %29 = vector.load %arg13[%c1_23, %c1_24, %c0_25, %c0_26] : memref<10x10x8x128xf32, #tpu.memory_space<vmem>>, vector<1x4x8x128xf32>
    %30 = vector.shape_cast %29 : vector<1x4x8x128xf32> to vector<4x8x128xf32>
    %31 = vector.shape_cast %28 : vector<4x8x128xf32> to vector<1x4x8x128xf32>
    tpu.vector_store %arg13[%c1_23, %c1_24, %c0_25, %c0_26], %31 {strides = array<i32>} : memref<10x10x8x128xf32, #tpu.memory_space<vmem>>, vector<1x4x8x128xf32>,
    %c128 = arith.constant 128 : index
    %c0_27 = arith.constant 0 : index
    %32 = vector.load %arg1[%c128, %c0_27] : memref<512x128xbf16, #tpu.memory_space<vmem>>, vector<128x128xbf16>
    %c0_28 = arith.constant 0 : index
    %c0_29 = arith.constant 0 : index
    %33 = vector.load %arg2[%c0_28, %c0_29] : memref<128x128xbf16, #tpu.memory_space<vmem>>, vector<128x128xbf16>
    %cst_30 = arith.constant dense<0.000000e+00> : vector<128x128xf32>
    %34 = tpu.matmul %32, %33, %cst_30 {dimension_numbers = #tpu.dot_dimension_numbers<[1], [0], [0], [1], [0, 0, 1, 1], [], []>} : vector<128x128xbf16>, vector<128x128xbf16>, vector<128x128xf32> -> vector<128x128xf32>
    %35 = vector.broadcast %0 : vector<1x128xf32> to vector<128x128xf32>
    %36 = arith.addf %34, %35 : vector<128x128xf32>
    %cst_31 = arith.constant 0.000000e+00 : f32
    %37 = vector.broadcast %cst_31 : f32 to vector<128x128xf32>
    %38 = arith.maximumf %36, %37 : vector<128x128xf32>
    %39 = vector.shape_cast %38 : vector<128x128xf32> to vector<2x4x2x8x128xf32>
    %40 = vector.extract_strided_slice %39 {offsets = [0, 0, 0, 0, 0], sizes = [1, 4, 1, 8, 128], strides = [1, 1, 1, 1, 1]} : vector<2x4x2x8x128xf32> to vector<1x4x1x8x128xf32>
    %41 = vector.shape_cast %40 : vector<1x4x1x8x128xf32> to vector<4x8x128xf32>
    %c6 = arith.constant 6 : index
    %c5_32 = arith.constant 5 : index
    %c0_33 = arith.constant 0 : index
    %c0_34 = arith.constant 0 : index
    %42 = vector.load %arg13[%c6, %c5_32, %c0_33, %c0_34] : memref<10x10x8x128xf32, #tpu.memory_space<vmem>>, vector<1x4x8x128xf32>
    %43 = vector.shape_cast %42 : vector<1x4x8x128xf32> to vector<4x8x128xf32>
    %44 = vector.shape_cast %41 : vector<4x8x128xf32> to vector<1x4x8x128xf32>
    tpu.vector_store %arg13[%c6, %c5_32, %c0_33, %c0_34], %44 {strides = array<i32>} : memref<10x10x8x128xf32, #tpu.memory_space<vmem>>, vector<1x4x8x128xf32>,
    %45 = vector.extract_strided_slice %39 {offsets = [0, 0, 1, 0, 0], sizes = [1, 4, 1, 8, 128], strides = [1, 1, 1, 1, 1]} : vector<2x4x2x8x128xf32> to vector<1x4x1x8x128xf32>
    %46 = vector.shape_cast %45 : vector<1x4x1x8x128xf32> to vector<4x8x128xf32>
    %c6_35 = arith.constant 6 : index
    %c1_36 = arith.constant 1 : index
    %c0_37 = arith.constant 0 : index
    %c0_38 = arith.constant 0 : index
    %47 = vector.load %arg13[%c6_35, %c1_36, %c0_37, %c0_38] : memref<10x10x8x128xf32, #tpu.memory_space<vmem>>, vector<1x4x8x128xf32>
    %48 = vector.shape_cast %47 : vector<1x4x8x128xf32> to vector<4x8x128xf32>
    %49 = vector.shape_cast %46 : vector<4x8x128xf32> to vector<1x4x8x128xf32>
    tpu.vector_store %arg13[%c6_35, %c1_36, %c0_37, %c0_38], %49 {strides = array<i32>} : memref<10x10x8x128xf32, #tpu.memory_space<vmem>>, vector<1x4x8x128xf32>,
    %50 = vector.extract_strided_slice %39 {offsets = [1, 0, 0, 0, 0], sizes = [1, 4, 1, 8, 128], strides = [1, 1, 1, 1, 1]} : vector<2x4x2x8x128xf32> to vector<1x4x1x8x128xf32>
    %51 = vector.shape_cast %50 : vector<1x4x1x8x128xf32> to vector<4x8x128xf32>
    %c2 = arith.constant 2 : index
    %c5_39 = arith.constant 5 : index
    %c0_40 = arith.constant 0 : index
    %c0_41 = arith.constant 0 : index
    %52 = vector.load %arg13[%c2, %c5_39, %c0_40, %c0_41] : memref<10x10x8x128xf32, #tpu.memory_space<vmem>>, vector<1x4x8x128xf32>
    %53 = vector.shape_cast %52 : vector<1x4x8x128xf32> to vector<4x8x128xf32>
    %54 = vector.shape_cast %51 : vector<4x8x128xf32> to vector<1x4x8x128xf32>
    tpu.vector_store %arg13[%c2, %c5_39, %c0_40, %c0_41], %54 {strides = array<i32>} : memref<10x10x8x128xf32, #tpu.memory_space<vmem>>, vector<1x4x8x128xf32>,
    %55 = vector.extract_strided_slice %39 {offsets = [1, 0, 1, 0, 0], sizes = [1, 4, 1, 8, 128], strides = [1, 1, 1, 1, 1]} : vector<2x4x2x8x128xf32> to vector<1x4x1x8x128xf32>
    %56 = vector.shape_cast %55 : vector<1x4x1x8x128xf32> to vector<4x8x128xf32>
    %c2_42 = arith.constant 2 : index
    %c1_43 = arith.constant 1 : index
    %c0_44 = arith.constant 0 : index
    %c0_45 = arith.constant 0 : index
    %57 = vector.load %arg13[%c2_42, %c1_43, %c0_44, %c0_45] : memref<10x10x8x128xf32, #tpu.memory_space<vmem>>, vector<1x4x8x128xf32>
    %58 = vector.shape_cast %57 : vector<1x4x8x128xf32> to vector<4x8x128xf32>
    %59 = vector.shape_cast %56 : vector<4x8x128xf32> to vector<1x4x8x128xf32>
    tpu.vector_store %arg13[%c2_42, %c1_43, %c0_44, %c0_45], %59 {strides = array<i32>} : memref<10x10x8x128xf32, #tpu.memory_space<vmem>>, vector<1x4x8x128xf32>,
    %c256 = arith.constant 256 : index
    %c0_46 = arith.constant 0 : index
    %60 = vector.load %arg1[%c256, %c0_46] : memref<512x128xbf16, #tpu.memory_space<vmem>>, vector<128x128xbf16>
    %c0_47 = arith.constant 0 : index
    %c0_48 = arith.constant 0 : index
    %61 = vector.load %arg2[%c0_47, %c0_48] : memref<128x128xbf16, #tpu.memory_space<vmem>>, vector<128x128xbf16>
    %cst_49 = arith.constant dense<0.000000e+00> : vector<128x128xf32>
    %62 = tpu.matmul %60, %61, %cst_49 {dimension_numbers = #tpu.dot_dimension_numbers<[1], [0], [0], [1], [0, 0, 1, 1], [], []>} : vector<128x128xbf16>, vector<128x128xbf16>, vector<128x128xf32> -> vector<128x128xf32>
    %63 = vector.broadcast %0 : vector<1x128xf32> to vector<128x128xf32>
    %64 = arith.addf %62, %63 : vector<128x128xf32>
    %cst_50 = arith.constant 0.000000e+00 : f32
    %65 = vector.broadcast %cst_50 : f32 to vector<128x128xf32>
    %66 = arith.maximumf %64, %65 : vector<128x128xf32>
    %67 = vector.shape_cast %66 : vector<128x128xf32> to vector<2x4x2x8x128xf32>
    %68 = vector.extract_strided_slice %67 {offsets = [0, 0, 0, 0, 0], sizes = [1, 4, 1, 8, 128], strides = [1, 1, 1, 1, 1]} : vector<2x4x2x8x128xf32> to vector<1x4x1x8x128xf32>
    %69 = vector.shape_cast %68 : vector<1x4x1x8x128xf32> to vector<4x8x128xf32>
    %c7 = arith.constant 7 : index
    %c5_51 = arith.constant 5 : index
    %c0_52 = arith.constant 0 : index
    %c0_53 = arith.constant 0 : index
    %70 = vector.load %arg13[%c7, %c5_51, %c0_52, %c0_53] : memref<10x10x8x128xf32, #tpu.memory_space<vmem>>, vector<1x4x8x128xf32>
    %71 = vector.shape_cast %70 : vector<1x4x8x128xf32> to vector<4x8x128xf32>
    %72 = vector.shape_cast %69 : vector<4x8x128xf32> to vector<1x4x8x128xf32>
    tpu.vector_store %arg13[%c7, %c5_51, %c0_52, %c0_53], %72 {strides = array<i32>} : memref<10x10x8x128xf32, #tpu.memory_space<vmem>>, vector<1x4x8x128xf32>,
    %73 = vector.extract_strided_slice %67 {offsets = [0, 0, 1, 0, 0], sizes = [1, 4, 1, 8, 128], strides = [1, 1, 1, 1, 1]} : vector<2x4x2x8x128xf32> to vector<1x4x1x8x128xf32>
    %74 = vector.shape_cast %73 : vector<1x4x1x8x128xf32> to vector<4x8x128xf32>
    %c7_54 = arith.constant 7 : index
    %c1_55 = arith.constant 1 : index
    %c0_56 = arith.constant 0 : index
    %c0_57 = arith.constant 0 : index
    %75 = vector.load %arg13[%c7_54, %c1_55, %c0_56, %c0_57] : memref<10x10x8x128xf32, #tpu.memory_space<vmem>>, vector<1x4x8x128xf32>
    %76 = vector.shape_cast %75 : vector<1x4x8x128xf32> to vector<4x8x128xf32>
    %77 = vector.shape_cast %74 : vector<4x8x128xf32> to vector<1x4x8x128xf32>
    tpu.vector_store %arg13[%c7_54, %c1_55, %c0_56, %c0_57], %77 {strides = array<i32>} : memref<10x10x8x128xf32, #tpu.memory_space<vmem>>, vector<1x4x8x128xf32>,
    %78 = vector.extract_strided_slice %67 {offsets = [1, 0, 0, 0, 0], sizes = [1, 4, 1, 8, 128], strides = [1, 1, 1, 1, 1]} : vector<2x4x2x8x128xf32> to vector<1x4x1x8x128xf32>
    %79 = vector.shape_cast %78 : vector<1x4x1x8x128xf32> to vector<4x8x128xf32>
    %c3 = arith.constant 3 : index
    %c5_58 = arith.constant 5 : index
    %c0_59 = arith.constant 0 : index
    %c0_60 = arith.constant 0 : index
    %80 = vector.load %arg13[%c3, %c5_58, %c0_59, %c0_60] : memref<10x10x8x128xf32, #tpu.memory_space<vmem>>, vector<1x4x8x128xf32>
    %81 = vector.shape_cast %80 : vector<1x4x8x128xf32> to vector<4x8x128xf32>
    %82 = vector.shape_cast %79 : vector<4x8x128xf32> to vector<1x4x8x128xf32>
    tpu.vector_store %arg13[%c3, %c5_58, %c0_59, %c0_60], %82 {strides = array<i32>} : memref<10x10x8x128xf32, #tpu.memory_space<vmem>>, vector<1x4x8x128xf32>,
    %83 = vector.extract_strided_slice %67 {offsets = [1, 0, 1, 0, 0], sizes = [1, 4, 1, 8, 128], strides = [1, 1, 1, 1, 1]} : vector<2x4x2x8x128xf32> to vector<1x4x1x8x128xf32>
    %84 = vector.shape_cast %83 : vector<1x4x1x8x128xf32> to vector<4x8x128xf32>
    %c3_61 = arith.constant 3 : index
    %c1_62 = arith.constant 1 : index
    %c0_63 = arith.constant 0 : index
    %c0_64 = arith.constant 0 : index
    %85 = vector.load %arg13[%c3_61, %c1_62, %c0_63, %c0_64] : memref<10x10x8x128xf32, #tpu.memory_space<vmem>>, vector<1x4x8x128xf32>
    %86 = vector.shape_cast %85 : vector<1x4x8x128xf32> to vector<4x8x128xf32>
    %87 = vector.shape_cast %84 : vector<4x8x128xf32> to vector<1x4x8x128xf32>
    tpu.vector_store %arg13[%c3_61, %c1_62, %c0_63, %c0_64], %87 {strides = array<i32>} : memref<10x10x8x128xf32, #tpu.memory_space<vmem>>, vector<1x4x8x128xf32>,
    %c384 = arith.constant 384 : index
    %c0_65 = arith.constant 0 : index
    %88 = vector.load %arg1[%c384, %c0_65] : memref<512x128xbf16, #tpu.memory_space<vmem>>, vector<128x128xbf16>
    %c0_66 = arith.constant 0 : index
    %c0_67 = arith.constant 0 : index
    %89 = vector.load %arg2[%c0_66, %c0_67] : memref<128x128xbf16, #tpu.memory_space<vmem>>, vector<128x128xbf16>
    %cst_68 = arith.constant dense<0.000000e+00> : vector<128x128xf32>
    %90 = tpu.matmul %88, %89, %cst_68 {dimension_numbers = #tpu.dot_dimension_numbers<[1], [0], [0], [1], [0, 0, 1, 1], [], []>} : vector<128x128xbf16>, vector<128x128xbf16>, vector<128x128xf32> -> vector<128x128xf32>
    %91 = vector.broadcast %0 : vector<1x128xf32> to vector<128x128xf32>
    %92 = arith.addf %90, %91 : vector<128x128xf32>
    %cst_69 = arith.constant 0.000000e+00 : f32
    %93 = vector.broadcast %cst_69 : f32 to vector<128x128xf32>
    %94 = arith.maximumf %92, %93 : vector<128x128xf32>
    %95 = vector.shape_cast %94 : vector<128x128xf32> to vector<2x4x2x8x128xf32>
    %96 = vector.extract_strided_slice %95 {offsets = [0, 0, 0, 0, 0], sizes = [1, 4, 1, 8, 128], strides = [1, 1, 1, 1, 1]} : vector<2x4x2x8x128xf32> to vector<1x4x1x8x128xf32>
    %97 = vector.shape_cast %96 : vector<1x4x1x8x128xf32> to vector<4x8x128xf32>
    %c8 = arith.constant 8 : index
    %c5_70 = arith.constant 5 : index
    %c0_71 = arith.constant 0 : index
    %c0_72 = arith.constant 0 : index
    %98 = vector.load %arg13[%c8, %c5_70, %c0_71, %c0_72] : memref<10x10x8x128xf32, #tpu.memory_space<vmem>>, vector<1x4x8x128xf32>
    %99 = vector.shape_cast %98 : vector<1x4x8x128xf32> to vector<4x8x128xf32>
    %100 = vector.shape_cast %97 : vector<4x8x128xf32> to vector<1x4x8x128xf32>
    tpu.vector_store %arg13[%c8, %c5_70, %c0_71, %c0_72], %100 {strides = array<i32>} : memref<10x10x8x128xf32, #tpu.memory_space<vmem>>, vector<1x4x8x128xf32>,
    %101 = vector.extract_strided_slice %95 {offsets = [0, 0, 1, 0, 0], sizes = [1, 4, 1, 8, 128], strides = [1, 1, 1, 1, 1]} : vector<2x4x2x8x128xf32> to vector<1x4x1x8x128xf32>
    %102 = vector.shape_cast %101 : vector<1x4x1x8x128xf32> to vector<4x8x128xf32>
    %c8_73 = arith.constant 8 : index
    %c1_74 = arith.constant 1 : index
    %c0_75 = arith.constant 0 : index
    %c0_76 = arith.constant 0 : index
    %103 = vector.load %arg13[%c8_73, %c1_74, %c0_75, %c0_76] : memref<10x10x8x128xf32, #tpu.memory_space<vmem>>, vector<1x4x8x128xf32>
    %104 = vector.shape_cast %103 : vector<1x4x8x128xf32> to vector<4x8x128xf32>
    %105 = vector.shape_cast %102 : vector<4x8x128xf32> to vector<1x4x8x128xf32>
    tpu.vector_store %arg13[%c8_73, %c1_74, %c0_75, %c0_76], %105 {strides = array<i32>} : memref<10x10x8x128xf32, #tpu.memory_space<vmem>>, vector<1x4x8x128xf32>,
    %106 = vector.extract_strided_slice %95 {offsets = [1, 0, 0, 0, 0], sizes = [1, 4, 1, 8, 128], strides = [1, 1, 1, 1, 1]} : vector<2x4x2x8x128xf32> to vector<1x4x1x8x128xf32>
    %107 = vector.shape_cast %106 : vector<1x4x1x8x128xf32> to vector<4x8x128xf32>
    %c4 = arith.constant 4 : index
    %c5_77 = arith.constant 5 : index
    %c0_78 = arith.constant 0 : index
    %c0_79 = arith.constant 0 : index
    %108 = vector.load %arg13[%c4, %c5_77, %c0_78, %c0_79] : memref<10x10x8x128xf32, #tpu.memory_space<vmem>>, vector<1x4x8x128xf32>
    %109 = vector.shape_cast %108 : vector<1x4x8x128xf32> to vector<4x8x128xf32>
    %110 = vector.shape_cast %107 : vector<4x8x128xf32> to vector<1x4x8x128xf32>
    tpu.vector_store %arg13[%c4, %c5_77, %c0_78, %c0_79], %110 {strides = array<i32>} : memref<10x10x8x128xf32, #tpu.memory_space<vmem>>, vector<1x4x8x128xf32>,
    %111 = vector.extract_strided_slice %95 {offsets = [1, 0, 1, 0, 0], sizes = [1, 4, 1, 8, 128], strides = [1, 1, 1, 1, 1]} : vector<2x4x2x8x128xf32> to vector<1x4x1x8x128xf32>
    %112 = vector.shape_cast %111 : vector<1x4x1x8x128xf32> to vector<4x8x128xf32>
    %c4_80 = arith.constant 4 : index
    %c1_81 = arith.constant 1 : index
    %c0_82 = arith.constant 0 : index
    %c0_83 = arith.constant 0 : index
    %113 = vector.load %arg13[%c4_80, %c1_81, %c0_82, %c0_83] : memref<10x10x8x128xf32, #tpu.memory_space<vmem>>, vector<1x4x8x128xf32>
    %114 = vector.shape_cast %113 : vector<1x4x8x128xf32> to vector<4x8x128xf32>
    %115 = vector.shape_cast %112 : vector<4x8x128xf32> to vector<1x4x8x128xf32>
    tpu.vector_store %arg13[%c4_80, %c1_81, %c0_82, %c0_83], %115 {strides = array<i32>} : memref<10x10x8x128xf32, #tpu.memory_space<vmem>>, vector<1x4x8x128xf32>,
    %cst_84 = arith.constant 0.000000e+00 : f32
    %116 = vector.broadcast %cst_84 : f32 to vector<128x128xf32>
    %c0_85 = arith.constant 0 : index
    %c0_86 = arith.constant 0 : index
    %c0_87 = arith.constant 0 : index
    %c0_88 = arith.constant 0 : index
    %117 = vector.load %arg13[%c0_85, %c0_86, %c0_87, %c0_88] : memref<10x10x8x128xf32, #tpu.memory_space<vmem>>, vector<4x4x8x128xf32>
    %118 = vector.shape_cast %117 : vector<4x4x8x128xf32> to vector<128x128xf32>
    %119 = arith.truncf %118 : vector<128x128xf32> to vector<128x128xbf16>
    %c0_89 = arith.constant 0 : index
    %c0_90 = arith.constant 0 : index
    %120 = vector.load %arg4[%c0_89, %c0_90] : memref<1152x128xbf16, #tpu.memory_space<vmem>>, vector<128x128xbf16>
    %cst_91 = arith.constant dense<0.000000e+00> : vector<128x128xf32>
    %121 = tpu.matmul %119, %120, %cst_91 {dimension_numbers = #tpu.dot_dimension_numbers<[1], [0], [0], [1], [0, 0, 1, 1], [], []>} : vector<128x128xbf16>, vector<128x128xbf16>, vector<128x128xf32> -> vector<128x128xf32>
    %122 = arith.addf %116, %121 : vector<128x128xf32>
    %c0_92 = arith.constant 0 : index
    %c5_93 = arith.constant 5 : index
    %c0_94 = arith.constant 0 : index
    %c0_95 = arith.constant 0 : index
    %123 = vector.load %arg13[%c0_92, %c5_93, %c0_94, %c0_95] : memref<10x10x8x128xf32, #tpu.memory_space<vmem>>, vector<4x4x8x128xf32>
    %124 = vector.shape_cast %123 : vector<4x4x8x128xf32> to vector<128x128xf32>
    %125 = arith.truncf %124 : vector<128x128xf32> to vector<128x128xbf16>
    %c128_96 = arith.constant 128 : index
    %c0_97 = arith.constant 0 : index
    %126 = vector.load %arg4[%c128_96, %c0_97] : memref<1152x128xbf16, #tpu.memory_space<vmem>>, vector<128x128xbf16>
    %cst_98 = arith.constant dense<0.000000e+00> : vector<128x128xf32>
    %127 = tpu.matmul %125, %126, %cst_98 {dimension_numbers = #tpu.dot_dimension_numbers<[1], [0], [0], [1], [0, 0, 1, 1], [], []>} : vector<128x128xbf16>, vector<128x128xbf16>, vector<128x128xf32> -> vector<128x128xf32>
    %128 = arith.addf %122, %127 : vector<128x128xf32>
    %c0_99 = arith.constant 0 : index
    %c1_100 = arith.constant 1 : index
    %c0_101 = arith.constant 0 : index
    %c0_102 = arith.constant 0 : index
    %129 = vector.load %arg13[%c0_99, %c1_100, %c0_101, %c0_102] : memref<10x10x8x128xf32, #tpu.memory_space<vmem>>, vector<4x4x8x128xf32>
    %130 = vector.shape_cast %129 : vector<4x4x8x128xf32> to vector<128x128xf32>
    %131 = arith.truncf %130 : vector<128x128xf32> to vector<128x128xbf16>
    %c256_103 = arith.constant 256 : index
    %c0_104 = arith.constant 0 : index
    %132 = vector.load %arg4[%c256_103, %c0_104] : memref<1152x128xbf16, #tpu.memory_space<vmem>>, vector<128x128xbf16>
    %cst_105 = arith.constant dense<0.000000e+00> : vector<128x128xf32>
    %133 = tpu.matmul %131, %132, %cst_105 {dimension_numbers = #tpu.dot_dimension_numbers<[1], [0], [0], [1], [0, 0, 1, 1], [], []>} : vector<128x128xbf16>, vector<128x128xbf16>, vector<128x128xf32> -> vector<128x128xf32>
    %134 = arith.addf %128, %133 : vector<128x128xf32>
    %c5_106 = arith.constant 5 : index
    %c0_107 = arith.constant 0 : index
    %c0_108 = arith.constant 0 : index
    %c0_109 = arith.constant 0 : index
    %135 = vector.load %arg13[%c5_106, %c0_107, %c0_108, %c0_109] : memref<10x10x8x128xf32, #tpu.memory_space<vmem>>, vector<4x4x8x128xf32>
    %136 = vector.shape_cast %135 : vector<4x4x8x128xf32> to vector<128x128xf32>
    %137 = arith.truncf %136 : vector<128x128xf32> to vector<128x128xbf16>
    %c384_110 = arith.constant 384 : index
    %c0_111 = arith.constant 0 : index
    %138 = vector.load %arg4[%c384_110, %c0_111] : memref<1152x128xbf16, #tpu.memory_space<vmem>>, vector<128x128xbf16>
    %cst_112 = arith.constant dense<0.000000e+00> : vector<128x128xf32>
    %139 = tpu.matmul %137, %138, %cst_112 {dimension_numbers = #tpu.dot_dimension_numbers<[1], [0], [0], [1], [0, 0, 1, 1], [], []>} : vector<128x128xbf16>, vector<128x128xbf16>, vector<128x128xf32> -> vector<128x128xf32>
    %140 = arith.addf %134, %139 : vector<128x128xf32>
    %c5_113 = arith.constant 5 : index
    %c5_114 = arith.constant 5 : index
    %c0_115 = arith.constant 0 : index
    %c0_116 = arith.constant 0 : index
    %141 = vector.load %arg13[%c5_113, %c5_114, %c0_115, %c0_116] : memref<10x10x8x128xf32, #tpu.memory_space<vmem>>, vector<4x4x8x128xf32>
    %142 = vector.shape_cast %141 : vector<4x4x8x128xf32> to vector<128x128xf32>
    %143 = arith.truncf %142 : vector<128x128xf32> to vector<128x128xbf16>
    %c512 = arith.constant 512 : index
    %c0_117 = arith.constant 0 : index
    %144 = vector.load %arg4[%c512, %c0_117] : memref<1152x128xbf16, #tpu.memory_space<vmem>>, vector<128x128xbf16>
    %cst_118 = arith.constant dense<0.000000e+00> : vector<128x128xf32>
    %145 = tpu.matmul %143, %144, %cst_118 {dimension_numbers = #tpu.dot_dimension_numbers<[1], [0], [0], [1], [0, 0, 1, 1], [], []>} : vector<128x128xbf16>, vector<128x128xbf16>, vector<128x128xf32> -> vector<128x128xf32>
    %146 = arith.addf %140, %145 : vector<128x128xf32>
    %c5_119 = arith.constant 5 : index
    %c1_120 = arith.constant 1 : index
    %c0_121 = arith.constant 0 : index
    %c0_122 = arith.constant 0 : index
    %147 = vector.load %arg13[%c5_119, %c1_120, %c0_121, %c0_122] : memref<10x10x8x128xf32, #tpu.memory_space<vmem>>, vector<4x4x8x128xf32>
    %148 = vector.shape_cast %147 : vector<4x4x8x128xf32> to vector<128x128xf32>
    %149 = arith.truncf %148 : vector<128x128xf32> to vector<128x128xbf16>
    %c640 = arith.constant 640 : index
    %c0_123 = arith.constant 0 : index
    %150 = vector.load %arg4[%c640, %c0_123] : memref<1152x128xbf16, #tpu.memory_space<vmem>>, vector<128x128xbf16>
    %cst_124 = arith.constant dense<0.000000e+00> : vector<128x128xf32>
    %151 = tpu.matmul %149, %150, %cst_124 {dimension_numbers = #tpu.dot_dimension_numbers<[1], [0], [0], [1], [0, 0, 1, 1], [], []>} : vector<128x128xbf16>, vector<128x128xbf16>, vector<128x128xf32> -> vector<128x128xf32>
    %152 = arith.addf %146, %151 : vector<128x128xf32>
    %c1_125 = arith.constant 1 : index
    %c0_126 = arith.constant 0 : index
    %c0_127 = arith.constant 0 : index
    %c0_128 = arith.constant 0 : index
    %153 = vector.load %arg13[%c1_125, %c0_126, %c0_127, %c0_128] : memref<10x10x8x128xf32, #tpu.memory_space<vmem>>, vector<4x4x8x128xf32>
    %154 = vector.shape_cast %153 : vector<4x4x8x128xf32> to vector<128x128xf32>
    %155 = arith.truncf %154 : vector<128x128xf32> to vector<128x128xbf16>
    %c768 = arith.constant 768 : index
    %c0_129 = arith.constant 0 : index
    %156 = vector.load %arg4[%c768, %c0_129] : memref<1152x128xbf16, #tpu.memory_space<vmem>>, vector<128x128xbf16>
    %cst_130 = arith.constant dense<0.000000e+00> : vector<128x128xf32>
    %157 = tpu.matmul %155, %156, %cst_130 {dimension_numbers = #tpu.dot_dimension_numbers<[1], [0], [0], [1], [0, 0, 1, 1], [], []>} : vector<128x128xbf16>, vector<128x128xbf16>, vector<128x128xf32> -> vector<128x128xf32>
    %158 = arith.addf %152, %157 : vector<128x128xf32>
    %c1_131 = arith.constant 1 : index
    %c5_132 = arith.constant 5 : index
    %c0_133 = arith.constant 0 : index
    %c0_134 = arith.constant 0 : index
    %159 = vector.load %arg13[%c1_131, %c5_132, %c0_133, %c0_134] : memref<10x10x8x128xf32, #tpu.memory_space<vmem>>, vector<4x4x8x128xf32>
    %160 = vector.shape_cast %159 : vector<4x4x8x128xf32> to vector<128x128xf32>
    %161 = arith.truncf %160 : vector<128x128xf32> to vector<128x128xbf16>
    %c896 = arith.constant 896 : index
    %c0_135 = arith.constant 0 : index
    %162 = vector.load %arg4[%c896, %c0_135] : memref<1152x128xbf16, #tpu.memory_space<vmem>>, vector<128x128xbf16>
    %cst_136 = arith.constant dense<0.000000e+00> : vector<128x128xf32>
    %163 = tpu.matmul %161, %162, %cst_136 {dimension_numbers = #tpu.dot_dimension_numbers<[1], [0], [0], [1], [0, 0, 1, 1], [], []>} : vector<128x128xbf16>, vector<128x128xbf16>, vector<128x128xf32> -> vector<128x128xf32>
    %164 = arith.addf %158, %163 : vector<128x128xf32>
    %c1_137 = arith.constant 1 : index
    %c1_138 = arith.constant 1 : index
    %c0_139 = arith.constant 0 : index
    %c0_140 = arith.constant 0 : index
    %165 = vector.load %arg13[%c1_137, %c1_138, %c0_139, %c0_140] : memref<10x10x8x128xf32, #tpu.memory_space<vmem>>, vector<4x4x8x128xf32>
    %166 = vector.shape_cast %165 : vector<4x4x8x128xf32> to vector<128x128xf32>
    %167 = arith.truncf %166 : vector<128x128xf32> to vector<128x128xbf16>
    %c1024 = arith.constant 1024 : index
    %c0_141 = arith.constant 0 : index
    %168 = vector.load %arg4[%c1024, %c0_141] : memref<1152x128xbf16, #tpu.memory_space<vmem>>, vector<128x128xbf16>
    %cst_142 = arith.constant dense<0.000000e+00> : vector<128x128xf32>
    %169 = tpu.matmul %167, %168, %cst_142 {dimension_numbers = #tpu.dot_dimension_numbers<[1], [0], [0], [1], [0, 0, 1, 1], [], []>} : vector<128x128xbf16>, vector<128x128xbf16>, vector<128x128xf32> -> vector<128x128xf32>
    %170 = arith.addf %164, %169 : vector<128x128xf32>
    %171 = vector.broadcast %1 : vector<1x128xf32> to vector<128x128xf32>
    %172 = arith.addf %170, %171 : vector<128x128xf32>
    %cst_143 = arith.constant 0.000000e+00 : f32
    %173 = vector.broadcast %cst_143 : f32 to vector<128x128xf32>
    %174 = arith.maximumf %172, %173 : vector<128x128xf32>
    %cst_144 = arith.constant 0.000000e+00 : f32
    %175 = vector.broadcast %cst_144 : f32 to vector<8x128xf32>
    %176 = vector.extract_strided_slice %174 {offsets = [0, 0], sizes = [8, 128], strides = [1, 1]} : vector<128x128xf32> to vector<8x128xf32>
    %177 = arith.truncf %176 : vector<8x128xf32> to vector<8x128xbf16>
    %c0_145 = arith.constant 0 : index
    %c0_146 = arith.constant 0 : index
    %178 = vector.load %arg6[%c0_145, %c0_146] : memref<2048x128xbf16, #tpu.memory_space<vmem>>, vector<128x128xbf16>
    %cst_147 = arith.constant dense<0.000000e+00> : vector<8x128xf32>
    %179 = tpu.matmul %177, %178, %cst_147 {dimension_numbers = #tpu.dot_dimension_numbers<[1], [0], [0], [1], [0, 0, 1, 1], [], []>} : vector<8x128xbf16>, vector<128x128xbf16>, vector<8x128xf32> -> vector<8x128xf32>
    %180 = arith.addf %175, %179 : vector<8x128xf32>
    %181 = vector.extract_strided_slice %174 {offsets = [8, 0], sizes = [8, 128], strides = [1, 1]} : vector<128x128xf32> to vector<8x128xf32>
    %182 = arith.truncf %181 : vector<8x128xf32> to vector<8x128xbf16>
    %c128_148 = arith.constant 128 : index
    %c0_149 = arith.constant 0 : index
    %183 = vector.load %arg6[%c128_148, %c0_149] : memref<2048x128xbf16, #tpu.memory_space<vmem>>, vector<128x128xbf16>
    %cst_150 = arith.constant dense<0.000000e+00> : vector<8x128xf32>
    %184 = tpu.matmul %182, %183, %cst_150 {dimension_numbers = #tpu.dot_dimension_numbers<[1], [0], [0], [1], [0, 0, 1, 1], [], []>} : vector<8x128xbf16>, vector<128x128xbf16>, vector<8x128xf32> -> vector<8x128xf32>
    %185 = arith.addf %180, %184 : vector<8x128xf32>
    %186 = vector.extract_strided_slice %174 {offsets = [16, 0], sizes = [8, 128], strides = [1, 1]} : vector<128x128xf32> to vector<8x128xf32>
    %187 = arith.truncf %186 : vector<8x128xf32> to vector<8x128xbf16>
    %c256_151 = arith.constant 256 : index
    %c0_152 = arith.constant 0 : index
    %188 = vector.load %arg6[%c256_151, %c0_152] : memref<2048x128xbf16, #tpu.memory_space<vmem>>, vector<128x128xbf16>
    %cst_153 = arith.constant dense<0.000000e+00> : vector<8x128xf32>
    %189 = tpu.matmul %187, %188, %cst_153 {dimension_numbers = #tpu.dot_dimension_numbers<[1], [0], [0], [1], [0, 0, 1, 1], [], []>} : vector<8x128xbf16>, vector<128x128xbf16>, vector<8x128xf32> -> vector<8x128xf32>
    %190 = arith.addf %185, %189 : vector<8x128xf32>
    %191 = vector.extract_strided_slice %174 {offsets = [24, 0], sizes = [8, 128], strides = [1, 1]} : vector<128x128xf32> to vector<8x128xf32>
    %192 = arith.truncf %191 : vector<8x128xf32> to vector<8x128xbf16>
    %c384_154 = arith.constant 384 : index
    %c0_155 = arith.constant 0 : index
    %193 = vector.load %arg6[%c384_154, %c0_155] : memref<2048x128xbf16, #tpu.memory_space<vmem>>, vector<128x128xbf16>
    %cst_156 = arith.constant dense<0.000000e+00> : vector<8x128xf32>
    %194 = tpu.matmul %192, %193, %cst_156 {dimension_numbers = #tpu.dot_dimension_numbers<[1], [0], [0], [1], [0, 0, 1, 1], [], []>} : vector<8x128xbf16>, vector<128x128xbf16>, vector<8x128xf32> -> vector<8x128xf32>
    %195 = arith.addf %190, %194 : vector<8x128xf32>
    %196 = vector.extract_strided_slice %174 {offsets = [32, 0], sizes = [8, 128], strides = [1, 1]} : vector<128x128xf32> to vector<8x128xf32>
    %197 = arith.truncf %196 : vector<8x128xf32> to vector<8x128xbf16>
    %c512_157 = arith.constant 512 : index
    %c0_158 = arith.constant 0 : index
    %198 = vector.load %arg6[%c512_157, %c0_158] : memref<2048x128xbf16, #tpu.memory_space<vmem>>, vector<128x128xbf16>
    %cst_159 = arith.constant dense<0.000000e+00> : vector<8x128xf32>
    %199 = tpu.matmul %197, %198, %cst_159 {dimension_numbers = #tpu.dot_dimension_numbers<[1], [0], [0], [1], [0, 0, 1, 1], [], []>} : vector<8x128xbf16>, vector<128x128xbf16>, vector<8x128xf32> -> vector<8x128xf32>
    %200 = arith.addf %195, %199 : vector<8x128xf32>
    %201 = vector.extract_strided_slice %174 {offsets = [40, 0], sizes = [8, 128], strides = [1, 1]} : vector<128x128xf32> to vector<8x128xf32>
    %202 = arith.truncf %201 : vector<8x128xf32> to vector<8x128xbf16>
    %c640_160 = arith.constant 640 : index
    %c0_161 = arith.constant 0 : index
    %203 = vector.load %arg6[%c640_160, %c0_161] : memref<2048x128xbf16, #tpu.memory_space<vmem>>, vector<128x128xbf16>
    %cst_162 = arith.constant dense<0.000000e+00> : vector<8x128xf32>
    %204 = tpu.matmul %202, %203, %cst_162 {dimension_numbers = #tpu.dot_dimension_numbers<[1], [0], [0], [1], [0, 0, 1, 1], [], []>} : vector<8x128xbf16>, vector<128x128xbf16>, vector<8x128xf32> -> vector<8x128xf32>
    %205 = arith.addf %200, %204 : vector<8x128xf32>
    %206 = vector.extract_strided_slice %174 {offsets = [48, 0], sizes = [8, 128], strides = [1, 1]} : vector<128x128xf32> to vector<8x128xf32>
    %207 = arith.truncf %206 : vector<8x128xf32> to vector<8x128xbf16>
    %c768_163 = arith.constant 768 : index
    %c0_164 = arith.constant 0 : index
    %208 = vector.load %arg6[%c768_163, %c0_164] : memref<2048x128xbf16, #tpu.memory_space<vmem>>, vector<128x128xbf16>
    %cst_165 = arith.constant dense<0.000000e+00> : vector<8x128xf32>
    %209 = tpu.matmul %207, %208, %cst_165 {dimension_numbers = #tpu.dot_dimension_numbers<[1], [0], [0], [1], [0, 0, 1, 1], [], []>} : vector<8x128xbf16>, vector<128x128xbf16>, vector<8x128xf32> -> vector<8x128xf32>
    %210 = arith.addf %205, %209 : vector<8x128xf32>
    %211 = vector.extract_strided_slice %174 {offsets = [56, 0], sizes = [8, 128], strides = [1, 1]} : vector<128x128xf32> to vector<8x128xf32>
    %212 = arith.truncf %211 : vector<8x128xf32> to vector<8x128xbf16>
    %c896_166 = arith.constant 896 : index
    %c0_167 = arith.constant 0 : index
    %213 = vector.load %arg6[%c896_166, %c0_167] : memref<2048x128xbf16, #tpu.memory_space<vmem>>, vector<128x128xbf16>
    %cst_168 = arith.constant dense<0.000000e+00> : vector<8x128xf32>
    %214 = tpu.matmul %212, %213, %cst_168 {dimension_numbers = #tpu.dot_dimension_numbers<[1], [0], [0], [1], [0, 0, 1, 1], [], []>} : vector<8x128xbf16>, vector<128x128xbf16>, vector<8x128xf32> -> vector<8x128xf32>
    %215 = arith.addf %210, %214 : vector<8x128xf32>
    %216 = vector.extract_strided_slice %174 {offsets = [64, 0], sizes = [8, 128], strides = [1, 1]} : vector<128x128xf32> to vector<8x128xf32>
    %217 = arith.truncf %216 : vector<8x128xf32> to vector<8x128xbf16>
    %c1024_169 = arith.constant 1024 : index
    %c0_170 = arith.constant 0 : index
    %218 = vector.load %arg6[%c1024_169, %c0_170] : memref<2048x128xbf16, #tpu.memory_space<vmem>>, vector<128x128xbf16>
    %cst_171 = arith.constant dense<0.000000e+00> : vector<8x128xf32>
    %219 = tpu.matmul %217, %218, %cst_171 {dimension_numbers = #tpu.dot_dimension_numbers<[1], [0], [0], [1], [0, 0, 1, 1], [], []>} : vector<8x128xbf16>, vector<128x128xbf16>, vector<8x128xf32> -> vector<8x128xf32>
    %220 = arith.addf %215, %219 : vector<8x128xf32>
    %221 = vector.extract_strided_slice %174 {offsets = [72, 0], sizes = [8, 128], strides = [1, 1]} : vector<128x128xf32> to vector<8x128xf32>
    %222 = arith.truncf %221 : vector<8x128xf32> to vector<8x128xbf16>
    %c1152 = arith.constant 1152 : index
    %c0_172 = arith.constant 0 : index
    %223 = vector.load %arg6[%c1152, %c0_172] : memref<2048x128xbf16, #tpu.memory_space<vmem>>, vector<128x128xbf16>
    %cst_173 = arith.constant dense<0.000000e+00> : vector<8x128xf32>
    %224 = tpu.matmul %222, %223, %cst_173 {dimension_numbers = #tpu.dot_dimension_numbers<[1], [0], [0], [1], [0, 0, 1, 1], [], []>} : vector<8x128xbf16>, vector<128x128xbf16>, vector<8x128xf32> -> vector<8x128xf32>
    %225 = arith.addf %220, %224 : vector<8x128xf32>
    %226 = vector.extract_strided_slice %174 {offsets = [80, 0], sizes = [8, 128], strides = [1, 1]} : vector<128x128xf32> to vector<8x128xf32>
    %227 = arith.truncf %226 : vector<8x128xf32> to vector<8x128xbf16>
    %c1280 = arith.constant 1280 : index
    %c0_174 = arith.constant 0 : index
    %228 = vector.load %arg6[%c1280, %c0_174] : memref<2048x128xbf16, #tpu.memory_space<vmem>>, vector<128x128xbf16>
    %cst_175 = arith.constant dense<0.000000e+00> : vector<8x128xf32>
    %229 = tpu.matmul %227, %228, %cst_175 {dimension_numbers = #tpu.dot_dimension_numbers<[1], [0], [0], [1], [0, 0, 1, 1], [], []>} : vector<8x128xbf16>, vector<128x128xbf16>, vector<8x128xf32> -> vector<8x128xf32>
    %230 = arith.addf %225, %229 : vector<8x128xf32>
    %231 = vector.extract_strided_slice %174 {offsets = [88, 0], sizes = [8, 128], strides = [1, 1]} : vector<128x128xf32> to vector<8x128xf32>
    %232 = arith.truncf %231 : vector<8x128xf32> to vector<8x128xbf16>
    %c1408 = arith.constant 1408 : index
    %c0_176 = arith.constant 0 : index
    %233 = vector.load %arg6[%c1408, %c0_176] : memref<2048x128xbf16, #tpu.memory_space<vmem>>, vector<128x128xbf16>
    %cst_177 = arith.constant dense<0.000000e+00> : vector<8x128xf32>
    %234 = tpu.matmul %232, %233, %cst_177 {dimension_numbers = #tpu.dot_dimension_numbers<[1], [0], [0], [1], [0, 0, 1, 1], [], []>} : vector<8x128xbf16>, vector<128x128xbf16>, vector<8x128xf32> -> vector<8x128xf32>
    %235 = arith.addf %230, %234 : vector<8x128xf32>
    %236 = vector.extract_strided_slice %174 {offsets = [96, 0], sizes = [8, 128], strides = [1, 1]} : vector<128x128xf32> to vector<8x128xf32>
    %237 = arith.truncf %236 : vector<8x128xf32> to vector<8x128xbf16>
    %c1536 = arith.constant 1536 : index
    %c0_178 = arith.constant 0 : index
    %238 = vector.load %arg6[%c1536, %c0_178] : memref<2048x128xbf16, #tpu.memory_space<vmem>>, vector<128x128xbf16>
    %cst_179 = arith.constant dense<0.000000e+00> : vector<8x128xf32>
    %239 = tpu.matmul %237, %238, %cst_179 {dimension_numbers = #tpu.dot_dimension_numbers<[1], [0], [0], [1], [0, 0, 1, 1], [], []>} : vector<8x128xbf16>, vector<128x128xbf16>, vector<8x128xf32> -> vector<8x128xf32>
    %240 = arith.addf %235, %239 : vector<8x128xf32>
    %241 = vector.extract_strided_slice %174 {offsets = [104, 0], sizes = [8, 128], strides = [1, 1]} : vector<128x128xf32> to vector<8x128xf32>
    %242 = arith.truncf %241 : vector<8x128xf32> to vector<8x128xbf16>
    %c1664 = arith.constant 1664 : index
    %c0_180 = arith.constant 0 : index
    %243 = vector.load %arg6[%c1664, %c0_180] : memref<2048x128xbf16, #tpu.memory_space<vmem>>, vector<128x128xbf16>
    %cst_181 = arith.constant dense<0.000000e+00> : vector<8x128xf32>
    %244 = tpu.matmul %242, %243, %cst_181 {dimension_numbers = #tpu.dot_dimension_numbers<[1], [0], [0], [1], [0, 0, 1, 1], [], []>} : vector<8x128xbf16>, vector<128x128xbf16>, vector<8x128xf32> -> vector<8x128xf32>
    %245 = arith.addf %240, %244 : vector<8x128xf32>
    %246 = vector.extract_strided_slice %174 {offsets = [112, 0], sizes = [8, 128], strides = [1, 1]} : vector<128x128xf32> to vector<8x128xf32>
    %247 = arith.truncf %246 : vector<8x128xf32> to vector<8x128xbf16>
    %c1792 = arith.constant 1792 : index
    %c0_182 = arith.constant 0 : index
    %248 = vector.load %arg6[%c1792, %c0_182] : memref<2048x128xbf16, #tpu.memory_space<vmem>>, vector<128x128xbf16>
    %cst_183 = arith.constant dense<0.000000e+00> : vector<8x128xf32>
    %249 = tpu.matmul %247, %248, %cst_183 {dimension_numbers = #tpu.dot_dimension_numbers<[1], [0], [0], [1], [0, 0, 1, 1], [], []>} : vector<8x128xbf16>, vector<128x128xbf16>, vector<8x128xf32> -> vector<8x128xf32>
    %250 = arith.addf %245, %249 : vector<8x128xf32>
    %251 = vector.extract_strided_slice %174 {offsets = [120, 0], sizes = [8, 128], strides = [1, 1]} : vector<128x128xf32> to vector<8x128xf32>
    %252 = arith.truncf %251 : vector<8x128xf32> to vector<8x128xbf16>
    %c1920 = arith.constant 1920 : index
    %c0_184 = arith.constant 0 : index
    %253 = vector.load %arg6[%c1920, %c0_184] : memref<2048x128xbf16, #tpu.memory_space<vmem>>, vector<128x128xbf16>
    %cst_185 = arith.constant dense<0.000000e+00> : vector<8x128xf32>
    %254 = tpu.matmul %252, %253, %cst_185 {dimension_numbers = #tpu.dot_dimension_numbers<[1], [0], [0], [1], [0, 0, 1, 1], [], []>} : vector<8x128xbf16>, vector<128x128xbf16>, vector<8x128xf32> -> vector<8x128xf32>
    %255 = arith.addf %250, %254 : vector<8x128xf32>
    %c0_186 = arith.constant 0 : index
    %c0_187 = arith.constant 0 : index
    %256 = vector.load %arg7[%c0_186, %c0_187] : memref<1x128xf32, #tpu.memory_space<vmem>>, vector<1x128xf32>
    %257 = vector.broadcast %256 : vector<1x128xf32> to vector<8x128xf32>
    %258 = arith.addf %255, %257 : vector<8x128xf32>
    %259 = arith.truncf %258 : vector<8x128xf32> to vector<8x128xbf16>
    %c0_188 = arith.constant 0 : index
    %c0_189 = arith.constant 0 : index
    %260 = vector.load %arg8[%c0_188, %c0_189] : memref<128x128xbf16, #tpu.memory_space<vmem>>, vector<128x128xbf16>
    %cst_190 = arith.constant dense<0.000000e+00> : vector<8x128xf32>
    %261 = tpu.matmul %259, %260, %cst_190 {dimension_numbers = #tpu.dot_dimension_numbers<[1], [0], [0], [1], [0, 0, 1, 1], [], []>} : vector<8x128xbf16>, vector<128x128xbf16>, vector<8x128xf32> -> vector<8x128xf32>
    %c0_191 = arith.constant 0 : index
    %c0_192 = arith.constant 0 : index
    %262 = vector.load %arg9[%c0_191, %c0_192] : memref<1x128xf32, #tpu.memory_space<vmem>>, vector<1x128xf32>
    %263 = vector.broadcast %262 : vector<1x128xf32> to vector<8x128xf32>
    %264 = arith.addf %261, %263 : vector<8x128xf32>
    %265 = arith.truncf %264 : vector<8x128xf32> to vector<8x128xbf16>
    %c0_193 = arith.constant 0 : index
    %c0_194 = arith.constant 0 : index
    %266 = vector.load %arg10[%c0_193, %c0_194] : memref<128x128xbf16, #tpu.memory_space<vmem>>, vector<128x128xbf16>
    %cst_195 = arith.constant dense<0.000000e+00> : vector<8x128xf32>
    %267 = tpu.matmul %265, %266, %cst_195 {dimension_numbers = #tpu.dot_dimension_numbers<[1], [0], [0], [1], [0, 0, 1, 1], [], []>} : vector<8x128xbf16>, vector<128x128xbf16>, vector<8x128xf32> -> vector<8x128xf32>
    %c0_196 = arith.constant 0 : index
    %c0_197 = arith.constant 0 : index
    %268 = vector.load %arg11[%c0_196, %c0_197] : memref<1x128xf32, #tpu.memory_space<vmem>>, vector<1x128xf32>
    %269 = vector.broadcast %268 : vector<1x128xf32> to vector<8x128xf32>
    %270 = arith.addf %267, %269 : vector<8x128xf32>
    %c0_198 = arith.constant 0 : index
    %c0_199 = arith.constant 0 : index
    %271 = vector.load %arg12[%c0_198, %c0_199] : memref<8x128xf32, #tpu.memory_space<vmem>>, vector<8x128xf32>
    tpu.vector_store %arg12[%c0_198, %c0_199], %270 {strides = array<i32>} : memref<8x128xf32, #tpu.memory_space<vmem>>, vector<8x128xf32>,
    return
  }
  func.func @transform_0(%arg0: i32) -> (i32, i32) {
    %c0_i32 = arith.constant 0 : i32
    %c0_i32_0 = arith.constant 0 : i32
    return %arg0, %c0_i32 : i32, i32
  }
  func.func @transform_1(%arg0: i32) -> (i32, i32) {
    %c0_i32 = arith.constant 0 : i32
    %c0_i32_0 = arith.constant 0 : i32
    %c0_i32_1 = arith.constant 0 : i32
    return %c0_i32, %c0_i32_0 : i32, i32
  }
  func.func @transform_2(%arg0: i32) -> (i32, i32) {
    %c0_i32 = arith.constant 0 : i32
    %c0_i32_0 = arith.constant 0 : i32
    %c0_i32_1 = arith.constant 0 : i32
    return %c0_i32, %c0_i32_0 : i32, i32
  }
  func.func @transform_3(%arg0: i32) -> (i32, i32) {
    %c0_i32 = arith.constant 0 : i32
    %c0_i32_0 = arith.constant 0 : i32
    %c0_i32_1 = arith.constant 0 : i32
    return %c0_i32, %c0_i32_0 : i32, i32
  }
  func.func @transform_4(%arg0: i32) -> (i32, i32) {
    %c0_i32 = arith.constant 0 : i32
    %c0_i32_0 = arith.constant 0 : i32
    %c0_i32_1 = arith.constant 0 : i32
    return %c0_i32, %c0_i32_0 : i32, i32
  }
  func.func @transform_5(%arg0: i32) -> (i32, i32) {
    %c0_i32 = arith.constant 0 : i32
    %c0_i32_0 = arith.constant 0 : i32
    %c0_i32_1 = arith.constant 0 : i32
    return %c0_i32, %c0_i32_0 : i32, i32
  }
  func.func @transform_6(%arg0: i32) -> (i32, i32) {
    %c0_i32 = arith.constant 0 : i32
    %c0_i32_0 = arith.constant 0 : i32
    %c0_i32_1 = arith.constant 0 : i32
    return %c0_i32, %c0_i32_0 : i32, i32
  }
  func.func @transform_7(%arg0: i32) -> (i32, i32) {
    %c0_i32 = arith.constant 0 : i32
    %c0_i32_0 = arith.constant 0 : i32
    %c0_i32_1 = arith.constant 0 : i32
    return %c0_i32, %c0_i32_0 : i32, i32
  }
  func.func @transform_8(%arg0: i32) -> (i32, i32) {
    %c0_i32 = arith.constant 0 : i32
    %c0_i32_0 = arith.constant 0 : i32
    %c0_i32_1 = arith.constant 0 : i32
    return %c0_i32, %c0_i32_0 : i32, i32
  }
  func.func @transform_9(%arg0: i32) -> (i32, i32) {
    %c0_i32 = arith.constant 0 : i32
    %c0_i32_0 = arith.constant 0 : i32
    %c0_i32_1 = arith.constant 0 : i32
    return %c0_i32, %c0_i32_0 : i32, i32
  }
  func.func @transform_10(%arg0: i32) -> (i32, i32) {
    %c0_i32 = arith.constant 0 : i32
    %c0_i32_0 = arith.constant 0 : i32
    %c0_i32_1 = arith.constant 0 : i32
    return %c0_i32, %c0_i32_0 : i32, i32
  }
  func.func @transform_11(%arg0: i32) -> (i32, i32) {
    %c0_i32 = arith.constant 0 : i32
    %c0_i32_0 = arith.constant 0 : i32
    return %arg0, %c0_i32 : i32, i32
  }
}

</mosaic_0001>

<bundles_post_ra>
// kernel: fucci_classifier_forward.1
= control target key start
LH: loop header
LB: loop body
LE: loop exit
PB: predicated region body
PF: predicated region fallthrough
CT: control target
= control target key end

     0   :  { %vm6785_vm0 = vmmov 0   ;;  %s8233_s1 = inlined_call_operand.vmem [shape: bf16[128,128], index: 1, kind: input, shape index: {}]   ;;  %s8234_s0 = inlined_call_operand.vmem [shape: bf16[512,128], index: 0, kind: input, shape index: {}]   ;;  %s8235_s3 = inlined_call_operand.vmem [shape: bf16[1152,128], index: 3, kind: input, shape index: {}]   ;;  %s8236_s2 = inlined_call_operand.vmem [shape: f32[1,128], index: 2, kind: input, shape index: {}]   ;;  %s8237_s5 = inlined_call_operand.vmem [shape: bf16[2048,128], index: 5, kind: input, shape index: {}]   ;;  %s8238_s4 = inlined_call_operand.vmem [shape: f32[1,128], index: 4, kind: input, shape index: {}]   ;;  %s8239_s7 = inlined_call_operand.vmem [shape: bf16[128,128], index: 7, kind: input, shape index: {}]   ;;  %s8240_s9 = inlined_call_operand.vmem [shape: bf16[128,128], index: 9, kind: input, shape index: {}]   ;;  %s8241_s6 = inlined_call_operand.vmem [shape: f32[1,128], index: 6, kind: input, shape index: {}]   ;;  %s8242_s8 = inlined_call_operand.vmem [shape: f32[1,128], index: 8, kind: input, shape index: {}]   ;;  %s8243_s10 = inlined_call_operand.vmem [shape: f32[1,128], index: 10, kind: input, shape index: {}]   ;;  %s8244_s11 = inlined_call_operand.vmem [shape: f32[8,128], index: 11, kind: output, shape index: {}]  }
   0x1   :  { %v6503_v0 = vld [vmem:[%s8233_s1] sm:$0xff]   ;;  %v6504_v1 = vld [vmem:[%s8233_s1 + $0x8] sm:$0xff]   ;;  %v6505_v2 = vld [vmem:[%s8233_s1 + $0x10] sm:$0xff]  }
   0x2   :  { %5596 = vmatprep.subr.bf16.mxu0 %v6503_v0  ;;  %v6507_v3 = vld [vmem:[%s8233_s1] sm:$0xff]   ;;  %v6509_v4 = vld [vmem:[%s8233_s1 + $0x8] sm:$0xff]   ;;  %v6506_v5 = vld [vmem:[%s8233_s1 + $0x18] sm:$0xff]  }
   0x3   :  { %5597 = vmatpush3.bf16.msra.mxu0 %v6503_v0  ;;  %5628 = vmatprep.subr.bf16.mxu1 %v6507_v3  ;;  %v6511_v6 = vld [vmem:[%s8233_s1 + $0x10] sm:$0xff]   ;;  %v6508_v7 = vld [vmem:[%s8233_s1 + $0x20] sm:$0xff]   ;;  %v6513_v8 = vld [vmem:[%s8233_s1 + $0x18] sm:$0xff]  }
   0x4   :  { %5598 = vmatprep.subr.bf16.mxu0 %v6504_v1  ;;  %5629 = vmatpush3.bf16.msra.mxu1 %v6507_v3  ;;  %v6516_v9 = vld [vmem:[%s8234_s0] sm:$0xff]   ;;  %v6510_v10 = vld [vmem:[%s8233_s1 + $0x28] sm:$0xff]   ;;  %v6512_v12 = vld [vmem:[%s8233_s1 + $0x30] sm:$0xff]  }
   0x5   :  { %5630 = vmatprep.subr.bf16.mxu1 %v6509_v4  ;;  %v6515_v11 = vld [vmem:[%s8233_s1 + $0x20] sm:$0xff]   ;;  %5612 = vmatprep.mubr.bf16.mxu0 %v6516_v9  ;;  %v6519_v13 = vld [vmem:[%s8233_s1 + $0x28] sm:$0xff]   ;;  %v6514_v14 = vld [vmem:[%s8233_s1 + $0x38] sm:$0xff]  }
   0x6   :  { %v6521_v15 = vld [vmem:[%s8233_s1 + $0x30] sm:$0xff]   ;;  %v6527_v16 = vld [vmem:[%s8234_s0 + $0x40] sm:$0xff]   ;;  %v6525_v18 = vld [vmem:[%s8233_s1 + $0x38] sm:$0xff]  }
   0x7   :  { %5599 = vmatpush3.bf16.msra.mxu0 %v6504_v1  ;;  %5644 = vmatprep.mubr.bf16.mxu1 %v6527_v16  ;;  %v6518_v17 = vld [vmem:[%s8233_s1] sm:$0xff]   ;;  %v6517_v19 = vld [vmem:[%s8234_s0 + $0x8] sm:$0xff]   ;;  %v6522_v20 = vld [vmem:[%s8234_s0 + $0x10] sm:$0xff]   ;;  %v6783_v1 = vmov 0.0  }
   0x8   :  { %5600 = vmatprep.subr.bf16.mxu0 %v6505_v2  ;;  %5631 = vmatpush3.bf16.msra.mxu1 %v6509_v4  ;;  %v6520_v21 = vld [vmem:[%s8233_s1 + $0x8] sm:$0xff]   ;;  %v6524_v22 = vld [vmem:[%s8233_s1 + $0x10] sm:$0xff]   ;;  %v6523_v25 = vld [vmem:[%s8234_s0 + $0x18] sm:$0xff]  }
   0x9   :  { %5632 = vmatprep.subr.bf16.mxu1 %v6511_v6  ;;  %v6528_v23 = vld [vmem:[%s8234_s0 + $0x48] sm:$0xff]   ;;  %v6533_v24 = vld [vmem:[%s8234_s0 + $0x50] sm:$0xff]   ;;  %v6529_v26 = vld [vmem:[%s8234_s0 + $0x20] sm:$0xff]  }
   0xa   :  { %v6526_v27 = vld [vmem:[%s8233_s1 + $0x18] sm:$0xff]   ;;  %v6531_v28 = vld [vmem:[%s8233_s1 + $0x20] sm:$0xff]   ;;  %v6530_v31 = vld [vmem:[%s8234_s0 + $0x28] sm:$0xff]  }
   0xb   :  { %5601 = vmatpush3.bf16.msra.mxu0 %v6505_v2  ;;  %v6534_v29 = vld [vmem:[%s8234_s0 + $0x58] sm:$0xff]   ;;  %v6539_v30 = vld [vmem:[%s8234_s0 + $0x60] sm:$0xff]   ;;  %v6532_v32 = vld [vmem:[%s8233_s1 + $0x28] sm:$0xff]  }
   0xc   :  { %5602 = vmatprep.subr.bf16.mxu0 %v6506_v5  ;;  %5633 = vmatpush3.bf16.msra.mxu1 %v6511_v6  ;;  %v6535_v33 = vld [vmem:[%s8234_s0 + $0x30] sm:$0xff]   ;;  %v6551_v34 = vld [vmem:[%s8233_s1] sm:$0xff]   ;;  %v6552_v35 = vld [vmem:[%s8233_s1 + $0x8] sm:$0xff]  }
   0xd   :  { %5634 = vmatprep.subr.bf16.mxu1 %v6513_v8  ;;  %v6537_v36 = vld [vmem:[%s8233_s1 + $0x30] sm:$0xff]   ;;  %v6540_v37 = vld [vmem:[%s8234_s0 + $0x68] sm:$0xff]   ;;  %v6536_v39 = vld [vmem:[%s8234_s0 + $0x38] sm:$0xff]  }
   0xe   :  { %v6543_v38 = vld [vmem:[%s8234_s0 + $0x70] sm:$0xff]   ;;  %v6541_v41 = vld [vmem:[%s8234_s0 + $0x80] sm:$0xff]   ;;  %v6538_v42 = vld [vmem:[%s8233_s1 + $0x38] sm:$0xff]  }
   0xf   :  { %5603 = vmatpush3.bf16.msra.mxu0 %v6506_v5  ;;  %v6553_v40 = vld [vmem:[%s8233_s1 + $0x10] sm:$0xff]   ;;  %v6544_v43 = vld [vmem:[%s8234_s0 + $0x78] sm:$0xff]   ;;  %v6559_v45 = vld [vmem:[%s8234_s0 + $0xc0] sm:$0xff]  }
  0x10   :  { %5604 = vmatprep.subr.bf16.mxu0 %v6508_v7  ;;  %5635 = vmatpush3.bf16.msra.mxu1 %v6513_v8  ;;  %v6554_v44 = vld [vmem:[%s8233_s1 + $0x18] sm:$0xff]   ;;  %v6542_v46 = vld [vmem:[%s8234_s0 + $0x88] sm:$0xff]   ;;  %v6563_v47 = vld [vmem:[%s8235_s3 + $0x40] sm:$0xff]   ;;  %v6784_v8 = vmov 0.0|0.0  }
  0x11   :  { %5636 = vmatprep.subr.bf16.mxu1 %v6515_v11  ;;  %v6545_v48 = vld [vmem:[%s8234_s0 + $0x90] sm:$0xff]   ;;  %v6555_v49 = vld [vmem:[%s8233_s1 + $0x20] sm:$0xff]   ;;  %v6564_v50 = vld [vmem:[%s8235_s3 + $0x48] sm:$0xff]  }
  0x12   :  { %v6556_v51 = vld [vmem:[%s8233_s1 + $0x28] sm:$0xff]   ;;  %v6565_v52 = vld [vmem:[%s8235_s3 + $0x50] sm:$0xff]   ;;  %v6546_v53 = vld [vmem:[%s8234_s0 + $0x98] sm:$0xff]  }
  0x13   :  { %5605 = vmatpush3.bf16.msra.mxu0 %v6508_v7  ;;  %v6557_v54 = vld [vmem:[%s8233_s1 + $0x30] sm:$0xff]   ;;  %v6547_v55 = vld [vmem:[%s8234_s0 + $0xa0] sm:$0xff]   ;;  %v6558_v56 = vld [vmem:[%s8233_s1 + $0x38] sm:$0xff]  }
  0x14   :  { %5606 = vmatprep.subr.bf16.mxu0 %v6510_v10  ;;  %5637 = vmatpush3.bf16.msra.mxu1 %v6515_v11  ;;  %v6548_v57 = vld [vmem:[%s8234_s0 + $0xa8] sm:$0xff]   ;;  %v6549_v58 = vld [vmem:[%s8234_s0 + $0xb0] sm:$0xff]   ;;  %v6550_v61 = vld [vmem:[%s8234_s0 + $0xb8] sm:$0xff]  }
  0x15   :  { %5638 = vmatprep.subr.bf16.mxu1 %v6519_v13  ;;  %v6560_v59 = vld [vmem:[%s8234_s0 + $0xc8] sm:$0xff]   ;;  %v6561_v60 = vld [vmem:[%s8234_s0 + $0xd0] sm:$0xff]   ;;  %v6562_v62 = vld [vmem:[%s8234_s0 + $0xd8] sm:$0xff]  }
  0x16   :  { %v6566_v63 = vld [vmem:[%s8235_s3 + $0x58] sm:$0xff]   ;;  %v6567_v0 = vld [vmem:[%s8235_s3 + $0x60] sm:$0xff]   ;;  %v6568_v2 = vld [vmem:[%s8235_s3 + $0x68] sm:$0xff]  }
  0x17   :  { %5607 = vmatpush3.bf16.msra.mxu0 %v6510_v10  ;;  %v6569_v3 = vld [vmem:[%s8235_s3 + $0x70] sm:$0xff]   ;;  %v6570_v4 = vld [vmem:[%s8234_s0 + $0xe0] sm:$0xff]   ;;  %v6571_v5 = vld [vmem:[%s8234_s0 + $0xe8] sm:$0xff]  }
  0x18   :  { %5608 = vmatprep.subr.bf16.mxu0 %v6512_v12  ;;  %5639 = vmatpush3.bf16.msra.mxu1 %v6519_v13  ;;  %v6572_v6 = vld [vmem:[%s8235_s3 + $0x78] sm:$0xff]   ;;  %v6573_v7 = vld [vmem:[%s8234_s0 + $0xf0] sm:$0xff]   ;;  %v6575_v10 = vld [vmem:[%s8235_s3] sm:$0xff]  }
  0x19   :  { %5640 = vmatprep.subr.bf16.mxu1 %v6521_v15  ;;  %v6574_v9 = vld [vmem:[%s8234_s0 + $0xf8] sm:$0xff]   ;;  %v6576_v11 = vld [vmem:[%s8235_s3 + $0x8] sm:$0xff]   ;;  %v6581_v16 = vld [vmem:[%s8235_s3 + $0x30] sm:$0xff]  }
  0x1a   :  { %v6578_v13 = vld [vmem:[%s8235_s3 + $0x18] sm:$0xff]  }
  0x1b   :  { %5609 = vmatpush3.bf16.msra.mxu0 %v6512_v12  ;;  %v6577_v12 = vld [vmem:[%s8235_s3 + $0x10] sm:$0xff]  }
  0x1c   :  { %5610 = vmatprep.subr.bf16.mxu0 %v6514_v14  ;;  %5641 = vmatpush3.bf16.msra.mxu1 %v6521_v15  ;;  %v6580_v15 = vld [vmem:[%s8235_s3 + $0x28] sm:$0xff]  }
  0x1d   :  { %5642 = vmatprep.subr.bf16.mxu1 %v6525_v18 }
  0x1f   :  { %5611 = vmatpush3.bf16.msra.mxu0 %v6514_v14  ;;  %v6579_v14 = vld [vmem:[%s8235_s3 + $0x20] sm:$0xff]  }
  0x20   :  { %5660 = vmatprep.subr.bf16.mxu0 %v6518_v17  ;;  %5643 = vmatpush3.bf16.msra.mxu1 %v6525_v18  ;;  %v7092_v18 = vld [vmem:[%s8235_s3 + $0x80] sm:$0xff]  }
  0x21   :  { %5692 = vmatprep.subr.bf16.mxu1 %v6551_v34 }
  0x22   :  { %5613 = vmatmul.mubr.bf16.vlgmr.msra.gmra.mrb[0].mxu0 %v6517_v19  ;;  %v7098_v19 = vld [vmem:[%s8236_s2] ss:$0 sm:$0xff] }
  0x23   :  { %5661 = vmatpush3.bf16.msra.mxu0 %v6518_v17  ;;  %5616 = vmatprep.mubr.bf16.mxu0 %v6522_v20  ;;  %v6582_v17 = vld [vmem:[%s8235_s3 + $0x38] sm:$0xff]  }
  0x24   :  { %5662 = vmatprep.subr.bf16.mxu0 %v6520_v21  ;;  %5645 = vmatmul.mubr.bf16.vlgmr.msra.gmra.mrb[0].mxu1 %v6528_v23 }
  0x25   :  { %5648 = vmatprep.mubr.bf16.mxu1 %v6533_v24  ;;  %5693 = vmatpush3.bf16.msra.mxu1 %v6551_v34 }
  0x26   :  { %5694 = vmatprep.subr.bf16.mxu1 %v6552_v35 }
  0x27   :  { %5663 = vmatpush3.bf16.msra.mxu0 %v6520_v21 }
  0x28   :  { %5664 = vmatprep.subr.bf16.mxu0 %v6524_v22 }
  0x29   :  { %5695 = vmatpush3.bf16.msra.mxu1 %v6552_v35 }
  0x2a   :  { %5617 = vmatmul.mubr.bf16.gmra.mrb[4].mxu0 %v6523_v25  ;;  %5696 = vmatprep.subr.bf16.mxu1 %v6553_v40 }
  0x2b   :  { %5665 = vmatpush3.bf16.msra.mxu0 %v6524_v22  ;;  %5620 = vmatprep.mubr.bf16.mxu0 %v6529_v26 }
  0x2c   :  { %5666 = vmatprep.subr.bf16.mxu0 %v6526_v27  ;;  %5649 = vmatmul.mubr.bf16.gmra.mrb[4].mxu1 %v6534_v29 }
  0x2d   :  { %5652 = vmatprep.mubr.bf16.mxu1 %v6539_v30  ;;  %5697 = vmatpush3.bf16.msra.mxu1 %v6553_v40 }
  0x2e   :  { %5698 = vmatprep.subr.bf16.mxu1 %v6554_v44 }
  0x2f   :  { %5667 = vmatpush3.bf16.msra.mxu0 %v6526_v27 }
  0x30   :  { %5668 = vmatprep.subr.bf16.mxu0 %v6531_v28 }
  0x31   :  { %5699 = vmatpush3.bf16.msra.mxu1 %v6554_v44 }
  0x32   :  { %5621 = vmatmul.mubr.bf16.gmra.mrb[8].mxu0 %v6530_v31  ;;  %5700 = vmatprep.subr.bf16.mxu1 %v6555_v49 }
  0x33   :  { %5669 = vmatpush3.bf16.msra.mxu0 %v6531_v28  ;;  %5624 = vmatprep.mubr.bf16.mxu0 %v6535_v33 }
  0x34   :  { %5670 = vmatprep.subr.bf16.mxu0 %v6532_v32  ;;  %5653 = vmatmul.mubr.bf16.gmra.mrb[8].mxu1 %v6540_v37 }
  0x35   :  { %5656 = vmatprep.mubr.bf16.mxu1 %v6543_v38  ;;  %5701 = vmatpush3.bf16.msra.mxu1 %v6555_v49 }
  0x36   :  { %5702 = vmatprep.subr.bf16.mxu1 %v6556_v51 }
  0x37   :  { %5671 = vmatpush3.bf16.msra.mxu0 %v6532_v32 }
  0x38   :  { %5672 = vmatprep.subr.bf16.mxu0 %v6537_v36 }
  0x39   :  { %5703 = vmatpush3.bf16.msra.mxu1 %v6556_v51 }
  0x3a   :  { %5625 = vmatmul.mubr.bf16.gmra.mrb[12].mxu0 %v6536_v39  ;;  %5704 = vmatprep.subr.bf16.mxu1 %v6557_v54 }
  0x3b   :  { %5673 = vmatpush3.bf16.msra.mxu0 %v6537_v36  ;;  %5676 = vmatprep.mubr.bf16.mxu0 %v6541_v41 }
  0x3c   :  { %5674 = vmatprep.subr.bf16.mxu0 %v6538_v42  ;;  %5657 = vmatmul.mubr.bf16.gmra.mrb[12].mxu1 %v6544_v43 }
  0x3d   :  { %5708 = vmatprep.mubr.bf16.mxu1 %v6559_v45  ;;  %5705 = vmatpush3.bf16.msra.mxu1 %v6557_v54 }
  0x3e   :  { %5706 = vmatprep.subr.bf16.mxu1 %v6558_v56 }
  0x3f   :  { %5675 = vmatpush3.bf16.msra.mxu0 %v6538_v42 }
  0x40   :  { %5724 = vmatprep.subr.bf16.mxu0 %v6563_v47 }
  0x41   :  { %5707 = vmatpush3.bf16.msra.mxu1 %v6558_v56 }
  0x42   :  { %5677 = vmatmul.mubr.bf16.vlgmr.msra.gmra.mrb[16].mxu0 %v6542_v46  ;;  %6012 = vmatprep.subr.bf16.mxu1 %v6783_v1 }
  0x43   :  { %5680 = vmatprep.mubr.bf16.mxu0 %v6545_v48  ;;  %5725 = vmatpush3.bf16.msra.mxu0 %v6563_v47 }
  0x44   :  { %5726 = vmatprep.subr.bf16.mxu0 %v6564_v50  ;;  %5709 = vmatmul.mubr.bf16.vlgmr.msra.gmra.mrb[16].mxu1 %v6560_v59 }
  0x45   :  { %5712 = vmatprep.mubr.bf16.mxu1 %v6561_v60 }
  0x47   :  { %5727 = vmatpush3.bf16.msra.mxu0 %v6564_v50 }
  0x48   :  { %5728 = vmatprep.subr.bf16.mxu0 %v6565_v52 }
  0x4a   :  { %5681 = vmatmul.mubr.bf16.gmra.mrb[20].mxu0 %v6546_v53 }
  0x4b   :  { %5684 = vmatprep.mubr.bf16.mxu0 %v6547_v55  ;;  %5729 = vmatpush3.bf16.msra.mxu0 %v6565_v52 }
  0x4c   :  { %5713 = vmatmul.mubr.bf16.gmra.mrb[20].mxu1 %v6562_v62  ;;  %5730 = vmatprep.subr.bf16.mxu0 %v6566_v63 }
  0x4d   :  { %5716 = vmatprep.mubr.bf16.mxu1 %v6570_v4 }
  0x4f   :  { %5731 = vmatpush3.bf16.msra.mxu0 %v6566_v63 }
  0x50   :  { %5732 = vmatprep.subr.bf16.mxu0 %v6567_v0 }
  0x52   :  { %5685 = vmatmul.mubr.bf16.gmra.mrb[24].mxu0 %v6548_v57 }
  0x53   :  { %5688 = vmatprep.mubr.bf16.mxu0 %v6549_v58  ;;  %5733 = vmatpush3.bf16.msra.mxu0 %v6567_v0 }
  0x54   :  { %5734 = vmatprep.subr.bf16.mxu0 %v6568_v2  ;;  %5717 = vmatmul.mubr.bf16.gmra.mrb[24].mxu1 %v6571_v5 }
  0x55   :  { %5720 = vmatprep.mubr.bf16.mxu1 %v6573_v7 }
  0x57   :  { %5735 = vmatpush3.bf16.msra.mxu0 %v6568_v2 }
  0x58   :  { %5736 = vmatprep.subr.bf16.mxu0 %v6569_v3 }
  0x5a   :  { %5689 = vmatmul.mubr.bf16.gmra.mrb[28].mxu0 %v6550_v61 }
  0x5b   :  { %5737 = vmatpush3.bf16.msra.mxu0 %v6569_v3  ;;  %5740 = vmatprep.mubr.bf16.mxu0 %v6784_v8 }
  0x5c   :  { %5738 = vmatprep.subr.bf16.mxu0 %v6572_v6  ;;  %5721 = vmatmul.mubr.bf16.gmra.mrb[28].mxu1 %v6574_v9 }
  0x5d   :  { %6028 = vmatprep.mubr.msk.bf16.mxu1 %vm6785_vm0, %v6783_v1 }
  0x5f   :  { %5739 = vmatpush3.bf16.msra.mxu0 %v6572_v6 }
  0x60   :  { %5756 = vmatprep.subr.bf16.mxu0 %v6575_v10 }
  0x62   :  { %5741 = vmatmul.mubr.bf16.vlgmr.msra.gmra.mrb[32].mxu0 %v6784_v8 }
  0x63   :  { %5757 = vmatpush3.bf16.msra.mxu0 %v6575_v10 }
  0x64   :  { %5758 = vmatprep.subr.bf16.mxu0 %v6576_v11 }
  0x67   :  { %5759 = vmatpush3.bf16.msra.mxu0 %v6576_v11 }
  0x68   :  { %5760 = vmatprep.subr.bf16.mxu0 %v6577_v12 }
  0x6b   :  { %5761 = vmatpush3.bf16.msra.mxu0 %v6577_v12 }
  0x6c   :  { %5762 = vmatprep.subr.bf16.mxu0 %v6578_v13 }
  0x6f   :  { %5763 = vmatpush3.bf16.msra.mxu0 %v6578_v13 }
  0x70   :  { %5764 = vmatprep.subr.bf16.mxu0 %v6579_v14 }
  0x73   :  { %5765 = vmatpush3.bf16.msra.mxu0 %v6579_v14 }
  0x74   :  { %5766 = vmatprep.subr.bf16.mxu0 %v6580_v15 }
  0x77   :  { %5767 = vmatpush3.bf16.msra.mxu0 %v6580_v15 }
  0x78   :  { %5768 = vmatprep.subr.bf16.mxu0 %v6581_v16 }
  0x7b   :  { %5769 = vmatpush3.bf16.msra.mxu0 %v6581_v16 }
  0x7c   :  { %5770 = vmatprep.subr.bf16.mxu0 %v6582_v17 }
  0x7f   :  { %5771 = vmatpush3.bf16.msra.mxu0 %v6582_v17 }
  0x80   :  { %5788 = vmatprep.subr.bf16.mxu0 %v7092_v18 }
  0xf5   :  { %v5614_v20 = vpop.f32.mrb[0].mxu0 }
  0xf6   :  { %v318_v21 = vadd.f32 %v5614_v20, %v7098_v19  ;;  %v309_v22 = vpop.f32.mrb[1].mxu0 }
  0xf7   :  { %v310_v23 = vadd.f32 %v7098_v19, %v309_v22  ;;  %v5615_v24 = vpop.f32.mrb[2].mxu0  ;;  %v5646_v31 = vpop.f32.mrb[0].mxu1 }
  0xf8   :  { %v374_v25 = vmax.f32 %v318_v21, 0.0  ;;  %v321_v26 = vadd.f32 %v5615_v24, %v7098_v19  ;;  %v312_v27 = vpop.f32.mrb[3].mxu0  ;;  %v579_v34 = vadd.f32 %v5646_v31, %v7098_v19  ;;  %v570_v35 = vpop.f32.mrb[1].mxu1 }
  0xf9   :  { %v372_v28 = vmax.f32 %v310_v23, 0.0  ;;  %v7104_v29 = vadd.f32 %v7098_v19, %v312_v27  ;;  %v571_v36 = vadd.f32 %v7098_v19, %v570_v35  ;;  %v5647_v37 = vpop.f32.mrb[2].mxu1 }
  0xfa   :  { %v375_v30 = vmax.f32 %v321_v26, 0.0  ;;  %v635_v40 = vmax.f32 %v579_v34, 0.0  ;;  %v582_v41 = vadd.f32 %v5647_v37, %v7098_v19  ;;  %v573_v42 = vpop.f32.mrb[3].mxu1 }
  0xfb   :  { %v7106_v32 = vpack.c.bf16 %v374_v25, %v372_v28  ;;  %v8248_v33 = vmax.f32 %v7104_v29, 0.0  ;;  %v633_v45 = vmax.f32 %v571_v36, 0.0  ;;  %v7118_v46 = vadd.f32 %v7098_v19, %v573_v42 }
  0xfc   :  { %v636_v49 = vmax.f32 %v582_v41, 0.0 }
  0xfd   :  { %v7113_v38 = vpack.c.bf16 %v375_v30, %v8248_v33  ;;  %v5618_v39 = vpop.f32.mrb[4].mxu0  ;;  %v7122_v53 = vpack.c.bf16 %v635_v40, %v633_v45  ;;  %v8247_v54 = vmax.f32 %v7118_v46, 0.0 }
  0xfe   :  { %v334_v43 = vadd.f32 %v5618_v39, %v7098_v19  ;;  %v325_v44 = vpop.f32.mrb[5].mxu0 }
  0xff   :  { %v326_v47 = vadd.f32 %v7098_v19, %v325_v44  ;;  %v5619_v48 = vpop.f32.mrb[6].mxu0  ;;  %v7128_v58 = vpack.c.bf16 %v636_v49, %v8247_v54  ;;  %v5650_v59 = vpop.f32.mrb[4].mxu1 }
 0x100   :  { %v378_v50 = vmax.f32 %v334_v43, 0.0  ;;  %v337_v51 = vadd.f32 %v5619_v48, %v7098_v19  ;;  %v328_v52 = vpop.f32.mrb[7].mxu0  ;;  %v595_v62 = vadd.f32 %v5650_v59, %v7098_v19  ;;  %v586_v63 = vpop.f32.mrb[5].mxu1 }
 0x101   :  { %v376_v55 = vmax.f32 %v326_v47, 0.0  ;;  %v329_v56 = vadd.f32 %v7098_v19, %v328_v52  ;;  %v587_v0 = vadd.f32 %v7098_v19, %v586_v63  ;;  %v5651_v2 = vpop.f32.mrb[6].mxu1 }
 0x102   :  { %v379_v57 = vmax.f32 %v337_v51, 0.0  ;;  %v639_v6 = vmax.f32 %v595_v62, 0.0  ;;  %v598_v7 = vadd.f32 %v5651_v2, %v7098_v19  ;;  %v589_v9 = vpop.f32.mrb[7].mxu1 }
 0x103   :  { %v7130_v60 = vpack.c.bf16 %v378_v50, %v376_v55  ;;  %v377_v61 = vmax.f32 %v329_v56, 0.0  ;;  %v637_v12 = vmax.f32 %v587_v0, 0.0  ;;  %v590_v13 = vadd.f32 %v7098_v19, %v589_v9 }
 0x104   :  { %v640_v16 = vmax.f32 %v598_v7, 0.0 }
 0x105   :  { %v7134_v3 = vpack.c.bf16 %v377_v61, %v375_v30  ;;  %v7136_v4 = vpack.c.bf16 %v379_v57, %v377_v61  ;;  %v5622_v5 = vpop.f32.mrb[8].mxu0  ;;  %v7143_v22 = vpack.c.bf16 %v639_v6, %v637_v12  ;;  %v638_v23 = vmax.f32 %v590_v13, 0.0 }
 0x106   :  { %v350_v10 = vadd.f32 %v5622_v5, %v7098_v19  ;;  %v341_v11 = vpop.f32.mrb[9].mxu0 }
 0x107   :  { %v342_v14 = vadd.f32 %v7098_v19, %v341_v11  ;;  %v5623_v15 = vpop.f32.mrb[10].mxu0  ;;  %v7148_v27 = vpack.c.bf16 %v638_v23, %v636_v49  ;;  %v7150_v28 = vpack.c.bf16 %v640_v16, %v638_v23  ;;  %v5654_v30 = vpop.f32.mrb[8].mxu1 }
 0x108   :  { %v382_v17 = vmax.f32 %v350_v10, 0.0  ;;  %v353_v20 = vadd.f32 %v5623_v15, %v7098_v19  ;;  %v344_v21 = vpop.f32.mrb[11].mxu0  ;;  %v611_v35 = vadd.f32 %v5654_v30, %v7098_v19  ;;  %v602_v36 = vpop.f32.mrb[9].mxu1 }
 0x109   :  { %v380_v24 = vmax.f32 %v342_v14, 0.0  ;;  %v7146_v25 = vadd.f32 %v7098_v19, %v344_v21  ;;  %v603_v37 = vadd.f32 %v7098_v19, %v602_v36  ;;  %v5655_v39 = vpop.f32.mrb[10].mxu1 }
 0x10a   :  { %v383_v26 = vmax.f32 %v353_v20, 0.0  ;;  %v643_v42 = vmax.f32 %v611_v35, 0.0  ;;  %v614_v43 = vadd.f32 %v5655_v39, %v7098_v19  ;;  %v605_v44 = vpop.f32.mrb[11].mxu1 }
 0x10b   :  { %v7152_v31 = vpack.c.bf16 %v382_v17, %v380_v24  ;;  %v381_v34 = vmax.f32 %v7146_v25, 0.0  ;;  %v641_v48 = vmax.f32 %v603_v37, 0.0  ;;  %v7165_v49 = vadd.f32 %v7098_v19, %v605_v44 }
 0x10c   :  { %v644_v52 = vmax.f32 %v614_v43, 0.0 }
 0x10d   :  { %v7159_v40 = vpack.c.bf16 %v383_v26, %v381_v34  ;;  %v5626_v41 = vpop.f32.mrb[12].mxu0  ;;  %5744 = vmatprep.mubr.bf16.mxu0 %v7152_v31  ;;  %v7169_v59 = vpack.c.bf16 %v643_v42, %v641_v48  ;;  %v642_v61 = vmax.f32 %v7165_v49, 0.0 }
 0x10e   :  { %v366_v45 = vadd.f32 %v5626_v41, %v7098_v19  ;;  %v357_v47 = vpop.f32.mrb[13].mxu0 }
 0x10f   :  { %v358_v50 = vadd.f32 %v7098_v19, %v357_v47  ;;  %v5627_v51 = vpop.f32.mrb[14].mxu0  ;;  %v7175_v2 = vpack.c.bf16 %v644_v52, %v642_v61  ;;  %v5658_v5 = vpop.f32.mrb[12].mxu1  ;;  %v7286_v25 = vpack.c.bf16 %v642_v61, %v6783_v1  ;;  %v6589_v61 = vld [vmem:[%s8235_s3 + $0xb0] sm:$0xff]  }
 0x110   :  { %v386_v55 = vmax.f32 %v366_v45, 0.0  ;;  %v369_v56 = vadd.f32 %v5627_v51, %v7098_v19  ;;  %v360_v57 = vpop.f32.mrb[15].mxu0  ;;  %v627_v9 = vadd.f32 %v5658_v5, %v7098_v19  ;;  %v618_v10 = vpop.f32.mrb[13].mxu1 }
 0x111   :  { %v384_v62 = vmax.f32 %v358_v50, 0.0  ;;  %v361_v63 = vadd.f32 %v7098_v19, %v360_v57  ;;  %v619_v11 = vadd.f32 %v7098_v19, %v618_v10  ;;  %v5659_v12 = vpop.f32.mrb[14].mxu1 }
 0x112   :  { %v387_v0 = vmax.f32 %v369_v56, 0.0  ;;  %v647_v16 = vmax.f32 %v627_v9, 0.0  ;;  %v630_v17 = vadd.f32 %v5659_v12, %v7098_v19  ;;  %v621_v20 = vpop.f32.mrb[15].mxu1 }
 0x113   :  { %v7177_v6 = vpack.c.bf16 %v386_v55, %v384_v62  ;;  %v385_v7 = vmax.f32 %v361_v63, 0.0  ;;  %v645_v24 = vmax.f32 %v619_v11, 0.0  ;;  %v622_v30 = vadd.f32 %v7098_v19, %v621_v20 }
 0x114   :  { %v648_v36 = vmax.f32 %v630_v17, 0.0 }
 0x115   :  { %v7181_v13 = vpack.c.bf16 %v385_v7, %v383_v26  ;;  %v7183_v14 = vpack.c.bf16 %v387_v0, %v385_v7  ;;  %v5678_v15 = vpop.f32.mrb[16].mxu0  ;;  %5745 = vmatmul.mubr.bf16.gmra.mrb[36].mxu0 %v7177_v6  ;;  %v7192_v42 = vpack.c.bf16 %v647_v16, %v645_v24  ;;  %v646_v43 = vmax.f32 %v622_v30, 0.0 }
 0x116   :  { %v840_v21 = vadd.f32 %v5678_v15, %v7098_v19  ;;  %v831_v23 = vpop.f32.mrb[17].mxu0  ;;  %5748 = vmatprep.mubr.bf16.mxu0 %v7169_v59 }
 0x117   :  { %v832_v26 = vadd.f32 %v7098_v19, %v831_v23  ;;  %v5679_v35 = vpop.f32.mrb[18].mxu0  ;;  %v7197_v48 = vpack.c.bf16 %v646_v43, %v644_v52  ;;  %v7199_v50 = vpack.c.bf16 %v648_v36, %v646_v43 }
 0x118   :  { %v896_v37 = vmax.f32 %v840_v21, 0.0  ;;  %v843_v39 = vadd.f32 %v5679_v35, %v7098_v19  ;;  %v834_v41 = vpop.f32.mrb[19].mxu0  ;;  %v5710_v35 = vpop.f32.mrb[16].mxu1 }
 0x119   :  { %v894_v44 = vmax.f32 %v832_v26, 0.0  ;;  %v7195_v45 = vadd.f32 %v7098_v19, %v834_v41  ;;  %v1101_v41 = vadd.f32 %v5710_v35, %v7098_v19  ;;  %v1092_v43 = vpop.f32.mrb[17].mxu1 }
 0x11a   :  { %v897_v47 = vmax.f32 %v843_v39, 0.0 }
 0x11b   :  { %v7201_v51 = vpack.c.bf16 %v896_v37, %v894_v44  ;;  %v8246_v55 = vmax.f32 %v7195_v45, 0.0 }
 0x11d   :  { %v7206_v56 = vpack.c.bf16 %v897_v47, %v8246_v55  ;;  %v5682_v57 = vpop.f32.mrb[20].mxu0  ;;  %5749 = vmatmul.mubr.bf16.gmra.mrb[40].mxu0 %v7192_v42 }
 0x11e   :  { %v856_v62 = vadd.f32 %v5682_v57, %v7098_v19  ;;  %v847_v63 = vpop.f32.mrb[21].mxu0  ;;  %v1093_v57 = vadd.f32 %v7098_v19, %v1092_v43 }
 0x11f   :  { %v848_v0 = vadd.f32 %v7098_v19, %v847_v63  ;;  %v5683_v52 = vpop.f32.mrb[22].mxu0 }
 0x120   :  { %v900_v5 = vmax.f32 %v856_v62, 0.0  ;;  %v859_v7 = vadd.f32 %v5683_v52, %v7098_v19  ;;  %v850_v9 = vpop.f32.mrb[23].mxu0  ;;  %v5711_v62 = vpop.f32.mrb[18].mxu1 }
 0x121   :  { %v898_v10 = vmax.f32 %v848_v0, 0.0  ;;  %v851_v11 = vadd.f32 %v7098_v19, %v850_v9  ;;  %v1157_v0 = vmax.f32 %v1101_v41, 0.0  ;;  %v1104_v52 = vadd.f32 %v5711_v62, %v7098_v19 }
 0x122   :  { %v901_v12 = vmax.f32 %v859_v7, 0.0 }
 0x123   :  { %v7213_v15 = vpack.c.bf16 %v900_v5, %v898_v10  ;;  %v899_v16 = vmax.f32 %v851_v11, 0.0  ;;  %v1095_v5 = vpop.f32.mrb[19].mxu1  ;;  %v1155_v10 = vmax.f32 %v1093_v57, 0.0 }
 0x124   :  { %v7232_v11 = vadd.f32 %v7098_v19, %v1095_v5 }
 0x125   :  { %v7215_v17 = vpack.c.bf16 %v899_v16, %v897_v47  ;;  %v7217_v20 = vpack.c.bf16 %v901_v12, %v899_v16  ;;  %v5686_v21 = vpop.f32.mrb[24].mxu0  ;;  %v1158_v12 = vmax.f32 %v1104_v52, 0.0 }
 0x126   :  { %v872_v23 = vadd.f32 %v5686_v21, %v7098_v19  ;;  %v863_v24 = vpop.f32.mrb[25].mxu0 }
 0x127   :  { %v864_v30 = vadd.f32 %v7098_v19, %v863_v24  ;;  %v5687_v26 = vpop.f32.mrb[26].mxu0  ;;  %v8245_v24 = vmax.f32 %v7232_v11, 0.0 }
 0x128   :  { %v904_v36 = vmax.f32 %v872_v23, 0.0  ;;  %v875_v37 = vadd.f32 %v5687_v26, %v7098_v19  ;;  %v866_v39 = vpop.f32.mrb[27].mxu0  ;;  %v7237_v23 = vpack.c.bf16 %v1157_v0, %v1155_v10 }
 0x129   :  { %v902_v44 = vmax.f32 %v864_v30, 0.0  ;;  %v7224_v47 = vadd.f32 %v7098_v19, %v866_v39  ;;  %v5714_v39 = vpop.f32.mrb[20].mxu1 }
 0x12a   :  { %v905_v63 = vmax.f32 %v875_v37, 0.0  ;;  %v7244_v37 = vpack.c.bf16 %v1158_v12, %v8245_v24  ;;  %v1108_v57 = vpop.f32.mrb[21].mxu1 }
 0x12b   :  { %v7228_v7 = vpack.c.bf16 %v904_v36, %v902_v44  ;;  %v903_v9 = vmax.f32 %v7224_v47, 0.0  ;;  %v1117_v47 = vadd.f32 %v5714_v39, %v7098_v19  ;;  %v1109_v52 = vadd.f32 %v7098_v19, %v1108_v57  ;;  %v5715_v5 = vpop.f32.mrb[22].mxu1 }
 0x12c   :  { %v1111_v24 = vpop.f32.mrb[23].mxu1 }
 0x12d   :  { %v7234_v16 = vpack.c.bf16 %v905_v63, %v903_v9  ;;  %v5690_v21 = vpop.f32.mrb[28].mxu0  ;;  %5752 = vmatprep.mubr.bf16.mxu0 %v7228_v7  ;;  %v1159_v54 = vmax.f32 %v1109_v52, 0.0  ;;  %v7297_v49 = vpack.c.bf16 %v903_v9, %v6783_v1  ;;  %v6591_v9 = vld [vmem:[%s8235_s3 + $0xc0] sm:$0xff]   ;;  %v5718_v57 = vpop.f32.mrb[24].mxu1 }
 0x12e   :  { %v888_v30 = vadd.f32 %v5690_v21, %v7098_v19  ;;  %v879_v26 = vpop.f32.mrb[29].mxu0  ;;  %v1161_v21 = vmax.f32 %v1117_v47, 0.0  ;;  %v1124_v52 = vpop.f32.mrb[25].mxu1 }
 0x12f   :  { %v880_v35 = vadd.f32 %v7098_v19, %v879_v26  ;;  %v5691_v36 = vpop.f32.mrb[30].mxu0  ;;  %v1120_v26 = vadd.f32 %v5715_v5, %v7098_v19 }
 0x130   :  { %v908_v41 = vmax.f32 %v888_v30, 0.0  ;;  %v891_v43 = vadd.f32 %v5691_v36, %v7098_v19  ;;  %v882_v44 = vpop.f32.mrb[31].mxu0  ;;  %v1112_v36 = vadd.f32 %v7098_v19, %v1111_v24  ;;  %v6584_v24 = vld [vmem:[%s8235_s3 + $0x88] sm:$0xff]  }
 0x131   :  { %v906_v62 = vmax.f32 %v880_v35, 0.0  ;;  %v883_v0 = vadd.f32 %v7098_v19, %v882_v44  ;;  %v1162_v33 = vmax.f32 %v1120_v26, 0.0  ;;  %v7259_v44 = vpack.c.bf16 %v1161_v21, %v1159_v54  ;;  %v6586_v54 = vld [vmem:[%s8235_s3 + $0x98] sm:$0xff]   ;;  %v5719_v21 = vpop.f32.mrb[26].mxu1  ;;  %v6593_v26 = vld [vmem:[%s8235_s3 + $0xd0] sm:$0xff]  }
 0x132   :  { %v909_v10 = vmax.f32 %v891_v43, 0.0  ;;  %v1160_v43 = vmax.f32 %v1112_v36, 0.0  ;;  %v1127_v36 = vpop.f32.mrb[27].mxu1 }
 0x133   :  { %v7251_v55 = vpack.c.bf16 %v908_v41, %v906_v62  ;;  %v907_v30 = vmax.f32 %v883_v0, 0.0  ;;  %v6592_v62 = vld [vmem:[%s8235_s3 + $0xc8] sm:$0xff]   ;;  %v1133_v0 = vadd.f32 %v5718_v57, %v7098_v19  ;;  %v6594_v57 = vld [vmem:[%s8235_s3 + $0xd8] sm:$0xff]  }
 0x134   :  { %v7262_v47 = vpack.c.bf16 %v1160_v43, %v1158_v12  ;;  %v7264_v41 = vpack.c.bf16 %v1162_v33, %v1160_v43  ;;  %v6585_v33 = vld [vmem:[%s8235_s3 + $0x90] sm:$0xff]   ;;  %v6590_v12 = vld [vmem:[%s8235_s3 + $0xb8] sm:$0xff]  }
 0x135   :  { %v7254_v39 = vpack.c.bf16 %v907_v30, %v905_v63  ;;  %v7256_v35 = vpack.c.bf16 %v909_v10, %v907_v30  ;;  %5753 = vmatmul.mubr.bf16.gmra.mrb[44].mxu0 %v7251_v55  ;;  %v7272_v63 = vpack.c.bf16 %v381_v34, %v6783_v1  ;;  %v6588_v34 = vld [vmem:[%s8235_s3 + $0xa8] sm:$0xff]   ;;  %v1165_v5 = vmax.f32 %v1133_v0, 0.0 }
 0x136   :  { %5772 = vmatprep.mubr.bf16.mxu0 %v6784_v8  ;;  %v1125_v10 = vadd.f32 %v7098_v19, %v1124_v52  ;;  %v1136_v30 = vadd.f32 %v5719_v21, %v7098_v19 }
 0x138   :  { %v1163_v43 = vmax.f32 %v1125_v10, 0.0 }
 0x13d   :  { %5773 = vmatmul.mubr.bf16.vlgmr.msra.gmra.mrb[32].mxu0 %v6784_v8 }
 0x13e   :  { %5776 = vmatprep.mubr.bf16.mxu0 %v7272_v63  ;;  %5789 = vmatpush3.bf16.msra.mxu0 %v7092_v18  ;;  %v6587_v18 = vld [vmem:[%s8235_s3 + $0xa0] sm:$0xff]  }
 0x13f   :  { %5790 = vmatprep.subr.bf16.mxu0 %v6584_v24 }
 0x142   :  { %5791 = vmatpush3.bf16.msra.mxu0 %v6584_v24  ;;  %v7324_v24 = vadd.f32 %v7098_v19, %v1127_v36 }
 0x143   :  { %5792 = vmatprep.subr.bf16.mxu0 %v6585_v33 }
 0x145   :  { %5777 = vmatmul.mubr.bf16.gmra.mrb[36].mxu0 %v7181_v13 }
 0x146   :  { %5780 = vmatprep.mubr.bf16.mxu0 %v7286_v25  ;;  %5793 = vmatpush3.bf16.msra.mxu0 %v6585_v33  ;;  %v1166_v33 = vmax.f32 %v1136_v30, 0.0 }
 0x147   :  { %5794 = vmatprep.subr.bf16.mxu0 %v6586_v54 }
 0x14a   :  { %5795 = vmatpush3.bf16.msra.mxu0 %v6586_v54 }
 0x14b   :  { %5796 = vmatprep.subr.bf16.mxu0 %v6587_v18 }
 0x14d   :  { %5781 = vmatmul.mubr.bf16.gmra.mrb[40].mxu0 %v7197_v48 }
 0x14e   :  { %5784 = vmatprep.mubr.bf16.mxu0 %v7297_v49  ;;  %5797 = vmatpush3.bf16.msra.mxu0 %v6587_v18 }
 0x14f   :  { %5798 = vmatprep.subr.bf16.mxu0 %v6588_v34 }
 0x152   :  { %5799 = vmatpush3.bf16.msra.mxu0 %v6588_v34  ;;  %v7327_v34 = vpack.c.bf16 %v1165_v5, %v1163_v43 }
 0x153   :  { %5800 = vmatprep.subr.bf16.mxu0 %v6589_v61 }
 0x155   :  { %5785 = vmatmul.mubr.bf16.gmra.mrb[44].mxu0 %v7254_v39 }
 0x156   :  { %5801 = vmatpush3.bf16.msra.mxu0 %v6589_v61  ;;  %5804 = vmatprep.mubr.bf16.mxu0 %v6784_v8  ;;  %v1164_v61 = vmax.f32 %v7324_v24, 0.0  ;;  %v6631_v24 = vld [vmem:[%s8235_s3 + $0x200] sm:$0xff]  }
 0x157   :  { %5802 = vmatprep.subr.bf16.mxu0 %v6590_v12 }
 0x158   :  { %v7337_v21 = vpack.c.bf16 %v1166_v33, %v1164_v61 }
 0x15a   :  { %5803 = vmatpush3.bf16.msra.mxu0 %v6590_v12 }
 0x15b   :  { %5820 = vmatprep.subr.bf16.mxu0 %v6591_v9 }
 0x15d   :  { %5805 = vmatmul.mubr.bf16.vlgmr.msra.gmra.mrb[32].mxu0 %v6784_v8  ;;  %v5722_v8 = vpop.f32.mrb[28].mxu1 }
 0x15e   :  { %5808 = vmatprep.mubr.bf16.mxu0 %v7159_v40  ;;  %5821 = vmatpush3.bf16.msra.mxu0 %v6591_v9  ;;  %v1149_v54 = vadd.f32 %v5722_v8, %v7098_v19  ;;  %v1140_v18 = vpop.f32.mrb[29].mxu1  ;;  %v6595_v8 = vld [vmem:[%s8235_s3 + $0xe0] sm:$0xff]  }
 0x15f   :  { %5822 = vmatprep.subr.bf16.mxu0 %v6592_v62  ;;  %v1141_v12 = vadd.f32 %v7098_v19, %v1140_v18  ;;  %v5723_v9 = vpop.f32.mrb[30].mxu1 }
 0x160   :  { %v1169_v0 = vmax.f32 %v1149_v54, 0.0  ;;  %v1152_v52 = vadd.f32 %v5723_v9, %v7098_v19  ;;  %v1143_v10 = vpop.f32.mrb[31].mxu1 }
 0x161   :  { %v1144_v5 = vadd.f32 %v7098_v19, %v1143_v10  ;;  %v6596_v19 = vld [vmem:[%s8235_s3 + $0xe8] sm:$0xff]   ;;  %v6601_v10 = vld [vmem:[%s8235_s3 + $0x110] sm:$0xff]  }
 0x162   :  { %5823 = vmatpush3.bf16.msra.mxu0 %v6592_v62  ;;  %v1167_v62 = vmax.f32 %v1141_v12, 0.0  ;;  %v1170_v30 = vmax.f32 %v1152_v52, 0.0  ;;  %v8249_v12 = vmax.f32 %v7104_v29, 0.0  ;;  %v8250_v52 = vmax.f32 %v7118_v46, 0.0 }
 0x163   :  { %5824 = vmatprep.subr.bf16.mxu0 %v6593_v26  ;;  %v1168_v43 = vmax.f32 %v1144_v5, 0.0  ;;  %v8251_v5 = vmax.f32 %v7195_v45, 0.0 }
 0x164   :  { %v7342_v36 = vpack.c.bf16 %v1169_v0, %v1167_v62  ;;  %v1781_v9 = vpack.c.bf16 %v8249_v12, %v6783_v1  ;;  %v6600_v0 = vld [vmem:[%s8235_s3 + $0x108] sm:$0xff]   ;;  %v1783_v29 = vpack.c.bf16 %v8250_v52, %v6783_v1  ;;  %v6602_v62 = vld [vmem:[%s8235_s3 + $0x118] sm:$0xff]  }
 0x165   :  { %5809 = vmatmul.mubr.bf16.gmra.mrb[36].mxu0 %v7183_v14  ;;  %v7347_v54 = vpack.c.bf16 %v1168_v43, %v1166_v33  ;;  %v7349_v18 = vpack.c.bf16 %v1170_v30, %v1168_v43  ;;  %v6598_v33 = vld [vmem:[%s8235_s3 + $0xf8] sm:$0xff]   ;;  %v1785_v46 = vpack.c.bf16 %v8251_v5, %v6783_v1  ;;  %v6604_v30 = vld [vmem:[%s8235_s3 + $0x128] sm:$0xff]   ;;  %v8252_v43 = vmax.f32 %v7232_v11, 0.0 }
 0x166   :  { %5812 = vmatprep.mubr.bf16.mxu0 %v7175_v2  ;;  %5825 = vmatpush3.bf16.msra.mxu0 %v6593_v26  ;;  %v6597_v26 = vld [vmem:[%s8235_s3 + $0xf0] sm:$0xff]   ;;  %v6608_v11 = vld [vmem:[%s8235_s3 + $0x148] sm:$0xff]   ;;  %v6618_v12 = vld [vmem:[%s8235_s3 + $0x198] sm:$0xff]  }
 0x167   :  { %5826 = vmatprep.subr.bf16.mxu0 %v6594_v57  ;;  %v1787_v45 = vpack.c.bf16 %v8252_v43, %v6783_v1 }
 0x16a   :  { %5827 = vmatpush3.bf16.msra.mxu0 %v6594_v57  ;;  %v6599_v57 = vld [vmem:[%s8235_s3 + $0x100] sm:$0xff]  }
 0x16b   :  { %5828 = vmatprep.subr.bf16.mxu0 %v6595_v8 }
 0x16d   :  { %5813 = vmatmul.mubr.bf16.gmra.mrb[40].mxu0 %v7199_v50 }
 0x16e   :  { %5816 = vmatprep.mubr.bf16.mxu0 %v7234_v16  ;;  %5829 = vmatpush3.bf16.msra.mxu0 %v6595_v8  ;;  %v6606_v8 = vld [vmem:[%s8235_s3 + $0x138] sm:$0xff]  }
 0x16f   :  { %5830 = vmatprep.subr.bf16.mxu0 %v6596_v19 }
 0x172   :  { %5831 = vmatpush3.bf16.msra.mxu0 %v6596_v19  ;;  %v6640_v19 = vld [vmem:[%s8237_s5 + $0x48] sm:$0xff]  }
 0x173   :  { %5832 = vmatprep.subr.bf16.mxu0 %v6597_v26 }
 0x175   :  { %5817 = vmatmul.mubr.bf16.gmra.mrb[44].mxu0 %v7256_v35 }
 0x176   :  { %5833 = vmatpush3.bf16.msra.mxu0 %v6597_v26  ;;  %5836 = vmatprep.mubr.bf16.mxu0 %v1781_v9  ;;  %v6617_v26 = vld [vmem:[%s8235_s3 + $0x190] sm:$0xff]   ;;  %v6645_v9 = vld [vmem:[%s8237_s5 + $0x68] sm:$0xff]  }
 0x177   :  { %5834 = vmatprep.subr.bf16.mxu0 %v6598_v33 }
 0x17a   :  { %5835 = vmatpush3.bf16.msra.mxu0 %v6598_v33  ;;  %v6642_v33 = vld [vmem:[%s8237_s5 + $0x58] sm:$0xff]  }
 0x17b   :  { %5852 = vmatprep.subr.bf16.mxu0 %v6599_v57 }
 0x17d   :  { %5837 = vmatmul.mubr.bf16.vlgmr.msra.gmra.mrb[32].mxu0 %v7134_v3  ;;  %v6603_v3 = vld [vmem:[%s8235_s3 + $0x120] sm:$0xff]  }
 0x17e   :  { %5840 = vmatprep.mubr.bf16.mxu0 %v1783_v29  ;;  %5853 = vmatpush3.bf16.msra.mxu0 %v6599_v57  ;;  %v6620_v57 = vld [vmem:[%s8235_s3 + $0x1a8] sm:$0xff]  }
 0x17f   :  { %5854 = vmatprep.subr.bf16.mxu0 %v6600_v0 }
 0x182   :  { %5855 = vmatpush3.bf16.msra.mxu0 %v6600_v0  ;;  %v2391_v0 = vpack.c.bf16 %v1164_v61, %v6783_v1  ;;  %v6633_v61 = vld [vmem:[%s8235_s3 + $0x210] sm:$0xff]  }
 0x183   :  { %5856 = vmatprep.subr.bf16.mxu0 %v6601_v10 }
 0x185   :  { %5841 = vmatmul.mubr.bf16.gmra.mrb[36].mxu0 %v7148_v27  ;;  %v6605_v27 = vld [vmem:[%s8235_s3 + $0x130] sm:$0xff]  }
 0x186   :  { %5844 = vmatprep.mubr.bf16.mxu0 %v1785_v46  ;;  %5857 = vmatpush3.bf16.msra.mxu0 %v6601_v10 }
 0x187   :  { %5858 = vmatprep.subr.bf16.mxu0 %v6602_v62 }
 0x18a   :  { %5859 = vmatpush3.bf16.msra.mxu0 %v6602_v62 }
 0x18b   :  { %5860 = vmatprep.subr.bf16.mxu0 %v6603_v3 }
 0x18d   :  { %5845 = vmatmul.mubr.bf16.gmra.mrb[40].mxu0 %v7215_v17  ;;  %v6607_v17 = vld [vmem:[%s8235_s3 + $0x140] sm:$0xff]  }
 0x18e   :  { %5848 = vmatprep.mubr.bf16.mxu0 %v1787_v45  ;;  %5861 = vmatpush3.bf16.msra.mxu0 %v6603_v3 }
 0x18f   :  { %5862 = vmatprep.subr.bf16.mxu0 %v6604_v30 }
 0x192   :  { %5863 = vmatpush3.bf16.msra.mxu0 %v6604_v30  ;;  %v6651_v30 = vld [vmem:[%s8237_s5] sm:$0xff]  }
 0x193   :  { %5864 = vmatprep.subr.bf16.mxu0 %v6605_v27 }
 0x195   :  { %5849 = vmatmul.mubr.bf16.gmra.mrb[44].mxu0 %v7262_v47  ;;  %v6610_v47 = vld [vmem:[%s8235_s3 + $0x158] sm:$0xff]  }
 0x196   :  { %5865 = vmatpush3.bf16.msra.mxu0 %v6605_v27  ;;  %5868 = vmatprep.mubr.bf16.mxu0 %v7106_v32  ;;  %v6609_v32 = vld [vmem:[%s8235_s3 + $0x150] sm:$0xff]  }
 0x197   :  { %5866 = vmatprep.subr.bf16.mxu0 %v6606_v8 }
 0x19a   :  { %5867 = vmatpush3.bf16.msra.mxu0 %v6606_v8 }
 0x19b   :  { %5884 = vmatprep.subr.bf16.mxu0 %v6607_v17 }
 0x19d   :  { %5869 = vmatmul.mubr.bf16.vlgmr.msra.gmra.mrb[32].mxu0 %v7130_v60  ;;  %v6612_v60 = vld [vmem:[%s8235_s3 + $0x168] sm:$0xff]  }
 0x19e   :  { %5872 = vmatprep.mubr.bf16.mxu0 %v7122_v53  ;;  %5885 = vmatpush3.bf16.msra.mxu0 %v6607_v17  ;;  %v6611_v53 = vld [vmem:[%s8235_s3 + $0x160] sm:$0xff]  }
 0x19f   :  { %5886 = vmatprep.subr.bf16.mxu0 %v6608_v11 }
 0x1a2   :  { %5887 = vmatpush3.bf16.msra.mxu0 %v6608_v11 }
 0x1a3   :  { %5888 = vmatprep.subr.bf16.mxu0 %v6609_v32 }
 0x1a5   :  { %5873 = vmatmul.mubr.bf16.gmra.mrb[36].mxu0 %v7143_v22  ;;  %v6613_v22 = vld [vmem:[%s8235_s3 + $0x170] sm:$0xff]  }
 0x1a6   :  { %5876 = vmatprep.mubr.bf16.mxu0 %v7201_v51  ;;  %5889 = vmatpush3.bf16.msra.mxu0 %v6609_v32  ;;  %v6614_v51 = vld [vmem:[%s8235_s3 + $0x178] sm:$0xff]  }
 0x1a7   :  { %5890 = vmatprep.subr.bf16.mxu0 %v6610_v47 }
 0x1aa   :  { %5891 = vmatpush3.bf16.msra.mxu0 %v6610_v47 }
 0x1ab   :  { %5892 = vmatprep.subr.bf16.mxu0 %v6611_v53 }
 0x1ad   :  { %5877 = vmatmul.mubr.bf16.gmra.mrb[40].mxu0 %v7213_v15  ;;  %v6639_v15 = vld [vmem:[%s8237_s5 + $0x40] sm:$0xff]  }
 0x1ae   :  { %5880 = vmatprep.mubr.bf16.mxu0 %v7237_v23  ;;  %5893 = vmatpush3.bf16.msra.mxu0 %v6611_v53  ;;  %v6615_v23 = vld [vmem:[%s8235_s3 + $0x180] sm:$0xff]   ;;  %v6653_v53 = vld [vmem:[%s8237_s5 + $0x8] sm:$0xff]  }
 0x1af   :  { %5894 = vmatprep.subr.bf16.mxu0 %v6612_v60  ;;  %6013 = vmatpush3.bf16.msra.mxu1 %v6639_v15 }
 0x1b0   :  { %6014 = vmatprep.subr.bf16.mxu1 %v6783_v1 }
 0x1b2   :  { %5895 = vmatpush3.bf16.msra.mxu0 %v6612_v60 }
 0x1b3   :  { %5896 = vmatprep.subr.bf16.mxu0 %v6613_v22  ;;  %6015 = vmatpush3.bf16.msra.mxu1 %v6640_v19 }
 0x1b4   :  { %6016 = vmatprep.subr.bf16.mxu1 %v6783_v1 }
 0x1b5   :  { %5881 = vmatmul.mubr.bf16.gmra.mrb[44].mxu0 %v7259_v44  ;;  %v6641_v44 = vld [vmem:[%s8237_s5 + $0x50] sm:$0xff]  }
 0x1b6   :  { %5897 = vmatpush3.bf16.msra.mxu0 %v6613_v22  ;;  %5900 = vmatprep.mubr.bf16.mxu0 %v7113_v38  ;;  %v6616_v38 = vld [vmem:[%s8235_s3 + $0x188] sm:$0xff]   ;;  %v6655_v22 = vld [vmem:[%s8237_s5 + $0x10] sm:$0xff]  }
 0x1b7   :  { %5898 = vmatprep.subr.bf16.mxu0 %v6614_v51  ;;  %6017 = vmatpush3.bf16.msra.mxu1 %v6641_v44 }
 0x1b8   :  { %6018 = vmatprep.subr.bf16.mxu1 %v6783_v1 }
 0x1ba   :  { %5899 = vmatpush3.bf16.msra.mxu0 %v6614_v51 }
 0x1bb   :  { %5916 = vmatprep.subr.bf16.mxu0 %v6615_v23  ;;  %6019 = vmatpush3.bf16.msra.mxu1 %v6642_v33 }
 0x1bc   :  { %6020 = vmatprep.subr.bf16.mxu1 %v6783_v1 }
 0x1bd   :  { %5901 = vmatmul.mubr.bf16.vlgmr.msra.gmra.mrb[32].mxu0 %v7136_v4  ;;  %v6643_v4 = vld [vmem:[%s8237_s5 + $0x60] sm:$0xff]  }
 0x1be   :  { %5904 = vmatprep.mubr.bf16.mxu0 %v7128_v58  ;;  %5917 = vmatpush3.bf16.msra.mxu0 %v6615_v23  ;;  %v6619_v58 = vld [vmem:[%s8235_s3 + $0x1a0] sm:$0xff]  }
 0x1bf   :  { %5918 = vmatprep.subr.bf16.mxu0 %v6616_v38  ;;  %6021 = vmatpush3.bf16.msra.mxu1 %v6643_v4  ;;  %v6659_v4 = vld [vmem:[%s8237_s5 + $0x20] sm:$0xff]  }
 0x1c0   :  { %6022 = vmatprep.subr.bf16.mxu1 %v6783_v1 }
 0x1c2   :  { %5919 = vmatpush3.bf16.msra.mxu0 %v6616_v38 }
 0x1c3   :  { %5920 = vmatprep.subr.bf16.mxu0 %v6617_v26  ;;  %6023 = vmatpush3.bf16.msra.mxu1 %v6645_v9 }
 0x1c4   :  { %6024 = vmatprep.subr.bf16.mxu1 %v6783_v1 }
 0x1c5   :  { %5905 = vmatmul.mubr.bf16.gmra.mrb[36].mxu0 %v7150_v28  ;;  %v6621_v28 = vld [vmem:[%s8235_s3 + $0x1b0] sm:$0xff]  }
 0x1c6   :  { %5908 = vmatprep.mubr.bf16.mxu0 %v7206_v56  ;;  %5921 = vmatpush3.bf16.msra.mxu0 %v6617_v26  ;;  %v6622_v56 = vld [vmem:[%s8235_s3 + $0x1b8] sm:$0xff]  }
 0x1c7   :  { %5922 = vmatprep.subr.bf16.mxu0 %v6618_v12  ;;  %v6657_v26 = vld [vmem:[%s8237_s5 + $0x18] sm:$0xff]  }
 0x1ca   :  { %5923 = vmatpush3.bf16.msra.mxu0 %v6618_v12 }
 0x1cb   :  { %5924 = vmatprep.subr.bf16.mxu0 %v6619_v58 }
 0x1cd   :  { %5909 = vmatmul.mubr.bf16.gmra.mrb[40].mxu0 %v7217_v20  ;;  %v6623_v20 = vld [vmem:[%s8235_s3 + $0x1c0] sm:$0xff]  }
 0x1ce   :  { %5912 = vmatprep.mubr.bf16.mxu0 %v7244_v37  ;;  %5925 = vmatpush3.bf16.msra.mxu0 %v6619_v58  ;;  %v6624_v37 = vld [vmem:[%s8235_s3 + $0x1c8] sm:$0xff]   ;;  %v6660_v58 = vld [vmem:[%s8237_s5 + $0x2c0] sm:$0xff]  }
 0x1cf   :  { %5926 = vmatprep.subr.bf16.mxu0 %v6620_v57 }
 0x1d2   :  { %5927 = vmatpush3.bf16.msra.mxu0 %v6620_v57 }
 0x1d3   :  { %5928 = vmatprep.subr.bf16.mxu0 %v6621_v28 }
 0x1d5   :  { %5913 = vmatmul.mubr.bf16.gmra.mrb[44].mxu0 %v7264_v41  ;;  %v6625_v41 = vld [vmem:[%s8235_s3 + $0x1d0] sm:$0xff]  }
 0x1d6   :  { %5929 = vmatpush3.bf16.msra.mxu0 %v6621_v28  ;;  %5932 = vmatprep.mubr.bf16.mxu0 %v7272_v63  ;;  %v6626_v63 = vld [vmem:[%s8235_s3 + $0x1d8] sm:$0xff]  }
 0x1d7   :  { %5930 = vmatprep.subr.bf16.mxu0 %v6622_v56 }
 0x1da   :  { %5931 = vmatpush3.bf16.msra.mxu0 %v6622_v56 }
 0x1db   :  { %5948 = vmatprep.subr.bf16.mxu0 %v6623_v20 }
 0x1dd   :  { %5933 = vmatmul.mubr.bf16.vlgmr.msra.gmra.mrb[32].mxu0 %v7181_v13  ;;  %v6627_v13 = vld [vmem:[%s8235_s3 + $0x1e0] sm:$0xff]  }
 0x1de   :  { %5936 = vmatprep.mubr.bf16.mxu0 %v7286_v25  ;;  %5949 = vmatpush3.bf16.msra.mxu0 %v6623_v20  ;;  %v6628_v25 = vld [vmem:[%s8235_s3 + $0x1e8] sm:$0xff]  }
 0x1df   :  { %5950 = vmatprep.subr.bf16.mxu0 %v6624_v37 }
 0x1e2   :  { %5951 = vmatpush3.bf16.msra.mxu0 %v6624_v37 }
 0x1e3   :  { %5952 = vmatprep.subr.bf16.mxu0 %v6625_v41 }
 0x1e5   :  { %5937 = vmatmul.mubr.bf16.gmra.mrb[36].mxu0 %v7197_v48  ;;  %v6629_v48 = vld [vmem:[%s8235_s3 + $0x1f0] sm:$0xff]  }
 0x1e6   :  { %5940 = vmatprep.mubr.bf16.mxu0 %v7297_v49  ;;  %5953 = vmatpush3.bf16.msra.mxu0 %v6625_v41  ;;  %v6630_v49 = vld [vmem:[%s8235_s3 + $0x1f8] sm:$0xff]  }
 0x1e7   :  { %5954 = vmatprep.subr.bf16.mxu0 %v6626_v63 }
 0x1ea   :  { %5955 = vmatpush3.bf16.msra.mxu0 %v6626_v63 }
 0x1eb   :  { %5956 = vmatprep.subr.bf16.mxu0 %v6627_v13 }
 0x1ed   :  { %5941 = vmatmul.mubr.bf16.gmra.mrb[40].mxu0 %v7254_v39  ;;  %v6632_v39 = vld [vmem:[%s8235_s3 + $0x208] sm:$0xff]  }
 0x1ee   :  { %5944 = vmatprep.mubr.bf16.mxu0 %v2391_v0  ;;  %5957 = vmatpush3.bf16.msra.mxu0 %v6627_v13  ;;  %v6661_v13 = vld [vmem:[%s8237_s5 + $0x28] sm:$0xff]  }
 0x1ef   :  { %5958 = vmatprep.subr.bf16.mxu0 %v6628_v25 }
 0x1f2   :  { %5959 = vmatpush3.bf16.msra.mxu0 %v6628_v25  ;;  %v6662_v25 = vld [vmem:[%s8237_s5 + $0x2c8] sm:$0xff]  }
 0x1f3   :  { %5960 = vmatprep.subr.bf16.mxu0 %v6629_v48 }
 0x1f5   :  { %5945 = vmatmul.mubr.bf16.gmra.mrb[44].mxu0 %v7347_v54  ;;  %v7613_v54 = vld [vmem:[%s8238_s4] ss:$0 sm:$0xff] }
 0x1f6   :  { %5961 = vmatpush3.bf16.msra.mxu0 %v6629_v48  ;;  %5964 = vmatprep.mubr.bf16.mxu0 %v7152_v31  ;;  %v6634_v31 = vld [vmem:[%s8235_s3 + $0x218] sm:$0xff]   ;;  %v6663_v48 = vld [vmem:[%s8237_s5 + $0x30] sm:$0xff]  }
 0x1f7   :  { %5962 = vmatprep.subr.bf16.mxu0 %v6630_v49 }
 0x1fa   :  { %5963 = vmatpush3.bf16.msra.mxu0 %v6630_v49  ;;  %v6664_v49 = vld [vmem:[%s8237_s5 + $0x2d0] sm:$0xff]  }
 0x1fb   :  { %5980 = vmatprep.subr.bf16.mxu0 %v6631_v24 }
 0x1fd   :  { %5965 = vmatmul.mubr.bf16.vlgmr.msra.gmra.mrb[32].mxu0 %v7177_v6  ;;  %v6635_v6 = vld [vmem:[%s8235_s3 + $0x220] sm:$0xff]  }
 0x1fe   :  { %5968 = vmatprep.mubr.bf16.mxu0 %v7169_v59  ;;  %5981 = vmatpush3.bf16.msra.mxu0 %v6631_v24  ;;  %v6636_v59 = vld [vmem:[%s8235_s3 + $0x228] sm:$0xff]  }
 0x1ff   :  { %5982 = vmatprep.subr.bf16.mxu0 %v6632_v39 }
 0x202   :  { %5983 = vmatpush3.bf16.msra.mxu0 %v6632_v39  ;;  %v6665_v39 = vld [vmem:[%s8237_s5 + $0x38] sm:$0xff]  }
 0x203   :  { %5984 = vmatprep.subr.bf16.mxu0 %v6633_v61 }
 0x205   :  { %5969 = vmatmul.mubr.bf16.gmra.mrb[36].mxu0 %v7192_v42  ;;  %v6637_v42 = vld [vmem:[%s8235_s3 + $0x230] sm:$0xff]  }
 0x206   :  { %5972 = vmatprep.mubr.bf16.mxu0 %v7228_v7  ;;  %5985 = vmatpush3.bf16.msra.mxu0 %v6633_v61  ;;  %v6638_v7 = vld [vmem:[%s8235_s3 + $0x238] sm:$0xff]  }
 0x207   :  { %5986 = vmatprep.subr.bf16.mxu0 %v6634_v31  ;;  %v6666_v61 = vld [vmem:[%s8237_s5 + $0x2d8] sm:$0xff]  }
 0x20a   :  { %5987 = vmatpush3.bf16.msra.mxu0 %v6634_v31 }
 0x20b   :  { %5988 = vmatprep.subr.bf16.mxu0 %v6635_v6 }
 0x20d   :  { %5973 = vmatmul.mubr.bf16.gmra.mrb[40].mxu0 %v7251_v55  ;;  %v6644_v55 = vld [vmem:[%s8237_s5 + $0x240] sm:$0xff]  }
 0x20e   :  { %5976 = vmatprep.mubr.bf16.mxu0 %v7327_v34  ;;  %5989 = vmatpush3.bf16.msra.mxu0 %v6635_v6  ;;  %v6646_v34 = vld [vmem:[%s8237_s5 + $0x248] sm:$0xff]   ;;  %v6667_v6 = vld [vmem:[%s8237_s5 + $0x80] sm:$0xff]  }
 0x20f   :  { %5990 = vmatprep.subr.bf16.mxu0 %v6636_v59 }
 0x212   :  { %5991 = vmatpush3.bf16.msra.mxu0 %v6636_v59  ;;  %v6668_v59 = vld [vmem:[%s8237_s5 + $0x2e0] sm:$0xff]  }
 0x213   :  { %5992 = vmatprep.subr.bf16.mxu0 %v6637_v42 }
 0x215   :  { %5977 = vmatmul.mubr.bf16.gmra.mrb[44].mxu0 %v7342_v36  ;;  %v6658_v36 = vld [vmem:[%s8237_s5 + $0x278] sm:$0xff]  }
 0x216   :  { %5993 = vmatpush3.bf16.msra.mxu0 %v6637_v42  ;;  %5996 = vmatprep.mubr.bf16.mxu0 %v7159_v40  ;;  %v6647_v40 = vld [vmem:[%s8237_s5 + $0x70] sm:$0xff]  }
 0x217   :  { %5994 = vmatprep.subr.bf16.mxu0 %v6638_v7  ;;  %6025 = vmatpush3.bf16.msra.mxu1 %v6647_v40  ;;  %v6672_v40 = vld [vmem:[%s8237_s5 + $0x2f0] sm:$0xff]  }
 0x218   :  { %6026 = vmatprep.subr.bf16.mxu1 %v6783_v1 }
 0x21a   :  { %5995 = vmatpush3.bf16.msra.mxu0 %v6638_v7  ;;  %v6669_v7 = vld [vmem:[%s8237_s5 + $0x88] sm:$0xff]  }
 0x21b   :  { %6192 = vmatprep.subr.bf16.mxu0 %v6783_v1 }
 0x21d   :  { %5997 = vmatmul.mubr.bf16.vlgmr.msra.gmra.mrb[32].mxu0 %v7183_v14  ;;  %v6649_v14 = vld [vmem:[%s8237_s5 + $0x78] sm:$0xff]  }
 0x21e   :  { %6000 = vmatprep.mubr.bf16.mxu0 %v7175_v2  ;;  %6193 = vmatpush3.bf16.msra.mxu0 %v6644_v55  ;;  %v6648_v2 = vld [vmem:[%s8237_s5 + $0x250] sm:$0xff]   ;;  %v6670_v55 = vld [vmem:[%s8237_s5 + $0x2e8] sm:$0xff]  }
 0x21f   :  { %6194 = vmatprep.subr.bf16.mxu0 %v6783_v1  ;;  %6027 = vmatpush3.bf16.msra.mxu1 %v6649_v14  ;;  %v6673_v14 = vld [vmem:[%s8237_s5 + $0x98] sm:$0xff]  }
 0x220   :  { %6032 = vmatprep.subr.bf16.mxu1 %v6783_v1 }
 0x222   :  { %6195 = vmatpush3.bf16.msra.mxu0 %v6646_v34  ;;  %v6671_v34 = vld [vmem:[%s8237_s5 + $0x90] sm:$0xff]  }
 0x223   :  { %6196 = vmatprep.subr.bf16.mxu0 %v6783_v1 }
 0x225   :  { %6001 = vmatmul.mubr.bf16.gmra.mrb[36].mxu0 %v7199_v50  ;;  %v6650_v50 = vld [vmem:[%s8237_s5 + $0x258] sm:$0xff]  }
 0x226   :  { %6004 = vmatprep.mubr.bf16.mxu0 %v7234_v16  ;;  %6197 = vmatpush3.bf16.msra.mxu0 %v6648_v2  ;;  %v6652_v16 = vld [vmem:[%s8237_s5 + $0x260] sm:$0xff]  }
 0x227   :  { %6198 = vmatprep.subr.bf16.mxu0 %v6783_v1 }
 0x22a   :  { %6199 = vmatpush3.bf16.msra.mxu0 %v6650_v50  ;;  %v6674_v50 = vld [vmem:[%s8237_s5 + $0x2f8] sm:$0xff]  }
 0x22b   :  { %6200 = vmatprep.subr.bf16.mxu0 %v6783_v1 }
 0x22d   :  { %6005 = vmatmul.mubr.bf16.gmra.mrb[40].mxu0 %v7256_v35  ;;  %v6654_v35 = vld [vmem:[%s8237_s5 + $0x268] sm:$0xff]  }
 0x22e   :  { %6008 = vmatprep.mubr.bf16.mxu0 %v7337_v21  ;;  %6201 = vmatpush3.bf16.msra.mxu0 %v6652_v16  ;;  %v6656_v21 = vld [vmem:[%s8237_s5 + $0x270] sm:$0xff]  }
 0x22f   :  { %6202 = vmatprep.subr.bf16.mxu0 %v6783_v1 }
 0x232   :  { %6203 = vmatpush3.bf16.msra.mxu0 %v6654_v35  ;;  %v6675_v35 = vld [vmem:[%s8237_s5 + $0xa0] sm:$0xff]  }
 0x233   :  { %6204 = vmatprep.subr.bf16.mxu0 %v6783_v1 }
 0x235   :  { %6009 = vmatmul.mubr.bf16.gmra.mrb[44].mxu0 %v7349_v18 }
 0x236   :  { %6208 = vmatprep.mubr.msk.bf16.mxu0 %vm6785_vm0, %v6783_v1  ;;  %6205 = vmatpush3.bf16.msra.mxu0 %v6656_v21  ;;  %v6676_v21 = vld [vmem:[%s8237_s5 + $0x340] sm:$0xff]  }
 0x237   :  { %6206 = vmatprep.subr.bf16.mxu0 %v6783_v1 }
 0x23a   :  { %6207 = vmatpush3.bf16.msra.mxu0 %v6658_v36 }
 0x23b   :  { %6232 = vmatprep.subr.bf16.mxu0 %v6783_v1 }
 0x2f0   :  { %v5998_v18 = vpop.f32.mrb[32].mxu0 }
 0x2f1   :  { %v7616_v52 = vadd.f32 %v5998_v18, %v7613_v54  ;;  %v2893_v29 = vpop.f32.mrb[33].mxu0  ;;  %v6678_v18 = vld [vmem:[%s8237_s5 + $0x348] sm:$0xff]  }
 0x2f2   :  { %v5999_v10 = vpop.f32.mrb[34].mxu0  ;;  %v2978_v24 = vadd.f32 %v7613_v54, %v2893_v29  ;;  %v6679_v29 = vld [vmem:[%s8237_s5 + $0xb0] sm:$0xff]  }
 0x2f3   :  { %v7619_v62 = vadd.f32 %v5999_v10, %v7613_v54  ;;  %v2896_v5 = vpop.f32.mrb[35].mxu0  ;;  %v6680_v10 = vld [vmem:[%s8237_s5 + $0x350] sm:$0xff]  }
 0x2f4   :  { %v2979_v46 = vadd.f32 %v7613_v54, %v2896_v5  ;;  %v2994_v31 = vmax.f32 %v2978_v24, 0.0  ;;  %v6681_v5 = vld [vmem:[%s8237_s5 + $0xb8] sm:$0xff]  }
 0x2f6   :  { %v2995_v3 = vmax.f32 %v2979_v46, 0.0  ;;  %v3010_v42 = vpack.c.bf16 %v2994_v31, %v2994_v31  ;;  %v6682_v46 = vld [vmem:[%s8237_s5 + $0x358] sm:$0xff]   ;;  %v6709_v31 = vld [vmem:[%s8237_s5 + $0x130] sm:$0xff]  }
 0x2f8   :  { %v3027_v43 = vpack.c.bf16 %v2995_v3, %v2995_v3  ;;  %v6002_v45 = vpop.f32.mrb[36].mxu0  ;;  %v2996_v3 = vmax.f32 %v7616_v52, 0.0  ;;  %v6685_v52 = vld [vmem:[%s8237_s5 + $0xc8] sm:$0xff]  }
 0x2f9   :  { %v7626_v27 = vadd.f32 %v6002_v45, %v7613_v54  ;;  %v2909_v8 = vpop.f32.mrb[37].mxu0 }
 0x2fa   :  { %v7629_v17 = vadd.f32 %v7613_v54, %v2909_v8  ;;  %v6003_v11 = vpop.f32.mrb[38].mxu0  ;;  %6029 = vmatmul.mubr.bf16.vlgmr.msra.gmra.mrb[32].mxu1 %v3027_v43  ;;  %v6684_v43 = vld [vmem:[%s8237_s5 + $0x360] sm:$0xff]   ;;  %v3220_v45 = vpack.c.bf16 %v2996_v3, %v2996_v3  ;;  %v6686_v8 = vld [vmem:[%s8237_s5 + $0x368] sm:$0xff]  }
 0x2fb   :  { %v7632_v32 = vadd.f32 %v6003_v11, %v7613_v54  ;;  %6033 = vmatpush3.bf16.msra.mxu1 %v6651_v30  ;;  %v2912_v47 = vpop.f32.mrb[39].mxu0  ;;  %6048 = vmatprep.mubr.msk.bf16.mxu1 %vm6785_vm0, %v6783_v1  ;;  %v6683_v30 = vld [vmem:[%s8237_s5 + $0xc0] sm:$0xff]   ;;  %v6687_v11 = vld [vmem:[%s8237_s5 + $0xd0] sm:$0xff]  }
 0x2fc   :  { %v7640_v60 = vadd.f32 %v7613_v54, %v2912_v47  ;;  %6034 = vmatprep.subr.bf16.mxu1 %v6783_v1  ;;  %v6688_v47 = vld [vmem:[%s8237_s5 + $0x370] sm:$0xff]   ;;  %v6727_v3 = vld [vmem:[%s8237_s5 + $0x1c0] sm:$0xff]  }
 0x2ff   :  { %6035 = vmatpush3.bf16.msra.mxu1 %v6653_v53  ;;  %v6689_v53 = vld [vmem:[%s8237_s5 + $0xd8] sm:$0xff]  }
 0x300   :  { %v6006_v51 = vpop.f32.mrb[40].mxu0  ;;  %6036 = vmatprep.subr.bf16.mxu1 %v6783_v1 }
 0x301   :  { %v7648_v15 = vadd.f32 %v6006_v51, %v7613_v54  ;;  %v2925_v23 = vpop.f32.mrb[41].mxu0 }
 0x302   :  { %v7651_v19 = vadd.f32 %v7613_v54, %v2925_v23  ;;  %v6007_v38 = vpop.f32.mrb[42].mxu0  ;;  %v6691_v23 = vld [vmem:[%s8237_s5 + $0xe0] sm:$0xff]  }
 0x303   :  { %6037 = vmatpush3.bf16.msra.mxu1 %v6655_v22  ;;  %v2928_v44 = vpop.f32.mrb[43].mxu0  ;;  %v2989_v2 = vadd.f32 %v6007_v38, %v7613_v54  ;;  %v6690_v22 = vld [vmem:[%s8237_s5 + $0x378] sm:$0xff]   ;;  %v6692_v38 = vld [vmem:[%s8237_s5 + $0x3c0] sm:$0xff]  }
 0x304   :  { %v2987_v33 = vadd.f32 %v7613_v54, %v2928_v44  ;;  %6038 = vmatprep.subr.bf16.mxu1 %v6783_v1 }
 0x305   :  { %v3005_v16 = vmax.f32 %v2989_v2, 0.0  ;;  %v6716_v2 = vld [vmem:[%s8237_s5 + $0x168] sm:$0xff]  }
 0x306   :  { %v3003_v12 = vmax.f32 %v2987_v33, 0.0  ;;  %v6694_v33 = vld [vmem:[%s8237_s5 + $0x3c8] sm:$0xff]  }
 0x307   :  { %6039 = vmatpush3.bf16.msra.mxu1 %v6657_v26  ;;  %v4174_v36 = vpack.c.bf16 %v3005_v16, %v3005_v16  ;;  %v6693_v26 = vld [vmem:[%s8237_s5 + $0xe8] sm:$0xff]   ;;  %v2999_v16 = vmax.f32 %v7640_v60, 0.0  ;;  %v6721_v60 = vld [vmem:[%s8237_s5 + $0x190] sm:$0xff]  }
 0x308   :  { %v3962_v9 = vpack.c.bf16 %v3003_v12, %v3003_v12  ;;  %v6010_v57 = vpop.f32.mrb[44].mxu0  ;;  %6040 = vmatprep.subr.bf16.mxu1 %v6783_v1  ;;  %v6695_v12 = vld [vmem:[%s8237_s5 + $0xf0] sm:$0xff]  }
 0x309   :  { %v7666_v28 = vadd.f32 %v6010_v57, %v7613_v54  ;;  %v2941_v56 = vpop.f32.mrb[45].mxu0  ;;  %v2997_v57 = vmax.f32 %v7619_v62, 0.0  ;;  %v6701_v62 = vld [vmem:[%s8237_s5 + $0x108] sm:$0xff]  }
 0x30a   :  { %v7669_v20 = vadd.f32 %v7613_v54, %v2941_v56  ;;  %v6011_v37 = vpop.f32.mrb[46].mxu0  ;;  %6209 = vmatmul.mubr.bf16.vlgmr.msra.gmra.mrb[48].mxu0 %v3962_v9  ;;  %v6698_v9 = vld [vmem:[%s8237_s5 + $0x3d8] sm:$0xff]   ;;  %v6699_v56 = vld [vmem:[%s8237_s5 + $0x100] sm:$0xff]  }
 0x30b   :  { %v7672_v41 = vadd.f32 %v6011_v37, %v7613_v54  ;;  %6041 = vmatpush3.bf16.msra.mxu1 %v6659_v4  ;;  %6233 = vmatpush3.bf16.msra.mxu0 %v6660_v58  ;;  %v2944_v63 = vpop.f32.mrb[47].mxu0  ;;  %v6696_v4 = vld [vmem:[%s8237_s5 + $0x3d0] sm:$0xff]   ;;  %v6697_v58 = vld [vmem:[%s8237_s5 + $0xf8] sm:$0xff]   ;;  %v6700_v37 = vld [vmem:[%s8237_s5 + $0x3e0] sm:$0xff]  }
 0x30c   :  { %v7681_v0 = vadd.f32 %v7613_v54, %v2944_v63  ;;  %6042 = vmatprep.subr.bf16.mxu1 %v6783_v1  ;;  %6234 = vmatprep.subr.bf16.mxu0 %v6783_v1  ;;  %v6677_v54 = vld [vmem:[%s8237_s5 + $0xa8] sm:$0xff]   ;;  %v3326_v63 = vpack.c.bf16 %v2997_v57, %v2997_v57  ;;  %v6738_v57 = vld [vmem:[%s8237_s5 + $0x218] sm:$0xff]  }
 0x30d   :  { %6248 = vmatprep.mubr.msk.bf16.mxu0 %vm6785_vm0, %v6783_v1  ;;  %v3009_v24 = vmax.f32 %v7672_v41, 0.0  ;;  %v6708_v41 = vld [vmem:[%s8237_s5 + $0x128] sm:$0xff]  }
 0x30e   :  { %v3007_v51 = vmax.f32 %v7681_v0, 0.0  ;;  %v6704_v0 = vld [vmem:[%s8237_s5 + $0x3f0] sm:$0xff]  }
 0x30f   :  { %6043 = vmatpush3.bf16.msra.mxu1 %v6661_v13  ;;  %6235 = vmatpush3.bf16.msra.mxu0 %v6662_v25  ;;  %v6702_v13 = vld [vmem:[%s8237_s5 + $0x3e8] sm:$0xff]   ;;  %v6703_v25 = vld [vmem:[%s8237_s5 + $0x110] sm:$0xff]  }
 0x310   :  { %6044 = vmatprep.subr.bf16.mxu1 %v6783_v1  ;;  %6236 = vmatprep.subr.bf16.mxu0 %v6783_v1  ;;  %v4386_v44 = vpack.c.bf16 %v3007_v51, %v3007_v51 }
 0x313   :  { %6045 = vmatpush3.bf16.msra.mxu1 %v6663_v48  ;;  %6237 = vmatpush3.bf16.msra.mxu0 %v6664_v49  ;;  %v6705_v48 = vld [vmem:[%s8237_s5 + $0x118] sm:$0xff]  }
 0x314   :  { %6046 = vmatprep.subr.bf16.mxu1 %v6783_v1  ;;  %6238 = vmatprep.subr.bf16.mxu0 %v6783_v1  ;;  %v6706_v49 = vld [vmem:[%s8237_s5 + $0x3f8] sm:$0xff]  }
 0x317   :  { %6047 = vmatpush3.bf16.msra.mxu1 %v6665_v39  ;;  %6239 = vmatpush3.bf16.msra.mxu0 %v6666_v61  ;;  %v6707_v39 = vld [vmem:[%s8237_s5 + $0x120] sm:$0xff]   ;;  %v4598_v61 = vpack.c.bf16 %v3009_v24, %v3009_v24  ;;  %v3002_v24 = vmax.f32 %v7651_v19, 0.0 }
 0x318   :  { %6052 = vmatprep.subr.bf16.mxu1 %v6783_v1  ;;  %6240 = vmatprep.subr.bf16.mxu0 %v6783_v1 }
 0x31a   :  { %6049 = vmatmul.mubr.bf16.vlgmr.msra.gmra.mrb[36].mxu1 %v3010_v42  ;;  %v6711_v42 = vld [vmem:[%s8237_s5 + $0x140] sm:$0xff]  }
 0x31b   :  { %6053 = vmatpush3.bf16.msra.mxu1 %v6667_v6  ;;  %6241 = vmatpush3.bf16.msra.mxu0 %v6668_v59  ;;  %v6710_v6 = vld [vmem:[%s8237_s5 + $0x138] sm:$0xff]   ;;  %v2998_v59 = vmax.f32 %v7629_v17, 0.0  ;;  %v6713_v17 = vld [vmem:[%s8237_s5 + $0x150] sm:$0xff]  }
 0x31c   :  { %6054 = vmatprep.subr.bf16.mxu1 %v6783_v1  ;;  %6242 = vmatprep.subr.bf16.mxu0 %v6783_v1 }
 0x31d   :  { %6068 = vmatprep.mubr.msk.bf16.mxu1 %vm6785_vm0, %v6783_v1 }
 0x31f   :  { %6055 = vmatpush3.bf16.msra.mxu1 %v6669_v7  ;;  %6243 = vmatpush3.bf16.msra.mxu0 %v6670_v55  ;;  %v3432_v7 = vpack.c.bf16 %v2998_v59, %v2998_v59  ;;  %v6712_v55 = vld [vmem:[%s8237_s5 + $0x148] sm:$0xff]   ;;  %v6745_v59 = vld [vmem:[%s8237_s5 + $0x290] sm:$0xff]  }
 0x320   :  { %6056 = vmatprep.subr.bf16.mxu1 %v6783_v1  ;;  %6244 = vmatprep.subr.bf16.mxu0 %v6783_v1 }
 0x323   :  { %6057 = vmatpush3.bf16.msra.mxu1 %v6671_v34  ;;  %6245 = vmatpush3.bf16.msra.mxu0 %v6672_v40  ;;  %v6714_v34 = vld [vmem:[%s8237_s5 + $0x158] sm:$0xff]   ;;  %v6715_v40 = vld [vmem:[%s8237_s5 + $0x160] sm:$0xff]  }
 0x324   :  { %6058 = vmatprep.subr.bf16.mxu1 %v6783_v1  ;;  %6246 = vmatprep.subr.bf16.mxu0 %v6783_v1 }
 0x327   :  { %6059 = vmatpush3.bf16.msra.mxu1 %v6673_v14  ;;  %6247 = vmatpush3.bf16.msra.mxu0 %v6674_v50  ;;  %v6717_v14 = vld [vmem:[%s8237_s5 + $0x170] sm:$0xff]   ;;  %v6718_v50 = vld [vmem:[%s8237_s5 + $0x178] sm:$0xff]  }
 0x328   :  { %6060 = vmatprep.subr.bf16.mxu1 %v6783_v1  ;;  %6272 = vmatprep.subr.bf16.mxu0 %v6783_v1 }
 0x32a   :  { %6249 = vmatmul.mubr.bf16.vlgmr.msra.gmra.mrb[52].mxu0 %v4174_v36  ;;  %v6720_v36 = vld [vmem:[%s8237_s5 + $0x188] sm:$0xff]  }
 0x32b   :  { %6061 = vmatpush3.bf16.msra.mxu1 %v6675_v35  ;;  %6273 = vmatpush3.bf16.msra.mxu0 %v6676_v21  ;;  %v6719_v35 = vld [vmem:[%s8237_s5 + $0x180] sm:$0xff]   ;;  %v3538_v21 = vpack.c.bf16 %v2999_v16, %v2999_v16 }
 0x32c   :  { %6062 = vmatprep.subr.bf16.mxu1 %v6783_v1  ;;  %6274 = vmatprep.subr.bf16.mxu0 %v6783_v1 }
 0x32d   :  { %6288 = vmatprep.mubr.msk.bf16.mxu0 %vm6785_vm0, %v6783_v1 }
 0x32f   :  { %6063 = vmatpush3.bf16.msra.mxu1 %v6677_v54  ;;  %6275 = vmatpush3.bf16.msra.mxu0 %v6678_v18  ;;  %v6722_v54 = vld [vmem:[%s8237_s5 + $0x198] sm:$0xff]   ;;  %v6723_v18 = vld [vmem:[%s8237_s5 + $0x1a0] sm:$0xff]  }
 0x330   :  { %6064 = vmatprep.subr.bf16.mxu1 %v6783_v1  ;;  %6276 = vmatprep.subr.bf16.mxu0 %v6783_v1 }
 0x333   :  { %6065 = vmatpush3.bf16.msra.mxu1 %v6679_v29  ;;  %6277 = vmatpush3.bf16.msra.mxu0 %v6680_v10  ;;  %v6724_v29 = vld [vmem:[%s8237_s5 + $0x1a8] sm:$0xff]   ;;  %v6725_v10 = vld [vmem:[%s8237_s5 + $0x1b0] sm:$0xff]  }
 0x334   :  { %6066 = vmatprep.subr.bf16.mxu1 %v6783_v1  ;;  %6278 = vmatprep.subr.bf16.mxu0 %v6783_v1 }
 0x337   :  { %6067 = vmatpush3.bf16.msra.mxu1 %v6681_v5  ;;  %6279 = vmatpush3.bf16.msra.mxu0 %v6682_v46  ;;  %v6726_v5 = vld [vmem:[%s8237_s5 + $0x1b8] sm:$0xff]   ;;  %v3000_v46 = vmax.f32 %v7626_v27, 0.0  ;;  %v6729_v27 = vld [vmem:[%s8237_s5 + $0x1d0] sm:$0xff]  }
 0x338   :  { %6072 = vmatprep.subr.bf16.mxu1 %v6783_v1  ;;  %6280 = vmatprep.subr.bf16.mxu0 %v6783_v1 }
 0x33a   :  { %6069 = vmatmul.mubr.bf16.vlgmr.msra.gmra.mrb[40].mxu1 %v3220_v45  ;;  %v6730_v45 = vld [vmem:[%s8237_s5 + $0x1d8] sm:$0xff]  }
 0x33b   :  { %6073 = vmatpush3.bf16.msra.mxu1 %v6683_v30  ;;  %6281 = vmatpush3.bf16.msra.mxu0 %v6684_v43  ;;  %v3644_v30 = vpack.c.bf16 %v3000_v46, %v3000_v46  ;;  %v6728_v43 = vld [vmem:[%s8237_s5 + $0x1c8] sm:$0xff]   ;;  %v6754_v46 = vld [vmem:[%s8237_s5 + $0x318] sm:$0xff]  }
 0x33c   :  { %6074 = vmatprep.subr.bf16.mxu1 %v6783_v1  ;;  %6282 = vmatprep.subr.bf16.mxu0 %v6783_v1 }
 0x33d   :  { %6088 = vmatprep.mubr.msk.bf16.mxu1 %vm6785_vm0, %v6783_v1 }
 0x33f   :  { %6075 = vmatpush3.bf16.msra.mxu1 %v6685_v52  ;;  %6283 = vmatpush3.bf16.msra.mxu0 %v6686_v8  ;;  %v6731_v52 = vld [vmem:[%s8237_s5 + $0x1e0] sm:$0xff]   ;;  %v6732_v8 = vld [vmem:[%s8237_s5 + $0x1e8] sm:$0xff]  }
 0x340   :  { %6076 = vmatprep.subr.bf16.mxu1 %v6783_v1  ;;  %6284 = vmatprep.subr.bf16.mxu0 %v6783_v1 }
 0x343   :  { %6077 = vmatpush3.bf16.msra.mxu1 %v6687_v11  ;;  %6285 = vmatpush3.bf16.msra.mxu0 %v6688_v47 }
 0x344   :  { %6078 = vmatprep.subr.bf16.mxu1 %v6783_v1  ;;  %6286 = vmatprep.subr.bf16.mxu0 %v6783_v1 }
 0x347   :  { %6079 = vmatpush3.bf16.msra.mxu1 %v6689_v53  ;;  %6287 = vmatpush3.bf16.msra.mxu0 %v6690_v22  ;;  %v6733_v22 = vld [vmem:[%s8237_s5 + $0x1f0] sm:$0xff]  }
 0x348   :  { %6080 = vmatprep.subr.bf16.mxu1 %v6783_v1  ;;  %6312 = vmatprep.subr.bf16.mxu0 %v6783_v1 }
 0x34a   :  { %6289 = vmatmul.mubr.bf16.vlgmr.msra.gmra.mrb[56].mxu0 %v4386_v44  ;;  %v6735_v44 = vld [vmem:[%s8237_s5 + $0x200] sm:$0xff]  }
 0x34b   :  { %6081 = vmatpush3.bf16.msra.mxu1 %v6691_v23  ;;  %6313 = vmatpush3.bf16.msra.mxu0 %v6692_v38  ;;  %v6734_v23 = vld [vmem:[%s8237_s5 + $0x1f8] sm:$0xff]   ;;  %v3001_v38 = vmax.f32 %v7632_v32, 0.0 }
 0x34c   :  { %6082 = vmatprep.subr.bf16.mxu1 %v6783_v1  ;;  %6314 = vmatprep.subr.bf16.mxu0 %v6783_v1 }
 0x34d   :  { %6328 = vmatprep.mubr.msk.bf16.mxu0 %vm6785_vm0, %v6783_v1 }
 0x34f   :  { %6083 = vmatpush3.bf16.msra.mxu1 %v6693_v26  ;;  %6315 = vmatpush3.bf16.msra.mxu0 %v6694_v33  ;;  %v3750_v26 = vpack.c.bf16 %v3001_v38, %v3001_v38  ;;  %v6736_v33 = vld [vmem:[%s8237_s5 + $0x208] sm:$0xff]  }
 0x350   :  { %6084 = vmatprep.subr.bf16.mxu1 %v6783_v1  ;;  %6316 = vmatprep.subr.bf16.mxu0 %v6783_v1 }
 0x353   :  { %6085 = vmatpush3.bf16.msra.mxu1 %v6695_v12  ;;  %6317 = vmatpush3.bf16.msra.mxu0 %v6696_v4 }
 0x354   :  { %6086 = vmatprep.subr.bf16.mxu1 %v6783_v1  ;;  %6318 = vmatprep.subr.bf16.mxu0 %v6783_v1 }
 0x357   :  { %6087 = vmatpush3.bf16.msra.mxu1 %v6697_v58  ;;  %6319 = vmatpush3.bf16.msra.mxu0 %v6698_v9  ;;  %v6737_v58 = vld [vmem:[%s8237_s5 + $0x210] sm:$0xff]  }
 0x358   :  { %6092 = vmatprep.subr.bf16.mxu1 %v6783_v1  ;;  %6320 = vmatprep.subr.bf16.mxu0 %v6783_v1 }
 0x35a   :  { %6089 = vmatmul.mubr.bf16.vlgmr.msra.gmra.mrb[44].mxu1 %v3326_v63 }
 0x35b   :  { %6093 = vmatpush3.bf16.msra.mxu1 %v6699_v56  ;;  %6321 = vmatpush3.bf16.msra.mxu0 %v6700_v37  ;;  %v6739_v56 = vld [vmem:[%s8237_s5 + $0x220] sm:$0xff]   ;;  %v6740_v37 = vld [vmem:[%s8237_s5 + $0x228] sm:$0xff]  }
 0x35c   :  { %6094 = vmatprep.subr.bf16.mxu1 %v6783_v1  ;;  %6322 = vmatprep.subr.bf16.mxu0 %v6783_v1 }
 0x35d   :  { %6108 = vmatprep.mubr.msk.bf16.mxu1 %vm6785_vm0, %v6783_v1 }
 0x35f   :  { %6095 = vmatpush3.bf16.msra.mxu1 %v6701_v62  ;;  %6323 = vmatpush3.bf16.msra.mxu0 %v6702_v13 }
 0x360   :  { %6096 = vmatprep.subr.bf16.mxu1 %v6783_v1  ;;  %6324 = vmatprep.subr.bf16.mxu0 %v6783_v1 }
 0x363   :  { %6097 = vmatpush3.bf16.msra.mxu1 %v6703_v25  ;;  %6325 = vmatpush3.bf16.msra.mxu0 %v6704_v0  ;;  %v6741_v0 = vld [vmem:[%s8237_s5 + $0x230] sm:$0xff]  }
 0x364   :  { %6098 = vmatprep.subr.bf16.mxu1 %v6783_v1  ;;  %6326 = vmatprep.subr.bf16.mxu0 %v6783_v1 }
 0x367   :  { %6099 = vmatpush3.bf16.msra.mxu1 %v6705_v48  ;;  %6327 = vmatpush3.bf16.msra.mxu0 %v6706_v49  ;;  %v6742_v49 = vld [vmem:[%s8237_s5 + $0x238] sm:$0xff]  }
 0x368   :  { %6100 = vmatprep.subr.bf16.mxu1 %v6783_v1  ;;  %6352 = vmatprep.subr.bf16.mxu0 %v6783_v1 }
 0x36a   :  { %6329 = vmatmul.mubr.bf16.vlgmr.msra.gmra.mrb[60].mxu0 %v4598_v61  ;;  %v3856_v61 = vpack.c.bf16 %v3002_v24, %v3002_v24 }
 0x36b   :  { %6101 = vmatpush3.bf16.msra.mxu1 %v6707_v39  ;;  %6368 = vmatprep.mubr.msk.bf16.mxu0 %vm6785_vm0, %v6783_v1  ;;  %v6743_v39 = vld [vmem:[%s8237_s5 + $0x280] sm:$0xff]  }
 0x36c   :  { %6102 = vmatprep.subr.bf16.mxu1 %v6783_v1 }
 0x36f   :  { %6103 = vmatpush3.bf16.msra.mxu1 %v6708_v41  ;;  %v6744_v41 = vld [vmem:[%s8237_s5 + $0x288] sm:$0xff]  }
 0x370   :  { %6104 = vmatprep.subr.bf16.mxu1 %v6783_v1 }
 0x373   :  { %6105 = vmatpush3.bf16.msra.mxu1 %v6709_v31 }
 0x374   :  { %6106 = vmatprep.subr.bf16.mxu1 %v6783_v1 }
 0x377   :  { %6107 = vmatpush3.bf16.msra.mxu1 %v6710_v6 }
 0x378   :  { %6112 = vmatprep.subr.bf16.mxu1 %v6783_v1 }
 0x37a   :  { %6109 = vmatmul.mubr.bf16.vlgmr.msra.gmra.mrb[48].mxu1 %v3432_v7  ;;  %v6746_v7 = vld [vmem:[%s8237_s5 + $0x298] sm:$0xff]  }
 0x37b   :  { %6113 = vmatpush3.bf16.msra.mxu1 %v6711_v42  ;;  %6128 = vmatprep.mubr.msk.bf16.mxu1 %vm6785_vm0, %v6783_v1 }
 0x37c   :  { %6114 = vmatprep.subr.bf16.mxu1 %v6783_v1 }
 0x37f   :  { %6115 = vmatpush3.bf16.msra.mxu1 %v6712_v55  ;;  %v6747_v55 = vld [vmem:[%s8237_s5 + $0x2a0] sm:$0xff]  }
 0x380   :  { %6116 = vmatprep.subr.bf16.mxu1 %v6783_v1 }
 0x383   :  { %6117 = vmatpush3.bf16.msra.mxu1 %v6713_v17  ;;  %v6748_v17 = vld [vmem:[%s8237_s5 + $0x2a8] sm:$0xff]  }
 0x384   :  { %6118 = vmatprep.subr.bf16.mxu1 %v6783_v1 }
 0x387   :  { %6119 = vmatpush3.bf16.msra.mxu1 %v6714_v34 }
 0x388   :  { %6120 = vmatprep.subr.bf16.mxu1 %v6783_v1 }
 0x38b   :  { %6121 = vmatpush3.bf16.msra.mxu1 %v6715_v40 }
 0x38c   :  { %6122 = vmatprep.subr.bf16.mxu1 %v6783_v1 }
 0x38f   :  { %6123 = vmatpush3.bf16.msra.mxu1 %v6716_v2 }
 0x390   :  { %6124 = vmatprep.subr.bf16.mxu1 %v6783_v1 }
 0x393   :  { %6125 = vmatpush3.bf16.msra.mxu1 %v6717_v14 }
 0x394   :  { %6126 = vmatprep.subr.bf16.mxu1 %v6783_v1 }
 0x397   :  { %6127 = vmatpush3.bf16.msra.mxu1 %v6718_v50  ;;  %v6749_v50 = vld [vmem:[%s8237_s5 + $0x2b0] sm:$0xff]  }
 0x398   :  { %6132 = vmatprep.subr.bf16.mxu1 %v6783_v1 }
 0x39a   :  { %6129 = vmatmul.mubr.bf16.vlgmr.msra.gmra.mrb[52].mxu1 %v3538_v21  ;;  %v3004_v21 = vmax.f32 %v7648_v15, 0.0 }
 0x39b   :  { %6133 = vmatpush3.bf16.msra.mxu1 %v6719_v35  ;;  %6148 = vmatprep.mubr.msk.bf16.mxu1 %vm6785_vm0, %v6783_v1  ;;  %v6750_v35 = vld [vmem:[%s8237_s5 + $0x2b8] sm:$0xff]  }
 0x39c   :  { %6134 = vmatprep.subr.bf16.mxu1 %v6783_v1 }
 0x39f   :  { %6135 = vmatpush3.bf16.msra.mxu1 %v6720_v36  ;;  %v6751_v36 = vld [vmem:[%s8237_s5 + $0x300] sm:$0xff]  }
 0x3a0   :  { %6136 = vmatprep.subr.bf16.mxu1 %v6783_v1 }
 0x3a3   :  { %6137 = vmatpush3.bf16.msra.mxu1 %v6721_v60  ;;  %v4068_v60 = vpack.c.bf16 %v3004_v21, %v3004_v21 }
 0x3a4   :  { %6138 = vmatprep.subr.bf16.mxu1 %v6783_v1 }
 0x3a7   :  { %6139 = vmatpush3.bf16.msra.mxu1 %v6722_v54  ;;  %v6752_v54 = vld [vmem:[%s8237_s5 + $0x308] sm:$0xff]  }
 0x3a8   :  { %6140 = vmatprep.subr.bf16.mxu1 %v6783_v1 }
 0x3ab   :  { %6141 = vmatpush3.bf16.msra.mxu1 %v6723_v18 }
 0x3ac   :  { %6142 = vmatprep.subr.bf16.mxu1 %v6783_v1 }
 0x3af   :  { %6143 = vmatpush3.bf16.msra.mxu1 %v6724_v29 }
 0x3b0   :  { %6144 = vmatprep.subr.bf16.mxu1 %v6783_v1 }
 0x3b3   :  { %6145 = vmatpush3.bf16.msra.mxu1 %v6725_v10  ;;  %v6753_v10 = vld [vmem:[%s8237_s5 + $0x310] sm:$0xff]  }
 0x3b4   :  { %6146 = vmatprep.subr.bf16.mxu1 %v6783_v1 }
 0x3b7   :  { %6147 = vmatpush3.bf16.msra.mxu1 %v6726_v5 }
 0x3b8   :  { %6152 = vmatprep.subr.bf16.mxu1 %v6783_v1 }
 0x3ba   :  { %6149 = vmatmul.mubr.bf16.vlgmr.msra.gmra.mrb[56].mxu1 %v3644_v30  ;;  %v6756_v30 = vld [vmem:[%s8237_s5 + $0x328] sm:$0xff]  }
 0x3bb   :  { %6153 = vmatpush3.bf16.msra.mxu1 %v6727_v3  ;;  %6168 = vmatprep.mubr.msk.bf16.mxu1 %vm6785_vm0, %v6783_v1  ;;  %v6755_v3 = vld [vmem:[%s8237_s5 + $0x320] sm:$0xff]  }
 0x3bc   :  { %6154 = vmatprep.subr.bf16.mxu1 %v6783_v1 }
 0x3bf   :  { %6155 = vmatpush3.bf16.msra.mxu1 %v6728_v43 }
 0x3c0   :  { %6156 = vmatprep.subr.bf16.mxu1 %v6783_v1 }
 0x3c3   :  { %6157 = vmatpush3.bf16.msra.mxu1 %v6729_v27 }
 0x3c4   :  { %6158 = vmatprep.subr.bf16.mxu1 %v6783_v1 }
 0x3c7   :  { %6159 = vmatpush3.bf16.msra.mxu1 %v6730_v45 }
 0x3c8   :  { %6160 = vmatprep.subr.bf16.mxu1 %v6783_v1 }
 0x3cb   :  { %6161 = vmatpush3.bf16.msra.mxu1 %v6731_v52 }
 0x3cc   :  { %6162 = vmatprep.subr.bf16.mxu1 %v6783_v1 }
 0x3cd   :  { %v3126_v11 = vpop.f32.mrb[32].mxu1 }
 0x3ce   :  { %v6030_v47 = vpop.f32.mrb[33].mxu1 }
 0x3cf   :  { %6163 = vmatpush3.bf16.msra.mxu1 %v6732_v8  ;;  %v3129_v53 = vpop.f32.mrb[34].mxu1  ;;  %v6757_v8 = vld [vmem:[%s8237_s5 + $0x330] sm:$0xff]   ;;  %v6758_v47 = vld [vmem:[%s8237_s5 + $0x338] sm:$0xff]  }
 0x3d0   :  { %v6031_v51 = vpop.f32.mrb[35].mxu1  ;;  %6164 = vmatprep.subr.bf16.mxu1 %v6783_v1  ;;  %v3006_v53 = vmax.f32 %v7669_v20, 0.0 }
 0x3d2   :  { %v4280_v51 = vpack.c.bf16 %v3006_v53, %v3006_v53 }
 0x3d3   :  { %6165 = vmatpush3.bf16.msra.mxu1 %v6733_v22  ;;  %v6759_v22 = vld [vmem:[%s8237_s5 + $0x380] sm:$0xff]  }
 0x3d4   :  { %6166 = vmatprep.subr.bf16.mxu1 %v6783_v1 }
 0x3d7   :  { %6167 = vmatpush3.bf16.msra.mxu1 %v6734_v23  ;;  %v6760_v23 = vld [vmem:[%s8237_s5 + $0x388] sm:$0xff]  }
 0x3d8   :  { %6172 = vmatprep.subr.bf16.mxu1 %v6783_v1 }
 0x3da   :  { %6169 = vmatmul.mubr.bf16.vlgmr.msra.gmra.mrb[60].mxu1 %v3750_v26  ;;  %v6761_v26 = vld [vmem:[%s8237_s5 + $0x390] sm:$0xff]  }
 0x3db   :  { %6173 = vmatpush3.bf16.msra.mxu1 %v6735_v44  ;;  %6188 = vmatprep.mubr.msk.bf16.mxu1 %vm6785_vm0, %v6783_v1 }
 0x3dc   :  { %6174 = vmatprep.subr.bf16.mxu1 %v6783_v1 }
 0x3dd   :  { %v8014_v32 = vpop.f32.mrb[48].mxu0 }
 0x3de   :  { %v6210_v12 = vpop.f32.mrb[49].mxu0 }
 0x3df   :  { %6175 = vmatpush3.bf16.msra.mxu1 %v6736_v33  ;;  %v4064_v4 = vpop.f32.mrb[50].mxu0  ;;  %v6762_v12 = vld [vmem:[%s8237_s5 + $0x398] sm:$0xff]  }
 0x3e0   :  { %v6211_v9 = vpop.f32.mrb[51].mxu0  ;;  %6176 = vmatprep.subr.bf16.mxu1 %v6783_v1  ;;  %v6763_v4 = vld [vmem:[%s8237_s5 + $0x3a0] sm:$0xff]  }
 0x3e3   :  { %6177 = vmatpush3.bf16.msra.mxu1 %v6737_v58  ;;  %v6764_v58 = vld [vmem:[%s8237_s5 + $0x3a8] sm:$0xff]  }
 0x3e4   :  { %6178 = vmatprep.subr.bf16.mxu1 %v6783_v1 }
 0x3e7   :  { %6179 = vmatpush3.bf16.msra.mxu1 %v6738_v57 }
 0x3e8   :  { %6180 = vmatprep.subr.bf16.mxu1 %v6783_v1 }
 0x3eb   :  { %6181 = vmatpush3.bf16.msra.mxu1 %v6739_v56 }
 0x3ec   :  { %6182 = vmatprep.subr.bf16.mxu1 %v6783_v1 }
 0x3ed   :  { %v3214_v63 = vpop.f32.mrb[36].mxu1 }
 0x3ee   :  { %v3215_v62 = vadd.f32 %v3214_v63, %v3126_v11  ;;  %v6050_v13 = vpop.f32.mrb[37].mxu1  ;;  %v6765_v63 = vld [vmem:[%s8237_s5 + $0x3b0] sm:$0xff]  }
 0x3ef   :  { %v3217_v25 = vpop.f32.mrb[38].mxu1  ;;  %6183 = vmatpush3.bf16.msra.mxu1 %v6740_v37  ;;  %v6766_v13 = vld [vmem:[%s8237_s5 + $0x3b8] sm:$0xff]  }
 0x3f0   :  { %v6051_v48 = vpop.f32.mrb[39].mxu1  ;;  %6184 = vmatprep.subr.bf16.mxu1 %v6783_v1  ;;  %v3008_v25 = vmax.f32 %v7666_v28, 0.0 }
 0x3f3   :  { %6185 = vmatpush3.bf16.msra.mxu1 %v6741_v0  ;;  %v4492_v0 = vpack.c.bf16 %v3008_v25, %v3008_v25 }
 0x3f4   :  { %6186 = vmatprep.subr.bf16.mxu1 %v6783_v1 }
 0x3f7   :  { %6187 = vmatpush3.bf16.msra.mxu1 %v6742_v49 }
 0x3f8   :  { %6212 = vmatprep.subr.bf16.mxu1 %v6783_v1 }
 0x3fa   :  { %6189 = vmatmul.mubr.bf16.vlgmr.msra.gmra.mrb[64].mxu1 %v3856_v61 }
 0x3fb   :  { %6213 = vmatpush3.bf16.msra.mxu1 %v6743_v39  ;;  %6228 = vmatprep.mubr.msk.bf16.mxu1 %vm6785_vm0, %v6783_v1 }
 0x3fc   :  { %6214 = vmatprep.subr.bf16.mxu1 %v6783_v1 }
 0x3fd   :  { %v8051_v19 = vpop.f32.mrb[52].mxu0 }
 0x3fe   :  { %v6250_v31 = vpop.f32.mrb[53].mxu0 }
 0x3ff   :  { %6215 = vmatpush3.bf16.msra.mxu1 %v6744_v41  ;;  %v4276_v6 = vpop.f32.mrb[54].mxu0 }
 0x400   :  { %v6251_v42 = vpop.f32.mrb[55].mxu0  ;;  %6216 = vmatprep.subr.bf16.mxu1 %v6783_v1 }
 0x401   :  { %v6767_v42 = vld [vmem:[%s8239_s7] sm:$0xff]  }
 0x403   :  { %6217 = vmatpush3.bf16.msra.mxu1 %v6745_v59 }
 0x404   :  { %6218 = vmatprep.subr.bf16.mxu1 %v6783_v1 }
 0x407   :  { %6219 = vmatpush3.bf16.msra.mxu1 %v6746_v7  ;;  %v6768_v7 = vld [vmem:[%s8239_s7 + $0x8] sm:$0xff]  }
 0x408   :  { %6220 = vmatprep.subr.bf16.mxu1 %v6783_v1 }
 0x40b   :  { %6221 = vmatpush3.bf16.msra.mxu1 %v6747_v55  ;;  %v6769_v55 = vld [vmem:[%s8239_s7 + $0x10] sm:$0xff]  }
 0x40c   :  { %6222 = vmatprep.subr.bf16.mxu1 %v6783_v1 }
 0x40d   :  { %v3319_v34 = vpop.f32.mrb[40].mxu1 }
 0x40e   :  { %v3325_v40 = vadd.f32 %v3319_v34, %v3215_v62  ;;  %v6070_v2 = vpop.f32.mrb[41].mxu1  ;;  %v6771_v34 = vld [vmem:[%s8239_s7 + $0x20] sm:$0xff]  }
 0x40f   :  { %v3322_v14 = vpop.f32.mrb[42].mxu1  ;;  %6223 = vmatpush3.bf16.msra.mxu1 %v6748_v17  ;;  %v6770_v17 = vld [vmem:[%s8239_s7 + $0x18] sm:$0xff]  }
 0x410   :  { %v6071_v16 = vpop.f32.mrb[43].mxu1  ;;  %6224 = vmatprep.subr.bf16.mxu1 %v6783_v1  ;;  %v6773_v14 = vld [vmem:[%s8239_s7 + $0x30] sm:$0xff]  }
 0x413   :  { %6225 = vmatpush3.bf16.msra.mxu1 %v6749_v50 }
 0x414   :  { %6226 = vmatprep.subr.bf16.mxu1 %v6783_v1 }
 0x417   :  { %6227 = vmatpush3.bf16.msra.mxu1 %v6750_v35 }
 0x418   :  { %6252 = vmatprep.subr.bf16.mxu1 %v6783_v1 }
 0x41a   :  { %6229 = vmatmul.mubr.bf16.vlgmr.msra.gmra.mrb[68].mxu1 %v4068_v60  ;;  %v6775_v60 = vld [vmem:[%s8240_s9] sm:$0xff]  }
 0x41b   :  { %6253 = vmatpush3.bf16.msra.mxu1 %v6751_v36  ;;  %6268 = vmatprep.mubr.msk.bf16.mxu1 %vm6785_vm0, %v6783_v1  ;;  %v6774_v36 = vld [vmem:[%s8239_s7 + $0x38] sm:$0xff]  }
 0x41c   :  { %6254 = vmatprep.subr.bf16.mxu1 %v6783_v1  ;;  %6353 = vmatpush3.bf16.msra.mxu0 %v6775_v60 }
 0x41d   :  { %v8088_v15 = vpop.f32.mrb[56].mxu0  ;;  %6354 = vmatprep.subr.bf16.mxu0 %v6783_v1 }
 0x41e   :  { %v6290_v18 = vpop.f32.mrb[57].mxu0 }
 0x41f   :  { %6255 = vmatpush3.bf16.msra.mxu1 %v6752_v54  ;;  %v4488_v29 = vpop.f32.mrb[58].mxu0  ;;  %v6776_v54 = vld [vmem:[%s8240_s9 + $0x8] sm:$0xff]   ;;  %v6777_v18 = vld [vmem:[%s8240_s9 + $0x10] sm:$0xff]  }
 0x420   :  { %v6291_v5 = vpop.f32.mrb[59].mxu0  ;;  %6256 = vmatprep.subr.bf16.mxu1 %v6783_v1  ;;  %6355 = vmatpush3.bf16.msra.mxu0 %v6776_v54  ;;  %v6778_v29 = vld [vmem:[%s8240_s9 + $0x18] sm:$0xff]  }
 0x421   :  { %6356 = vmatprep.subr.bf16.mxu0 %v6783_v1  ;;  %v6780_v5 = vld [vmem:[%s8240_s9 + $0x28] sm:$0xff]  }
 0x423   :  { %6257 = vmatpush3.bf16.msra.mxu1 %v6753_v10  ;;  %v6779_v10 = vld [vmem:[%s8240_s9 + $0x20] sm:$0xff]  }
 0x424   :  { %6258 = vmatprep.subr.bf16.mxu1 %v6783_v1  ;;  %6357 = vmatpush3.bf16.msra.mxu0 %v6777_v18 }
 0x425   :  { %6358 = vmatprep.subr.bf16.mxu0 %v6783_v1 }
 0x427   :  { %6259 = vmatpush3.bf16.msra.mxu1 %v6754_v46 }
 0x428   :  { %6260 = vmatprep.subr.bf16.mxu1 %v6783_v1  ;;  %6359 = vmatpush3.bf16.msra.mxu0 %v6778_v29 }
 0x429   :  { %6360 = vmatprep.subr.bf16.mxu0 %v6783_v1 }
 0x42b   :  { %6261 = vmatpush3.bf16.msra.mxu1 %v6755_v3  ;;  %v6781_v3 = vld [vmem:[%s8240_s9 + $0x30] sm:$0xff]  }
 0x42c   :  { %6262 = vmatprep.subr.bf16.mxu1 %v6783_v1  ;;  %6361 = vmatpush3.bf16.msra.mxu0 %v6779_v10 }
 0x42d   :  { %v3425_v43 = vpop.f32.mrb[44].mxu1  ;;  %6362 = vmatprep.subr.bf16.mxu0 %v6783_v1 }
 0x42e   :  { %v3431_v27 = vadd.f32 %v3425_v43, %v3325_v40  ;;  %v6090_v45 = vpop.f32.mrb[45].mxu1  ;;  %v6772_v40 = vld [vmem:[%s8239_s7 + $0x28] sm:$0xff]  }
 0x42f   :  { %v3428_v52 = vpop.f32.mrb[46].mxu1  ;;  %6263 = vmatpush3.bf16.msra.mxu1 %v6756_v30 }
 0x430   :  { %v6091_v11 = vpop.f32.mrb[47].mxu1  ;;  %6264 = vmatprep.subr.bf16.mxu1 %v6783_v1  ;;  %6363 = vmatpush3.bf16.msra.mxu0 %v6780_v5 }
 0x431   :  { %6364 = vmatprep.subr.bf16.mxu0 %v6783_v1 }
 0x433   :  { %6265 = vmatpush3.bf16.msra.mxu1 %v6757_v8 }
 0x434   :  { %6266 = vmatprep.subr.bf16.mxu1 %v6783_v1  ;;  %6365 = vmatpush3.bf16.msra.mxu0 %v6781_v3 }
 0x435   :  { %6366 = vmatprep.subr.bf16.mxu0 %v6783_v1 }
 0x437   :  { %6267 = vmatpush3.bf16.msra.mxu1 %v6758_v47 }
 0x438   :  { %6292 = vmatprep.subr.bf16.mxu1 %v6783_v1 }
 0x43a   :  { %6269 = vmatmul.mubr.bf16.vlgmr.msra.gmra.mrb[72].mxu1 %v4280_v51 }
 0x43b   :  { %6293 = vmatpush3.bf16.msra.mxu1 %v6759_v22  ;;  %6308 = vmatprep.mubr.msk.bf16.mxu1 %vm6785_vm0, %v6783_v1 }
 0x43c   :  { %6294 = vmatprep.subr.bf16.mxu1 %v6783_v1 }
 0x43d   :  { %v8125_v20 = vpop.f32.mrb[60].mxu0 }
 0x43e   :  { %v6330_v38 = vpop.f32.mrb[61].mxu0 }
 0x43f   :  { %6295 = vmatpush3.bf16.msra.mxu1 %v6760_v23  ;;  %v4700_v44 = vpop.f32.mrb[62].mxu0 }
 0x440   :  { %v6331_v33 = vpop.f32.mrb[63].mxu0  ;;  %6296 = vmatprep.subr.bf16.mxu1 %v6783_v1 }
 0x443   :  { %6297 = vmatpush3.bf16.msra.mxu1 %v6761_v26 }
 0x444   :  { %6298 = vmatprep.subr.bf16.mxu1 %v6783_v1 }
 0x447   :  { %6299 = vmatpush3.bf16.msra.mxu1 %v6762_v12 }
 0x448   :  { %6300 = vmatprep.subr.bf16.mxu1 %v6783_v1 }
 0x44b   :  { %6301 = vmatpush3.bf16.msra.mxu1 %v6763_v4 }
 0x44c   :  { %6302 = vmatprep.subr.bf16.mxu1 %v6783_v1 }
 0x44d   :  { %v3531_v9 = vpop.f32.mrb[48].mxu1 }
 0x44e   :  { %v3537_v57 = vadd.f32 %v3531_v9, %v3431_v27  ;;  %v6110_v56 = vpop.f32.mrb[49].mxu1 }
 0x44f   :  { %v3534_v37 = vpop.f32.mrb[50].mxu1  ;;  %6303 = vmatpush3.bf16.msra.mxu1 %v6764_v58 }
 0x450   :  { %v6111_v62 = vpop.f32.mrb[51].mxu1  ;;  %6304 = vmatprep.subr.bf16.mxu1 %v6783_v1 }
 0x453   :  { %6305 = vmatpush3.bf16.msra.mxu1 %v6765_v63  ;;  %v6782_v63 = vld [vmem:[%s8240_s9 + $0x38] sm:$0xff]  }
 0x454   :  { %6306 = vmatprep.subr.bf16.mxu1 %v6783_v1  ;;  %6367 = vmatpush3.bf16.msra.mxu0 %v6782_v63 }
 0x457   :  { %6307 = vmatpush3.bf16.msra.mxu1 %v6766_v13 }
 0x458   :  { %6332 = vmatprep.subr.bf16.mxu1 %v6783_v1 }
 0x45a   :  { %6309 = vmatmul.mubr.bf16.vlgmr.msra.gmra.mrb[76].mxu1 %v4492_v0 }
 0x45b   :  { %6348 = vmatprep.mubr.msk.bf16.mxu1 %vm6785_vm0, %v6783_v1  ;;  %6333 = vmatpush3.bf16.msra.mxu1 %v6767_v42 }
 0x45c   :  { %6334 = vmatprep.subr.bf16.mxu1 %v6783_v1 }
 0x45f   :  { %6335 = vmatpush3.bf16.msra.mxu1 %v6768_v7 }
 0x460   :  { %6336 = vmatprep.subr.bf16.mxu1 %v6783_v1 }
 0x463   :  { %6337 = vmatpush3.bf16.msra.mxu1 %v6769_v55 }
 0x464   :  { %6338 = vmatprep.subr.bf16.mxu1 %v6783_v1 }
 0x467   :  { %6339 = vmatpush3.bf16.msra.mxu1 %v6770_v17 }
 0x468   :  { %6340 = vmatprep.subr.bf16.mxu1 %v6783_v1 }
 0x46b   :  { %6341 = vmatpush3.bf16.msra.mxu1 %v6771_v34 }
 0x46c   :  { %6342 = vmatprep.subr.bf16.mxu1 %v6783_v1 }
 0x46d   :  { %v3637_v48 = vpop.f32.mrb[52].mxu1 }
 0x46e   :  { %v3643_v49 = vadd.f32 %v3637_v48, %v3537_v57  ;;  %v6130_v24 = vpop.f32.mrb[53].mxu1 }
 0x46f   :  { %v3640_v39 = vpop.f32.mrb[54].mxu1  ;;  %6343 = vmatpush3.bf16.msra.mxu1 %v6772_v40 }
 0x470   :  { %v6131_v61 = vpop.f32.mrb[55].mxu1  ;;  %6344 = vmatprep.subr.bf16.mxu1 %v6783_v1 }
 0x473   :  { %6345 = vmatpush3.bf16.msra.mxu1 %v6773_v14 }
 0x474   :  { %6346 = vmatprep.subr.bf16.mxu1 %v6783_v1  ;;  %v5207_v1 = vld [vmem:[%s8241_s6] ss:$0 sm:$0xff] }
 0x477   :  { %6347 = vmatpush3.bf16.msra.mxu1 %v6774_v36 }
 0x48d   :  { %v3743_v41 = vpop.f32.mrb[56].mxu1 }
 0x48e   :  { %v3749_v31 = vadd.f32 %v3743_v41, %v3643_v49  ;;  %v6150_v6 = vpop.f32.mrb[57].mxu1 }
 0x48f   :  { %v3746_v59 = vpop.f32.mrb[58].mxu1 }
 0x490   :  { %v6151_v28 = vpop.f32.mrb[59].mxu1 }
 0x4ad   :  { %v3849_v2 = vpop.f32.mrb[60].mxu1 }
 0x4ae   :  { %v3855_v50 = vadd.f32 %v3849_v2, %v3749_v31  ;;  %v6170_v16 = vpop.f32.mrb[61].mxu1 }
 0x4af   :  { %v3852_v35 = vpop.f32.mrb[62].mxu1 }
 0x4b0   :  { %v6171_v21 = vpop.f32.mrb[63].mxu1 }
 0x4cd   :  { %v3955_v46 = vpop.f32.mrb[64].mxu1 }
 0x4ce   :  { %v3961_v30 = vadd.f32 %v3955_v46, %v3855_v50  ;;  %v6190_v43 = vpop.f32.mrb[65].mxu1 }
 0x4cf   :  { %v3958_v27 = vpop.f32.mrb[66].mxu1 }
 0x4d0   :  { %v6191_v45 = vpop.f32.mrb[67].mxu1  ;;  %v4067_v52 = vadd.f32 %v8014_v32, %v3961_v30 }
 0x4ed   :  { %v4167_v8 = vpop.f32.mrb[68].mxu1 }
 0x4ee   :  { %v4173_v11 = vadd.f32 %v4167_v8, %v4067_v52  ;;  %v6230_v47 = vpop.f32.mrb[69].mxu1 }
 0x4ef   :  { %v4170_v53 = vpop.f32.mrb[70].mxu1 }
 0x4f0   :  { %v6231_v22 = vpop.f32.mrb[71].mxu1  ;;  %v4279_v51 = vadd.f32 %v8051_v19, %v4173_v11 }
 0x50d   :  { %v4379_v23 = vpop.f32.mrb[72].mxu1 }
 0x50e   :  { %v4385_v38 = vadd.f32 %v4379_v23, %v4279_v51  ;;  %v6270_v44 = vpop.f32.mrb[73].mxu1 }
 0x50f   :  { %v4382_v26 = vpop.f32.mrb[74].mxu1 }
 0x510   :  { %v6271_v33 = vpop.f32.mrb[75].mxu1  ;;  %v4491_v12 = vadd.f32 %v8088_v15, %v4385_v38  ;;  %v5208_v15 = vld [vmem:[%s8242_s8] ss:$0 sm:$0xff] }
 0x52d   :  { %v4591_v4 = vpop.f32.mrb[76].mxu1 }
 0x52e   :  { %v4597_v58 = vadd.f32 %v4591_v4, %v4491_v12  ;;  %v6310_v32 = vpop.f32.mrb[77].mxu1 }
 0x52f   :  { %v4594_v9 = vpop.f32.mrb[78].mxu1 }
 0x530   :  { %v4703_v57 = vadd.f32 %v8125_v20, %v4597_v58  ;;  %v6311_v56 = vpop.f32.mrb[79].mxu1  ;;  %v5217_v20 = vld [vmem:[%s8243_s10] ss:$0 sm:$0xff] }
 0x532   :  { %v4711_v37 = vadd.f32 %v5207_v1, %v4703_v57 }
 0x534   :  { %v4712_v19 = vpack.c.bf16 %v4711_v37, %v4711_v37 }
 0x536   :  { %6349 = vmatmul.mubr.bf16.vlgmr.msra.gmra.mrb[80].mxu1 %v4712_v19 }
 0x609   :  { %v4818_v62 = vpop.f32.mrb[80].mxu1 }
 0x60a   :  { %v4819_v13 = vadd.f32 %v5208_v15, %v4818_v62  ;;  %v6350_v25 = vpop.f32.mrb[81].mxu1 }
 0x60b   :  { %v4821_v0 = vpop.f32.mrb[82].mxu1 }
 0x60c   :  { %v4824_v48 = vpack.c.bf16 %v4819_v13, %v4819_v13  ;;  %v6351_v49 = vpop.f32.mrb[83].mxu1 }
 0x60e   :  { %6369 = vmatmul.mubr.bf16.vlgmr.msra.gmra.mrb[64].mxu0 %v4824_v48 }
 0x6e1   :  { %v4930_v24 = vpop.f32.mrb[64].mxu0 }
 0x6e2   :  { %v4931_v39 = vadd.f32 %v5217_v20, %v4930_v24  ;;  %v6370_v61 = vpop.f32.mrb[65].mxu0 }
 0x6e3   :  { %v4933_v41 = vpop.f32.mrb[66].mxu0 }
 0x6e4   :  { %4936 = vst [vmem:[%s8244_s11] sm:$0xff] %v4931_v39  ;;  %v6371_v31 = vpop.f32.mrb[67].mxu0 }

</bundles_post_ra>
